<compile_context>
chip_gen: v6e
topology: v6e:2x2x1
jax: 0.10.0
libtpu: 0.0.40
codegen_flags: <defaults>
</compile_context>

<pallas_src>
import math

import numpy as np
import jax
import jax.numpy as jnp
from jax.experimental import pallas as pl
from jax.experimental.pallas import tpu as pltpu


def _normalize_params(kernel_size, sigma, dim=3):
    if isinstance(kernel_size, (int, float)):
        kernel_size = [int(kernel_size)] * dim
    else:
        kernel_size = [int(k) for k in kernel_size]
    if isinstance(sigma, (int, float)):
        sigma = [float(sigma)] * dim
    else:
        sigma = [float(s) for s in sigma]
    return kernel_size, sigma


def _gaussian_taps_1d(size, std):
    """Normalized 1D Gaussian taps (the 3D kernel is their outer product)."""
    coords = np.arange(size, dtype=np.float64)
    mean = (size - 1) / 2.0
    g = (1.0 / (std * math.sqrt(2.0 * math.pi))) * np.exp(
        -(((coords - mean) / std) ** 2) / 2.0
    )
    g = g / g.sum()
    return tuple(float(t) for t in g)


def make_gaussian_kernel_3d(kernel_size, sigma, dim=3):
    """Full 3D kernel exactly as the PyTorch module builds it (reference)."""
    kernel_size, sigma = _normalize_params(kernel_size, sigma, dim)
    grids = np.meshgrid(
        *[np.arange(s, dtype=np.float32) for s in kernel_size], indexing="ij"
    )
    k = np.ones((), dtype=np.float32)
    for size, std, mgrid in zip(kernel_size, sigma, grids):
        mean = (size - 1) / 2.0
        k = k * (1.0 / (std * math.sqrt(2.0 * math.pi))
                 * np.exp(-(((mgrid - mean) / std) ** 2) / 2.0))
    k = k / np.sum(k)
    return k.astype(np.float32), kernel_size


def gaussian_smoothing_3d(x, kernel_size=3, sigma=1.0,
                          block_bytes_target=8 * 1024 * 1024):
    """x: (N, C, D, H, W). Depthwise 3D Gaussian blur (zero ConstantPad3d)."""
    ksizes, sigmas = _normalize_params(kernel_size, sigma, dim=3)
    kd, kh, kw = ksizes
    pad = ksizes[0] // 2  # ConstantPad3d(kernel_size[0] // 2, 0)

    N, C, D, H, W = x.shape
    Dp, Hp, Wp = D + 2 * pad, H + 2 * pad, W + 2 * pad
    Do, Ho, Wo = Dp - kd + 1, Hp - kh + 1, Wp - kw + 1  # == D,H,W for odd k

    # Separable 1D taps (exact: normalized outer product == module's kernel).
    taps_d = _gaussian_taps_1d(kd, sigmas[0])
    taps_h = _gaussian_taps_1d(kh, sigmas[1])
    taps_w = _gaussian_taps_1d(kw, sigmas[2])

    # Fuse batch and channel into one grid axis; pick how many channels go
    # into each block from a VMEM budget (in + out double-buffered + scratch).
    NC = N * C
    per_chan_bytes = 4 * (2 * D * H * W + 2 * Do * Ho * Wo + Dp * Hp * Wp)
    bc_cap = max(1, block_bytes_target // per_chan_bytes)
    bc = 1
    for cand in range(1, NC + 1):
        if NC % cand == 0 and cand <= bc_cap:
            bc = cand

    x2 = x.reshape(NC, D, H, W)  # contiguous view, no data movement

    def kernel_fn(x_ref, o_ref, xpad_ref):
        # In-kernel zero padding (ConstantPad3d) into VMEM scratch.
        xpad_ref[...] = jnp.zeros_like(xpad_ref)
        xpad_ref[:, pad:pad + D, pad:pad + H, pad:pad + W] = (
            x_ref[...].astype(jnp.float32))

        # Separable passes, computed slab-by-slab along the output D axis so
        # vreg pressure stays bounded and the store happens immediately.
        for d in range(Do):
            # D pass: (bc, 1, Hp, Wp)  -- outer-dim slices, no lane movement.
            sl = taps_d[0] * xpad_ref[:, d:d + 1, :, :]
            for a in range(1, kd):
                sl = sl + taps_d[a] * xpad_ref[:, d + a:d + a + 1, :, :]
            # H pass: (bc, 1, Ho, Wp) -- sublane-axis shifts only.
            th = taps_h[0] * sl[:, :, 0:Ho, :]
            for b in range(1, kh):
                th = th + taps_h[b] * sl[:, :, b:b + Ho, :]
            # W pass: (bc, 1, Ho, Wo) -- k small lane-axis shifts.
            tw = taps_w[0] * th[:, :, :, 0:Wo]
            for c in range(1, kw):
                tw = tw + taps_w[c] * th[:, :, :, c:c + Wo]
            o_ref[:, d:d + 1, :, :] = tw.astype(o_ref.dtype)

    out = pl.pallas_call(
        kernel_fn,
        out_shape=jax.ShapeDtypeStruct((NC, Do, Ho, Wo), x.dtype),
        grid_spec=pltpu.PrefetchScalarGridSpec(
            num_scalar_prefetch=0,
            grid=(NC // bc,),
            in_specs=[pl.BlockSpec((bc, D, H, W), lambda i: (i, 0, 0, 0))],
            out_specs=pl.BlockSpec((bc, Do, Ho, Wo), lambda i: (i, 0, 0, 0)),
            scratch_shapes=[pltpu.VMEM((bc, Dp, Hp, Wp), jnp.float32)],
        ),
        compiler_params=pltpu.CompilerParams(
            dimension_semantics=("parallel",),
            vmem_limit_bytes=64 * 1024 * 1024,
        ),
    )(x2)
    return out.reshape(N, C, Do, Ho, Wo)


def reference_numpy(x, kernel_size=3, sigma=1.0):
    """Direct numpy re-implementation of the PyTorch forward for checking."""
    w, ks = make_gaussian_kernel_3d(kernel_size, sigma, dim=3)
    pad = ks[0] // 2
    xn = np.asarray(x)
    N, C, D, H, W = xn.shape
    xp = np.pad(xn, ((0, 0), (0, 0), (pad, pad), (pad, pad), (pad, pad)))
    kd, kh, kw = w.shape
    Do, Ho, Wo = D + 2 * pad - kd + 1, H + 2 * pad - kh + 1, W + 2 * pad - kw + 1
    out = np.zeros((N, C, Do, Ho, Wo), np.float32)
    for a in range(kd):
        for b in range(kh):
            for c in range(kw):
                out += w[a, b, c] * xp[:, :, a:a + Do, b:b + Ho, c:c + Wo]
    return out


if __name__ == "__main__":
    key = jax.random.PRNGKey(0)
    N, C, D, H, W = 2, 4, 8, 8, 8  # small NCDHW volume (conv3d semantics)
    x = jax.random.normal(key, (N, C, D, H, W), dtype=jnp.float32)

    y = gaussian_smoothing_3d(x, kernel_size=3, sigma=1.0)
    y = jax.block_until_ready(y)

    y_ref = reference_numpy(x, kernel_size=3, sigma=1.0)
    assert y.shape == y_ref.shape
    np.testing.assert_allclose(np.asarray(y), y_ref, rtol=1e-5, atol=1e-5)

    print("KERNEL_OK")
</pallas_src>

<mosaic_0001>
module attributes {stable_mosaic.version = 11 : i64} {
  func.func @kernel_fn(%arg0: i32, %arg1: memref<8x8x8x8xf32, #tpu.memory_space<vmem>>, %arg2: memref<8x8x8x8xf32, #tpu.memory_space<vmem>>, %arg3: memref<8x10x10x10xf32, #tpu.memory_space<vmem>>) attributes {dimension_semantics = [#tpu.dimension_semantics<parallel>], iteration_bounds = array<i64: 1>, scalar_prefetch = 0 : i64, scratch_operands = 1 : i64, tpu.core_type = #tpu.core_type<tc>, window_params = [{transform_indices = @transform_0, window_bounds = array<i64: 8, 8, 8, 8>}, {transform_indices = @transform_1, window_bounds = array<i64: 8, 8, 8, 8>}]} {
    %cst = arith.constant 0.000000e+00 : f32
    %0 = vector.broadcast %cst : f32 to vector<8x10x10x10xf32>
    %c0 = arith.constant 0 : index
    %c0_0 = arith.constant 0 : index
    %c0_1 = arith.constant 0 : index
    %c0_2 = arith.constant 0 : index
    %1 = vector.load %arg3[%c0, %c0_0, %c0_1, %c0_2] : memref<8x10x10x10xf32, #tpu.memory_space<vmem>>, vector<8x10x10x10xf32>
    tpu.vector_store %arg3[%c0, %c0_0, %c0_1, %c0_2], %0 {strides = array<i32>} : memref<8x10x10x10xf32, #tpu.memory_space<vmem>>, vector<8x10x10x10xf32>,
    %c0_3 = arith.constant 0 : index
    %c0_4 = arith.constant 0 : index
    %c0_5 = arith.constant 0 : index
    %c0_6 = arith.constant 0 : index
    %2 = vector.load %arg1[%c0_3, %c0_4, %c0_5, %c0_6] : memref<8x8x8x8xf32, #tpu.memory_space<vmem>>, vector<8x8x8x8xf32>
    %c0_7 = arith.constant 0 : index
    %c1 = arith.constant 1 : index
    %c1_8 = arith.constant 1 : index
    %c1_9 = arith.constant 1 : index
    %3 = vector.load %arg3[%c0_7, %c1, %c1_8, %c1_9] : memref<8x10x10x10xf32, #tpu.memory_space<vmem>>, vector<8x8x8x8xf32>
    tpu.vector_store %arg3[%c0_7, %c1, %c1_8, %c1_9], %2 {strides = array<i32>} : memref<8x10x10x10xf32, #tpu.memory_space<vmem>>, vector<8x8x8x8xf32>,
    %c0_10 = arith.constant 0 : index
    %c0_11 = arith.constant 0 : index
    %c0_12 = arith.constant 0 : index
    %c0_13 = arith.constant 0 : index
    %4 = vector.load %arg3[%c0_10, %c0_11, %c0_12, %c0_13] : memref<8x10x10x10xf32, #tpu.memory_space<vmem>>, vector<8x1x10x10xf32>
    %cst_14 = arith.constant 0.274068624 : f32
    %5 = vector.broadcast %cst_14 : f32 to vector<8x1x10x10xf32>
    %6 = arith.mulf %5, %4 : vector<8x1x10x10xf32>
    %c0_15 = arith.constant 0 : index
    %c1_16 = arith.constant 1 : index
    %c0_17 = arith.constant 0 : index
    %c0_18 = arith.constant 0 : index
    %7 = vector.load %arg3[%c0_15, %c1_16, %c0_17, %c0_18] : memref<8x10x10x10xf32, #tpu.memory_space<vmem>>, vector<8x1x10x10xf32>
    %cst_19 = arith.constant 0.451862752 : f32
    %8 = vector.broadcast %cst_19 : f32 to vector<8x1x10x10xf32>
    %9 = arith.mulf %8, %7 : vector<8x1x10x10xf32>
    %10 = arith.addf %6, %9 : vector<8x1x10x10xf32>
    %c0_20 = arith.constant 0 : index
    %c2 = arith.constant 2 : index
    %c0_21 = arith.constant 0 : index
    %c0_22 = arith.constant 0 : index
    %11 = vector.load %arg3[%c0_20, %c2, %c0_21, %c0_22] : memref<8x10x10x10xf32, #tpu.memory_space<vmem>>, vector<8x1x10x10xf32>
    %cst_23 = arith.constant 0.274068624 : f32
    %12 = vector.broadcast %cst_23 : f32 to vector<8x1x10x10xf32>
    %13 = arith.mulf %12, %11 : vector<8x1x10x10xf32>
    %14 = arith.addf %10, %13 : vector<8x1x10x10xf32>
    %15 = vector.extract_strided_slice %14 {offsets = [0, 0, 0, 0], sizes = [8, 1, 8, 10], strides = [1, 1, 1, 1]} : vector<8x1x10x10xf32> to vector<8x1x8x10xf32>
    %cst_24 = arith.constant 0.274068624 : f32
    %16 = vector.broadcast %cst_24 : f32 to vector<8x1x8x10xf32>
    %17 = arith.mulf %16, %15 : vector<8x1x8x10xf32>
    %18 = vector.extract_strided_slice %14 {offsets = [0, 0, 1, 0], sizes = [8, 1, 8, 10], strides = [1, 1, 1, 1]} : vector<8x1x10x10xf32> to vector<8x1x8x10xf32>
    %cst_25 = arith.constant 0.451862752 : f32
    %19 = vector.broadcast %cst_25 : f32 to vector<8x1x8x10xf32>
    %20 = arith.mulf %19, %18 : vector<8x1x8x10xf32>
    %21 = arith.addf %17, %20 : vector<8x1x8x10xf32>
    %22 = vector.extract_strided_slice %14 {offsets = [0, 0, 2, 0], sizes = [8, 1, 8, 10], strides = [1, 1, 1, 1]} : vector<8x1x10x10xf32> to vector<8x1x8x10xf32>
    %cst_26 = arith.constant 0.274068624 : f32
    %23 = vector.broadcast %cst_26 : f32 to vector<8x1x8x10xf32>
    %24 = arith.mulf %23, %22 : vector<8x1x8x10xf32>
    %25 = arith.addf %21, %24 : vector<8x1x8x10xf32>
    %26 = vector.extract_strided_slice %25 {offsets = [0, 0, 0, 0], sizes = [8, 1, 8, 8], strides = [1, 1, 1, 1]} : vector<8x1x8x10xf32> to vector<8x1x8x8xf32>
    %cst_27 = arith.constant 0.274068624 : f32
    %27 = vector.broadcast %cst_27 : f32 to vector<8x1x8x8xf32>
    %28 = arith.mulf %27, %26 : vector<8x1x8x8xf32>
    %29 = vector.extract_strided_slice %25 {offsets = [0, 0, 0, 1], sizes = [8, 1, 8, 8], strides = [1, 1, 1, 1]} : vector<8x1x8x10xf32> to vector<8x1x8x8xf32>
    %cst_28 = arith.constant 0.451862752 : f32
    %30 = vector.broadcast %cst_28 : f32 to vector<8x1x8x8xf32>
    %31 = arith.mulf %30, %29 : vector<8x1x8x8xf32>
    %32 = arith.addf %28, %31 : vector<8x1x8x8xf32>
    %33 = vector.extract_strided_slice %25 {offsets = [0, 0, 0, 2], sizes = [8, 1, 8, 8], strides = [1, 1, 1, 1]} : vector<8x1x8x10xf32> to vector<8x1x8x8xf32>
    %cst_29 = arith.constant 0.274068624 : f32
    %34 = vector.broadcast %cst_29 : f32 to vector<8x1x8x8xf32>
    %35 = arith.mulf %34, %33 : vector<8x1x8x8xf32>
    %36 = arith.addf %32, %35 : vector<8x1x8x8xf32>
    %c0_30 = arith.constant 0 : index
    %c0_31 = arith.constant 0 : index
    %c0_32 = arith.constant 0 : index
    %c0_33 = arith.constant 0 : index
    %37 = vector.load %arg2[%c0_30, %c0_31, %c0_32, %c0_33] : memref<8x8x8x8xf32, #tpu.memory_space<vmem>>, vector<8x1x8x8xf32>
    tpu.vector_store %arg2[%c0_30, %c0_31, %c0_32, %c0_33], %36 {strides = array<i32>} : memref<8x8x8x8xf32, #tpu.memory_space<vmem>>, vector<8x1x8x8xf32>,
    %c0_34 = arith.constant 0 : index
    %c1_35 = arith.constant 1 : index
    %c0_36 = arith.constant 0 : index
    %c0_37 = arith.constant 0 : index
    %38 = vector.load %arg3[%c0_34, %c1_35, %c0_36, %c0_37] : memref<8x10x10x10xf32, #tpu.memory_space<vmem>>, vector<8x1x10x10xf32>
    %cst_38 = arith.constant 0.274068624 : f32
    %39 = vector.broadcast %cst_38 : f32 to vector<8x1x10x10xf32>
    %40 = arith.mulf %39, %38 : vector<8x1x10x10xf32>
    %c0_39 = arith.constant 0 : index
    %c2_40 = arith.constant 2 : index
    %c0_41 = arith.constant 0 : index
    %c0_42 = arith.constant 0 : index
    %41 = vector.load %arg3[%c0_39, %c2_40, %c0_41, %c0_42] : memref<8x10x10x10xf32, #tpu.memory_space<vmem>>, vector<8x1x10x10xf32>
    %cst_43 = arith.constant 0.451862752 : f32
    %42 = vector.broadcast %cst_43 : f32 to vector<8x1x10x10xf32>
    %43 = arith.mulf %42, %41 : vector<8x1x10x10xf32>
    %44 = arith.addf %40, %43 : vector<8x1x10x10xf32>
    %c0_44 = arith.constant 0 : index
    %c3 = arith.constant 3 : index
    %c0_45 = arith.constant 0 : index
    %c0_46 = arith.constant 0 : index
    %45 = vector.load %arg3[%c0_44, %c3, %c0_45, %c0_46] : memref<8x10x10x10xf32, #tpu.memory_space<vmem>>, vector<8x1x10x10xf32>
    %cst_47 = arith.constant 0.274068624 : f32
    %46 = vector.broadcast %cst_47 : f32 to vector<8x1x10x10xf32>
    %47 = arith.mulf %46, %45 : vector<8x1x10x10xf32>
    %48 = arith.addf %44, %47 : vector<8x1x10x10xf32>
    %49 = vector.extract_strided_slice %48 {offsets = [0, 0, 0, 0], sizes = [8, 1, 8, 10], strides = [1, 1, 1, 1]} : vector<8x1x10x10xf32> to vector<8x1x8x10xf32>
    %cst_48 = arith.constant 0.274068624 : f32
    %50 = vector.broadcast %cst_48 : f32 to vector<8x1x8x10xf32>
    %51 = arith.mulf %50, %49 : vector<8x1x8x10xf32>
    %52 = vector.extract_strided_slice %48 {offsets = [0, 0, 1, 0], sizes = [8, 1, 8, 10], strides = [1, 1, 1, 1]} : vector<8x1x10x10xf32> to vector<8x1x8x10xf32>
    %cst_49 = arith.constant 0.451862752 : f32
    %53 = vector.broadcast %cst_49 : f32 to vector<8x1x8x10xf32>
    %54 = arith.mulf %53, %52 : vector<8x1x8x10xf32>
    %55 = arith.addf %51, %54 : vector<8x1x8x10xf32>
    %56 = vector.extract_strided_slice %48 {offsets = [0, 0, 2, 0], sizes = [8, 1, 8, 10], strides = [1, 1, 1, 1]} : vector<8x1x10x10xf32> to vector<8x1x8x10xf32>
    %cst_50 = arith.constant 0.274068624 : f32
    %57 = vector.broadcast %cst_50 : f32 to vector<8x1x8x10xf32>
    %58 = arith.mulf %57, %56 : vector<8x1x8x10xf32>
    %59 = arith.addf %55, %58 : vector<8x1x8x10xf32>
    %60 = vector.extract_strided_slice %59 {offsets = [0, 0, 0, 0], sizes = [8, 1, 8, 8], strides = [1, 1, 1, 1]} : vector<8x1x8x10xf32> to vector<8x1x8x8xf32>
    %cst_51 = arith.constant 0.274068624 : f32
    %61 = vector.broadcast %cst_51 : f32 to vector<8x1x8x8xf32>
    %62 = arith.mulf %61, %60 : vector<8x1x8x8xf32>
    %63 = vector.extract_strided_slice %59 {offsets = [0, 0, 0, 1], sizes = [8, 1, 8, 8], strides = [1, 1, 1, 1]} : vector<8x1x8x10xf32> to vector<8x1x8x8xf32>
    %cst_52 = arith.constant 0.451862752 : f32
    %64 = vector.broadcast %cst_52 : f32 to vector<8x1x8x8xf32>
    %65 = arith.mulf %64, %63 : vector<8x1x8x8xf32>
    %66 = arith.addf %62, %65 : vector<8x1x8x8xf32>
    %67 = vector.extract_strided_slice %59 {offsets = [0, 0, 0, 2], sizes = [8, 1, 8, 8], strides = [1, 1, 1, 1]} : vector<8x1x8x10xf32> to vector<8x1x8x8xf32>
    %cst_53 = arith.constant 0.274068624 : f32
    %68 = vector.broadcast %cst_53 : f32 to vector<8x1x8x8xf32>
    %69 = arith.mulf %68, %67 : vector<8x1x8x8xf32>
    %70 = arith.addf %66, %69 : vector<8x1x8x8xf32>
    %c0_54 = arith.constant 0 : index
    %c1_55 = arith.constant 1 : index
    %c0_56 = arith.constant 0 : index
    %c0_57 = arith.constant 0 : index
    %71 = vector.load %arg2[%c0_54, %c1_55, %c0_56, %c0_57] : memref<8x8x8x8xf32, #tpu.memory_space<vmem>>, vector<8x1x8x8xf32>
    tpu.vector_store %arg2[%c0_54, %c1_55, %c0_56, %c0_57], %70 {strides = array<i32>} : memref<8x8x8x8xf32, #tpu.memory_space<vmem>>, vector<8x1x8x8xf32>,
    %c0_58 = arith.constant 0 : index
    %c2_59 = arith.constant 2 : index
    %c0_60 = arith.constant 0 : index
    %c0_61 = arith.constant 0 : index
    %72 = vector.load %arg3[%c0_58, %c2_59, %c0_60, %c0_61] : memref<8x10x10x10xf32, #tpu.memory_space<vmem>>, vector<8x1x10x10xf32>
    %cst_62 = arith.constant 0.274068624 : f32
    %73 = vector.broadcast %cst_62 : f32 to vector<8x1x10x10xf32>
    %74 = arith.mulf %73, %72 : vector<8x1x10x10xf32>
    %c0_63 = arith.constant 0 : index
    %c3_64 = arith.constant 3 : index
    %c0_65 = arith.constant 0 : index
    %c0_66 = arith.constant 0 : index
    %75 = vector.load %arg3[%c0_63, %c3_64, %c0_65, %c0_66] : memref<8x10x10x10xf32, #tpu.memory_space<vmem>>, vector<8x1x10x10xf32>
    %cst_67 = arith.constant 0.451862752 : f32
    %76 = vector.broadcast %cst_67 : f32 to vector<8x1x10x10xf32>
    %77 = arith.mulf %76, %75 : vector<8x1x10x10xf32>
    %78 = arith.addf %74, %77 : vector<8x1x10x10xf32>
    %c0_68 = arith.constant 0 : index
    %c4 = arith.constant 4 : index
    %c0_69 = arith.constant 0 : index
    %c0_70 = arith.constant 0 : index
    %79 = vector.load %arg3[%c0_68, %c4, %c0_69, %c0_70] : memref<8x10x10x10xf32, #tpu.memory_space<vmem>>, vector<8x1x10x10xf32>
    %cst_71 = arith.constant 0.274068624 : f32
    %80 = vector.broadcast %cst_71 : f32 to vector<8x1x10x10xf32>
    %81 = arith.mulf %80, %79 : vector<8x1x10x10xf32>
    %82 = arith.addf %78, %81 : vector<8x1x10x10xf32>
    %83 = vector.extract_strided_slice %82 {offsets = [0, 0, 0, 0], sizes = [8, 1, 8, 10], strides = [1, 1, 1, 1]} : vector<8x1x10x10xf32> to vector<8x1x8x10xf32>
    %cst_72 = arith.constant 0.274068624 : f32
    %84 = vector.broadcast %cst_72 : f32 to vector<8x1x8x10xf32>
    %85 = arith.mulf %84, %83 : vector<8x1x8x10xf32>
    %86 = vector.extract_strided_slice %82 {offsets = [0, 0, 1, 0], sizes = [8, 1, 8, 10], strides = [1, 1, 1, 1]} : vector<8x1x10x10xf32> to vector<8x1x8x10xf32>
    %cst_73 = arith.constant 0.451862752 : f32
    %87 = vector.broadcast %cst_73 : f32 to vector<8x1x8x10xf32>
    %88 = arith.mulf %87, %86 : vector<8x1x8x10xf32>
    %89 = arith.addf %85, %88 : vector<8x1x8x10xf32>
    %90 = vector.extract_strided_slice %82 {offsets = [0, 0, 2, 0], sizes = [8, 1, 8, 10], strides = [1, 1, 1, 1]} : vector<8x1x10x10xf32> to vector<8x1x8x10xf32>
    %cst_74 = arith.constant 0.274068624 : f32
    %91 = vector.broadcast %cst_74 : f32 to vector<8x1x8x10xf32>
    %92 = arith.mulf %91, %90 : vector<8x1x8x10xf32>
    %93 = arith.addf %89, %92 : vector<8x1x8x10xf32>
    %94 = vector.extract_strided_slice %93 {offsets = [0, 0, 0, 0], sizes = [8, 1, 8, 8], strides = [1, 1, 1, 1]} : vector<8x1x8x10xf32> to vector<8x1x8x8xf32>
    %cst_75 = arith.constant 0.274068624 : f32
    %95 = vector.broadcast %cst_75 : f32 to vector<8x1x8x8xf32>
    %96 = arith.mulf %95, %94 : vector<8x1x8x8xf32>
    %97 = vector.extract_strided_slice %93 {offsets = [0, 0, 0, 1], sizes = [8, 1, 8, 8], strides = [1, 1, 1, 1]} : vector<8x1x8x10xf32> to vector<8x1x8x8xf32>
    %cst_76 = arith.constant 0.451862752 : f32
    %98 = vector.broadcast %cst_76 : f32 to vector<8x1x8x8xf32>
    %99 = arith.mulf %98, %97 : vector<8x1x8x8xf32>
    %100 = arith.addf %96, %99 : vector<8x1x8x8xf32>
    %101 = vector.extract_strided_slice %93 {offsets = [0, 0, 0, 2], sizes = [8, 1, 8, 8], strides = [1, 1, 1, 1]} : vector<8x1x8x10xf32> to vector<8x1x8x8xf32>
    %cst_77 = arith.constant 0.274068624 : f32
    %102 = vector.broadcast %cst_77 : f32 to vector<8x1x8x8xf32>
    %103 = arith.mulf %102, %101 : vector<8x1x8x8xf32>
    %104 = arith.addf %100, %103 : vector<8x1x8x8xf32>
    %c0_78 = arith.constant 0 : index
    %c2_79 = arith.constant 2 : index
    %c0_80 = arith.constant 0 : index
    %c0_81 = arith.constant 0 : index
    %105 = vector.load %arg2[%c0_78, %c2_79, %c0_80, %c0_81] : memref<8x8x8x8xf32, #tpu.memory_space<vmem>>, vector<8x1x8x8xf32>
    tpu.vector_store %arg2[%c0_78, %c2_79, %c0_80, %c0_81], %104 {strides = array<i32>} : memref<8x8x8x8xf32, #tpu.memory_space<vmem>>, vector<8x1x8x8xf32>,
    %c0_82 = arith.constant 0 : index
    %c3_83 = arith.constant 3 : index
    %c0_84 = arith.constant 0 : index
    %c0_85 = arith.constant 0 : index
    %106 = vector.load %arg3[%c0_82, %c3_83, %c0_84, %c0_85] : memref<8x10x10x10xf32, #tpu.memory_space<vmem>>, vector<8x1x10x10xf32>
    %cst_86 = arith.constant 0.274068624 : f32
    %107 = vector.broadcast %cst_86 : f32 to vector<8x1x10x10xf32>
    %108 = arith.mulf %107, %106 : vector<8x1x10x10xf32>
    %c0_87 = arith.constant 0 : index
    %c4_88 = arith.constant 4 : index
    %c0_89 = arith.constant 0 : index
    %c0_90 = arith.constant 0 : index
    %109 = vector.load %arg3[%c0_87, %c4_88, %c0_89, %c0_90] : memref<8x10x10x10xf32, #tpu.memory_space<vmem>>, vector<8x1x10x10xf32>
    %cst_91 = arith.constant 0.451862752 : f32
    %110 = vector.broadcast %cst_91 : f32 to vector<8x1x10x10xf32>
    %111 = arith.mulf %110, %109 : vector<8x1x10x10xf32>
    %112 = arith.addf %108, %111 : vector<8x1x10x10xf32>
    %c0_92 = arith.constant 0 : index
    %c5 = arith.constant 5 : index
    %c0_93 = arith.constant 0 : index
    %c0_94 = arith.constant 0 : index
    %113 = vector.load %arg3[%c0_92, %c5, %c0_93, %c0_94] : memref<8x10x10x10xf32, #tpu.memory_space<vmem>>, vector<8x1x10x10xf32>
    %cst_95 = arith.constant 0.274068624 : f32
    %114 = vector.broadcast %cst_95 : f32 to vector<8x1x10x10xf32>
    %115 = arith.mulf %114, %113 : vector<8x1x10x10xf32>
    %116 = arith.addf %112, %115 : vector<8x1x10x10xf32>
    %117 = vector.extract_strided_slice %116 {offsets = [0, 0, 0, 0], sizes = [8, 1, 8, 10], strides = [1, 1, 1, 1]} : vector<8x1x10x10xf32> to vector<8x1x8x10xf32>
    %cst_96 = arith.constant 0.274068624 : f32
    %118 = vector.broadcast %cst_96 : f32 to vector<8x1x8x10xf32>
    %119 = arith.mulf %118, %117 : vector<8x1x8x10xf32>
    %120 = vector.extract_strided_slice %116 {offsets = [0, 0, 1, 0], sizes = [8, 1, 8, 10], strides = [1, 1, 1, 1]} : vector<8x1x10x10xf32> to vector<8x1x8x10xf32>
    %cst_97 = arith.constant 0.451862752 : f32
    %121 = vector.broadcast %cst_97 : f32 to vector<8x1x8x10xf32>
    %122 = arith.mulf %121, %120 : vector<8x1x8x10xf32>
    %123 = arith.addf %119, %122 : vector<8x1x8x10xf32>
    %124 = vector.extract_strided_slice %116 {offsets = [0, 0, 2, 0], sizes = [8, 1, 8, 10], strides = [1, 1, 1, 1]} : vector<8x1x10x10xf32> to vector<8x1x8x10xf32>
    %cst_98 = arith.constant 0.274068624 : f32
    %125 = vector.broadcast %cst_98 : f32 to vector<8x1x8x10xf32>
    %126 = arith.mulf %125, %124 : vector<8x1x8x10xf32>
    %127 = arith.addf %123, %126 : vector<8x1x8x10xf32>
    %128 = vector.extract_strided_slice %127 {offsets = [0, 0, 0, 0], sizes = [8, 1, 8, 8], strides = [1, 1, 1, 1]} : vector<8x1x8x10xf32> to vector<8x1x8x8xf32>
    %cst_99 = arith.constant 0.274068624 : f32
    %129 = vector.broadcast %cst_99 : f32 to vector<8x1x8x8xf32>
    %130 = arith.mulf %129, %128 : vector<8x1x8x8xf32>
    %131 = vector.extract_strided_slice %127 {offsets = [0, 0, 0, 1], sizes = [8, 1, 8, 8], strides = [1, 1, 1, 1]} : vector<8x1x8x10xf32> to vector<8x1x8x8xf32>
    %cst_100 = arith.constant 0.451862752 : f32
    %132 = vector.broadcast %cst_100 : f32 to vector<8x1x8x8xf32>
    %133 = arith.mulf %132, %131 : vector<8x1x8x8xf32>
    %134 = arith.addf %130, %133 : vector<8x1x8x8xf32>
    %135 = vector.extract_strided_slice %127 {offsets = [0, 0, 0, 2], sizes = [8, 1, 8, 8], strides = [1, 1, 1, 1]} : vector<8x1x8x10xf32> to vector<8x1x8x8xf32>
    %cst_101 = arith.constant 0.274068624 : f32
    %136 = vector.broadcast %cst_101 : f32 to vector<8x1x8x8xf32>
    %137 = arith.mulf %136, %135 : vector<8x1x8x8xf32>
    %138 = arith.addf %134, %137 : vector<8x1x8x8xf32>
    %c0_102 = arith.constant 0 : index
    %c3_103 = arith.constant 3 : index
    %c0_104 = arith.constant 0 : index
    %c0_105 = arith.constant 0 : index
    %139 = vector.load %arg2[%c0_102, %c3_103, %c0_104, %c0_105] : memref<8x8x8x8xf32, #tpu.memory_space<vmem>>, vector<8x1x8x8xf32>
    tpu.vector_store %arg2[%c0_102, %c3_103, %c0_104, %c0_105], %138 {strides = array<i32>} : memref<8x8x8x8xf32, #tpu.memory_space<vmem>>, vector<8x1x8x8xf32>,
    %c0_106 = arith.constant 0 : index
    %c4_107 = arith.constant 4 : index
    %c0_108 = arith.constant 0 : index
    %c0_109 = arith.constant 0 : index
    %140 = vector.load %arg3[%c0_106, %c4_107, %c0_108, %c0_109] : memref<8x10x10x10xf32, #tpu.memory_space<vmem>>, vector<8x1x10x10xf32>
    %cst_110 = arith.constant 0.274068624 : f32
    %141 = vector.broadcast %cst_110 : f32 to vector<8x1x10x10xf32>
    %142 = arith.mulf %141, %140 : vector<8x1x10x10xf32>
    %c0_111 = arith.constant 0 : index
    %c5_112 = arith.constant 5 : index
    %c0_113 = arith.constant 0 : index
    %c0_114 = arith.constant 0 : index
    %143 = vector.load %arg3[%c0_111, %c5_112, %c0_113, %c0_114] : memref<8x10x10x10xf32, #tpu.memory_space<vmem>>, vector<8x1x10x10xf32>
    %cst_115 = arith.constant 0.451862752 : f32
    %144 = vector.broadcast %cst_115 : f32 to vector<8x1x10x10xf32>
    %145 = arith.mulf %144, %143 : vector<8x1x10x10xf32>
    %146 = arith.addf %142, %145 : vector<8x1x10x10xf32>
    %c0_116 = arith.constant 0 : index
    %c6 = arith.constant 6 : index
    %c0_117 = arith.constant 0 : index
    %c0_118 = arith.constant 0 : index
    %147 = vector.load %arg3[%c0_116, %c6, %c0_117, %c0_118] : memref<8x10x10x10xf32, #tpu.memory_space<vmem>>, vector<8x1x10x10xf32>
    %cst_119 = arith.constant 0.274068624 : f32
    %148 = vector.broadcast %cst_119 : f32 to vector<8x1x10x10xf32>
    %149 = arith.mulf %148, %147 : vector<8x1x10x10xf32>
    %150 = arith.addf %146, %149 : vector<8x1x10x10xf32>
    %151 = vector.extract_strided_slice %150 {offsets = [0, 0, 0, 0], sizes = [8, 1, 8, 10], strides = [1, 1, 1, 1]} : vector<8x1x10x10xf32> to vector<8x1x8x10xf32>
    %cst_120 = arith.constant 0.274068624 : f32
    %152 = vector.broadcast %cst_120 : f32 to vector<8x1x8x10xf32>
    %153 = arith.mulf %152, %151 : vector<8x1x8x10xf32>
    %154 = vector.extract_strided_slice %150 {offsets = [0, 0, 1, 0], sizes = [8, 1, 8, 10], strides = [1, 1, 1, 1]} : vector<8x1x10x10xf32> to vector<8x1x8x10xf32>
    %cst_121 = arith.constant 0.451862752 : f32
    %155 = vector.broadcast %cst_121 : f32 to vector<8x1x8x10xf32>
    %156 = arith.mulf %155, %154 : vector<8x1x8x10xf32>
    %157 = arith.addf %153, %156 : vector<8x1x8x10xf32>
    %158 = vector.extract_strided_slice %150 {offsets = [0, 0, 2, 0], sizes = [8, 1, 8, 10], strides = [1, 1, 1, 1]} : vector<8x1x10x10xf32> to vector<8x1x8x10xf32>
    %cst_122 = arith.constant 0.274068624 : f32
    %159 = vector.broadcast %cst_122 : f32 to vector<8x1x8x10xf32>
    %160 = arith.mulf %159, %158 : vector<8x1x8x10xf32>
    %161 = arith.addf %157, %160 : vector<8x1x8x10xf32>
    %162 = vector.extract_strided_slice %161 {offsets = [0, 0, 0, 0], sizes = [8, 1, 8, 8], strides = [1, 1, 1, 1]} : vector<8x1x8x10xf32> to vector<8x1x8x8xf32>
    %cst_123 = arith.constant 0.274068624 : f32
    %163 = vector.broadcast %cst_123 : f32 to vector<8x1x8x8xf32>
    %164 = arith.mulf %163, %162 : vector<8x1x8x8xf32>
    %165 = vector.extract_strided_slice %161 {offsets = [0, 0, 0, 1], sizes = [8, 1, 8, 8], strides = [1, 1, 1, 1]} : vector<8x1x8x10xf32> to vector<8x1x8x8xf32>
    %cst_124 = arith.constant 0.451862752 : f32
    %166 = vector.broadcast %cst_124 : f32 to vector<8x1x8x8xf32>
    %167 = arith.mulf %166, %165 : vector<8x1x8x8xf32>
    %168 = arith.addf %164, %167 : vector<8x1x8x8xf32>
    %169 = vector.extract_strided_slice %161 {offsets = [0, 0, 0, 2], sizes = [8, 1, 8, 8], strides = [1, 1, 1, 1]} : vector<8x1x8x10xf32> to vector<8x1x8x8xf32>
    %cst_125 = arith.constant 0.274068624 : f32
    %170 = vector.broadcast %cst_125 : f32 to vector<8x1x8x8xf32>
    %171 = arith.mulf %170, %169 : vector<8x1x8x8xf32>
    %172 = arith.addf %168, %171 : vector<8x1x8x8xf32>
    %c0_126 = arith.constant 0 : index
    %c4_127 = arith.constant 4 : index
    %c0_128 = arith.constant 0 : index
    %c0_129 = arith.constant 0 : index
    %173 = vector.load %arg2[%c0_126, %c4_127, %c0_128, %c0_129] : memref<8x8x8x8xf32, #tpu.memory_space<vmem>>, vector<8x1x8x8xf32>
    tpu.vector_store %arg2[%c0_126, %c4_127, %c0_128, %c0_129], %172 {strides = array<i32>} : memref<8x8x8x8xf32, #tpu.memory_space<vmem>>, vector<8x1x8x8xf32>,
    %c0_130 = arith.constant 0 : index
    %c5_131 = arith.constant 5 : index
    %c0_132 = arith.constant 0 : index
    %c0_133 = arith.constant 0 : index
    %174 = vector.load %arg3[%c0_130, %c5_131, %c0_132, %c0_133] : memref<8x10x10x10xf32, #tpu.memory_space<vmem>>, vector<8x1x10x10xf32>
    %cst_134 = arith.constant 0.274068624 : f32
    %175 = vector.broadcast %cst_134 : f32 to vector<8x1x10x10xf32>
    %176 = arith.mulf %175, %174 : vector<8x1x10x10xf32>
    %c0_135 = arith.constant 0 : index
    %c6_136 = arith.constant 6 : index
    %c0_137 = arith.constant 0 : index
    %c0_138 = arith.constant 0 : index
    %177 = vector.load %arg3[%c0_135, %c6_136, %c0_137, %c0_138] : memref<8x10x10x10xf32, #tpu.memory_space<vmem>>, vector<8x1x10x10xf32>
    %cst_139 = arith.constant 0.451862752 : f32
    %178 = vector.broadcast %cst_139 : f32 to vector<8x1x10x10xf32>
    %179 = arith.mulf %178, %177 : vector<8x1x10x10xf32>
    %180 = arith.addf %176, %179 : vector<8x1x10x10xf32>
    %c0_140 = arith.constant 0 : index
    %c7 = arith.constant 7 : index
    %c0_141 = arith.constant 0 : index
    %c0_142 = arith.constant 0 : index
    %181 = vector.load %arg3[%c0_140, %c7, %c0_141, %c0_142] : memref<8x10x10x10xf32, #tpu.memory_space<vmem>>, vector<8x1x10x10xf32>
    %cst_143 = arith.constant 0.274068624 : f32
    %182 = vector.broadcast %cst_143 : f32 to vector<8x1x10x10xf32>
    %183 = arith.mulf %182, %181 : vector<8x1x10x10xf32>
    %184 = arith.addf %180, %183 : vector<8x1x10x10xf32>
    %185 = vector.extract_strided_slice %184 {offsets = [0, 0, 0, 0], sizes = [8, 1, 8, 10], strides = [1, 1, 1, 1]} : vector<8x1x10x10xf32> to vector<8x1x8x10xf32>
    %cst_144 = arith.constant 0.274068624 : f32
    %186 = vector.broadcast %cst_144 : f32 to vector<8x1x8x10xf32>
    %187 = arith.mulf %186, %185 : vector<8x1x8x10xf32>
    %188 = vector.extract_strided_slice %184 {offsets = [0, 0, 1, 0], sizes = [8, 1, 8, 10], strides = [1, 1, 1, 1]} : vector<8x1x10x10xf32> to vector<8x1x8x10xf32>
    %cst_145 = arith.constant 0.451862752 : f32
    %189 = vector.broadcast %cst_145 : f32 to vector<8x1x8x10xf32>
    %190 = arith.mulf %189, %188 : vector<8x1x8x10xf32>
    %191 = arith.addf %187, %190 : vector<8x1x8x10xf32>
    %192 = vector.extract_strided_slice %184 {offsets = [0, 0, 2, 0], sizes = [8, 1, 8, 10], strides = [1, 1, 1, 1]} : vector<8x1x10x10xf32> to vector<8x1x8x10xf32>
    %cst_146 = arith.constant 0.274068624 : f32
    %193 = vector.broadcast %cst_146 : f32 to vector<8x1x8x10xf32>
    %194 = arith.mulf %193, %192 : vector<8x1x8x10xf32>
    %195 = arith.addf %191, %194 : vector<8x1x8x10xf32>
    %196 = vector.extract_strided_slice %195 {offsets = [0, 0, 0, 0], sizes = [8, 1, 8, 8], strides = [1, 1, 1, 1]} : vector<8x1x8x10xf32> to vector<8x1x8x8xf32>
    %cst_147 = arith.constant 0.274068624 : f32
    %197 = vector.broadcast %cst_147 : f32 to vector<8x1x8x8xf32>
    %198 = arith.mulf %197, %196 : vector<8x1x8x8xf32>
    %199 = vector.extract_strided_slice %195 {offsets = [0, 0, 0, 1], sizes = [8, 1, 8, 8], strides = [1, 1, 1, 1]} : vector<8x1x8x10xf32> to vector<8x1x8x8xf32>
    %cst_148 = arith.constant 0.451862752 : f32
    %200 = vector.broadcast %cst_148 : f32 to vector<8x1x8x8xf32>
    %201 = arith.mulf %200, %199 : vector<8x1x8x8xf32>
    %202 = arith.addf %198, %201 : vector<8x1x8x8xf32>
    %203 = vector.extract_strided_slice %195 {offsets = [0, 0, 0, 2], sizes = [8, 1, 8, 8], strides = [1, 1, 1, 1]} : vector<8x1x8x10xf32> to vector<8x1x8x8xf32>
    %cst_149 = arith.constant 0.274068624 : f32
    %204 = vector.broadcast %cst_149 : f32 to vector<8x1x8x8xf32>
    %205 = arith.mulf %204, %203 : vector<8x1x8x8xf32>
    %206 = arith.addf %202, %205 : vector<8x1x8x8xf32>
    %c0_150 = arith.constant 0 : index
    %c5_151 = arith.constant 5 : index
    %c0_152 = arith.constant 0 : index
    %c0_153 = arith.constant 0 : index
    %207 = vector.load %arg2[%c0_150, %c5_151, %c0_152, %c0_153] : memref<8x8x8x8xf32, #tpu.memory_space<vmem>>, vector<8x1x8x8xf32>
    tpu.vector_store %arg2[%c0_150, %c5_151, %c0_152, %c0_153], %206 {strides = array<i32>} : memref<8x8x8x8xf32, #tpu.memory_space<vmem>>, vector<8x1x8x8xf32>,
    %c0_154 = arith.constant 0 : index
    %c6_155 = arith.constant 6 : index
    %c0_156 = arith.constant 0 : index
    %c0_157 = arith.constant 0 : index
    %208 = vector.load %arg3[%c0_154, %c6_155, %c0_156, %c0_157] : memref<8x10x10x10xf32, #tpu.memory_space<vmem>>, vector<8x1x10x10xf32>
    %cst_158 = arith.constant 0.274068624 : f32
    %209 = vector.broadcast %cst_158 : f32 to vector<8x1x10x10xf32>
    %210 = arith.mulf %209, %208 : vector<8x1x10x10xf32>
    %c0_159 = arith.constant 0 : index
    %c7_160 = arith.constant 7 : index
    %c0_161 = arith.constant 0 : index
    %c0_162 = arith.constant 0 : index
    %211 = vector.load %arg3[%c0_159, %c7_160, %c0_161, %c0_162] : memref<8x10x10x10xf32, #tpu.memory_space<vmem>>, vector<8x1x10x10xf32>
    %cst_163 = arith.constant 0.451862752 : f32
    %212 = vector.broadcast %cst_163 : f32 to vector<8x1x10x10xf32>
    %213 = arith.mulf %212, %211 : vector<8x1x10x10xf32>
    %214 = arith.addf %210, %213 : vector<8x1x10x10xf32>
    %c0_164 = arith.constant 0 : index
    %c8 = arith.constant 8 : index
    %c0_165 = arith.constant 0 : index
    %c0_166 = arith.constant 0 : index
    %215 = vector.load %arg3[%c0_164, %c8, %c0_165, %c0_166] : memref<8x10x10x10xf32, #tpu.memory_space<vmem>>, vector<8x1x10x10xf32>
    %cst_167 = arith.constant 0.274068624 : f32
    %216 = vector.broadcast %cst_167 : f32 to vector<8x1x10x10xf32>
    %217 = arith.mulf %216, %215 : vector<8x1x10x10xf32>
    %218 = arith.addf %214, %217 : vector<8x1x10x10xf32>
    %219 = vector.extract_strided_slice %218 {offsets = [0, 0, 0, 0], sizes = [8, 1, 8, 10], strides = [1, 1, 1, 1]} : vector<8x1x10x10xf32> to vector<8x1x8x10xf32>
    %cst_168 = arith.constant 0.274068624 : f32
    %220 = vector.broadcast %cst_168 : f32 to vector<8x1x8x10xf32>
    %221 = arith.mulf %220, %219 : vector<8x1x8x10xf32>
    %222 = vector.extract_strided_slice %218 {offsets = [0, 0, 1, 0], sizes = [8, 1, 8, 10], strides = [1, 1, 1, 1]} : vector<8x1x10x10xf32> to vector<8x1x8x10xf32>
    %cst_169 = arith.constant 0.451862752 : f32
    %223 = vector.broadcast %cst_169 : f32 to vector<8x1x8x10xf32>
    %224 = arith.mulf %223, %222 : vector<8x1x8x10xf32>
    %225 = arith.addf %221, %224 : vector<8x1x8x10xf32>
    %226 = vector.extract_strided_slice %218 {offsets = [0, 0, 2, 0], sizes = [8, 1, 8, 10], strides = [1, 1, 1, 1]} : vector<8x1x10x10xf32> to vector<8x1x8x10xf32>
    %cst_170 = arith.constant 0.274068624 : f32
    %227 = vector.broadcast %cst_170 : f32 to vector<8x1x8x10xf32>
    %228 = arith.mulf %227, %226 : vector<8x1x8x10xf32>
    %229 = arith.addf %225, %228 : vector<8x1x8x10xf32>
    %230 = vector.extract_strided_slice %229 {offsets = [0, 0, 0, 0], sizes = [8, 1, 8, 8], strides = [1, 1, 1, 1]} : vector<8x1x8x10xf32> to vector<8x1x8x8xf32>
    %cst_171 = arith.constant 0.274068624 : f32
    %231 = vector.broadcast %cst_171 : f32 to vector<8x1x8x8xf32>
    %232 = arith.mulf %231, %230 : vector<8x1x8x8xf32>
    %233 = vector.extract_strided_slice %229 {offsets = [0, 0, 0, 1], sizes = [8, 1, 8, 8], strides = [1, 1, 1, 1]} : vector<8x1x8x10xf32> to vector<8x1x8x8xf32>
    %cst_172 = arith.constant 0.451862752 : f32
    %234 = vector.broadcast %cst_172 : f32 to vector<8x1x8x8xf32>
    %235 = arith.mulf %234, %233 : vector<8x1x8x8xf32>
    %236 = arith.addf %232, %235 : vector<8x1x8x8xf32>
    %237 = vector.extract_strided_slice %229 {offsets = [0, 0, 0, 2], sizes = [8, 1, 8, 8], strides = [1, 1, 1, 1]} : vector<8x1x8x10xf32> to vector<8x1x8x8xf32>
    %cst_173 = arith.constant 0.274068624 : f32
    %238 = vector.broadcast %cst_173 : f32 to vector<8x1x8x8xf32>
    %239 = arith.mulf %238, %237 : vector<8x1x8x8xf32>
    %240 = arith.addf %236, %239 : vector<8x1x8x8xf32>
    %c0_174 = arith.constant 0 : index
    %c6_175 = arith.constant 6 : index
    %c0_176 = arith.constant 0 : index
    %c0_177 = arith.constant 0 : index
    %241 = vector.load %arg2[%c0_174, %c6_175, %c0_176, %c0_177] : memref<8x8x8x8xf32, #tpu.memory_space<vmem>>, vector<8x1x8x8xf32>
    tpu.vector_store %arg2[%c0_174, %c6_175, %c0_176, %c0_177], %240 {strides = array<i32>} : memref<8x8x8x8xf32, #tpu.memory_space<vmem>>, vector<8x1x8x8xf32>,
    %c0_178 = arith.constant 0 : index
    %c7_179 = arith.constant 7 : index
    %c0_180 = arith.constant 0 : index
    %c0_181 = arith.constant 0 : index
    %242 = vector.load %arg3[%c0_178, %c7_179, %c0_180, %c0_181] : memref<8x10x10x10xf32, #tpu.memory_space<vmem>>, vector<8x1x10x10xf32>
    %cst_182 = arith.constant 0.274068624 : f32
    %243 = vector.broadcast %cst_182 : f32 to vector<8x1x10x10xf32>
    %244 = arith.mulf %243, %242 : vector<8x1x10x10xf32>
    %c0_183 = arith.constant 0 : index
    %c8_184 = arith.constant 8 : index
    %c0_185 = arith.constant 0 : index
    %c0_186 = arith.constant 0 : index
    %245 = vector.load %arg3[%c0_183, %c8_184, %c0_185, %c0_186] : memref<8x10x10x10xf32, #tpu.memory_space<vmem>>, vector<8x1x10x10xf32>
    %cst_187 = arith.constant 0.451862752 : f32
    %246 = vector.broadcast %cst_187 : f32 to vector<8x1x10x10xf32>
    %247 = arith.mulf %246, %245 : vector<8x1x10x10xf32>
    %248 = arith.addf %244, %247 : vector<8x1x10x10xf32>
    %c0_188 = arith.constant 0 : index
    %c9 = arith.constant 9 : index
    %c0_189 = arith.constant 0 : index
    %c0_190 = arith.constant 0 : index
    %249 = vector.load %arg3[%c0_188, %c9, %c0_189, %c0_190] : memref<8x10x10x10xf32, #tpu.memory_space<vmem>>, vector<8x1x10x10xf32>
    %cst_191 = arith.constant 0.274068624 : f32
    %250 = vector.broadcast %cst_191 : f32 to vector<8x1x10x10xf32>
    %251 = arith.mulf %250, %249 : vector<8x1x10x10xf32>
    %252 = arith.addf %248, %251 : vector<8x1x10x10xf32>
    %253 = vector.extract_strided_slice %252 {offsets = [0, 0, 0, 0], sizes = [8, 1, 8, 10], strides = [1, 1, 1, 1]} : vector<8x1x10x10xf32> to vector<8x1x8x10xf32>
    %cst_192 = arith.constant 0.274068624 : f32
    %254 = vector.broadcast %cst_192 : f32 to vector<8x1x8x10xf32>
    %255 = arith.mulf %254, %253 : vector<8x1x8x10xf32>
    %256 = vector.extract_strided_slice %252 {offsets = [0, 0, 1, 0], sizes = [8, 1, 8, 10], strides = [1, 1, 1, 1]} : vector<8x1x10x10xf32> to vector<8x1x8x10xf32>
    %cst_193 = arith.constant 0.451862752 : f32
    %257 = vector.broadcast %cst_193 : f32 to vector<8x1x8x10xf32>
    %258 = arith.mulf %257, %256 : vector<8x1x8x10xf32>
    %259 = arith.addf %255, %258 : vector<8x1x8x10xf32>
    %260 = vector.extract_strided_slice %252 {offsets = [0, 0, 2, 0], sizes = [8, 1, 8, 10], strides = [1, 1, 1, 1]} : vector<8x1x10x10xf32> to vector<8x1x8x10xf32>
    %cst_194 = arith.constant 0.274068624 : f32
    %261 = vector.broadcast %cst_194 : f32 to vector<8x1x8x10xf32>
    %262 = arith.mulf %261, %260 : vector<8x1x8x10xf32>
    %263 = arith.addf %259, %262 : vector<8x1x8x10xf32>
    %264 = vector.extract_strided_slice %263 {offsets = [0, 0, 0, 0], sizes = [8, 1, 8, 8], strides = [1, 1, 1, 1]} : vector<8x1x8x10xf32> to vector<8x1x8x8xf32>
    %cst_195 = arith.constant 0.274068624 : f32
    %265 = vector.broadcast %cst_195 : f32 to vector<8x1x8x8xf32>
    %266 = arith.mulf %265, %264 : vector<8x1x8x8xf32>
    %267 = vector.extract_strided_slice %263 {offsets = [0, 0, 0, 1], sizes = [8, 1, 8, 8], strides = [1, 1, 1, 1]} : vector<8x1x8x10xf32> to vector<8x1x8x8xf32>
    %cst_196 = arith.constant 0.451862752 : f32
    %268 = vector.broadcast %cst_196 : f32 to vector<8x1x8x8xf32>
    %269 = arith.mulf %268, %267 : vector<8x1x8x8xf32>
    %270 = arith.addf %266, %269 : vector<8x1x8x8xf32>
    %271 = vector.extract_strided_slice %263 {offsets = [0, 0, 0, 2], sizes = [8, 1, 8, 8], strides = [1, 1, 1, 1]} : vector<8x1x8x10xf32> to vector<8x1x8x8xf32>
    %cst_197 = arith.constant 0.274068624 : f32
    %272 = vector.broadcast %cst_197 : f32 to vector<8x1x8x8xf32>
    %273 = arith.mulf %272, %271 : vector<8x1x8x8xf32>
    %274 = arith.addf %270, %273 : vector<8x1x8x8xf32>
    %c0_198 = arith.constant 0 : index
    %c7_199 = arith.constant 7 : index
    %c0_200 = arith.constant 0 : index
    %c0_201 = arith.constant 0 : index
    %275 = vector.load %arg2[%c0_198, %c7_199, %c0_200, %c0_201] : memref<8x8x8x8xf32, #tpu.memory_space<vmem>>, vector<8x1x8x8xf32>
    tpu.vector_store %arg2[%c0_198, %c7_199, %c0_200, %c0_201], %274 {strides = array<i32>} : memref<8x8x8x8xf32, #tpu.memory_space<vmem>>, vector<8x1x8x8xf32>,
    return
  }
  func.func @transform_0(%arg0: i32) -> (i32, i32, i32, i32) {
    %c0_i32 = arith.constant 0 : i32
    %c0_i32_0 = arith.constant 0 : i32
    %c0_i32_1 = arith.constant 0 : i32
    %c0_i32_2 = arith.constant 0 : i32
    return %arg0, %c0_i32, %c0_i32_0, %c0_i32_1 : i32, i32, i32, i32
  }
  func.func @transform_1(%arg0: i32) -> (i32, i32, i32, i32) {
    %c0_i32 = arith.constant 0 : i32
    %c0_i32_0 = arith.constant 0 : i32
    %c0_i32_1 = arith.constant 0 : i32
    %c0_i32_2 = arith.constant 0 : i32
    return %arg0, %c0_i32, %c0_i32_0, %c0_i32_1 : i32, i32, i32, i32
  }
}

</mosaic_0001>

<bundles_post_ra>
// kernel: tpu_custom_call.1
= control target key start
LH: loop header
LB: loop body
LE: loop exit
PB: predicated region body
PF: predicated region fallthrough
CT: control target
= control target key end

     0   :  { %6 = vsyncpa [#allocation4], 0  ;;  %s5623_s0 = inlined_call_operand.hbm [shape: f32[8,8,8,8], index: 0, kind: input, shape index: {}]   ;;  %s5624_s1 = inlined_call_operand.hbm [shape: f32[8,8,8,8], index: 1, kind: output, shape index: {}]  }
   0x1   :  { %7 = vsyncpa [#allocation5], 0  ;;  %s3669_s6 = smov [#allocation3]  }
   0x2   :  { %s13_s7 = sshll.u32 %s3669_s6, 4  ;;  %s14_s7 = int_to_ptr.vmem [resolvable:$true] %s13_s7 }
   0x3   :  { %s3633_s8 = scalar_lea.vmem %s14_s7, 8192  ;;  %p3638_p1 = scmp.lt.s32.totalorder %s14_s7, %s14_s7 }
   0x4   :  { %p3634_p0 = scmp.ne.s32.totalorder %s14_s7, %s3633_s8  ;;  %p3639_p2 = scmp.lt.s32.totalorder %s3633_s8, %s3633_s8 }
   0x6   :  { %p3640_p3 = por %p3639_p2, %p3638_p1 }
   0x8   :  { %p3641_p4 = pnand %p3640_p3, %p3634_p0 }
   0xa   :  { %3644 = shalt.err (!%p3641_p4)
}
   0xb   :  { %s3670_s9 = smov 128   ;;  %s3671_s10 = smov 8  }
   0xc   :  { %19 = dma.hbm_to_vmem [thread:$0]  %s5623_s0, 8192, %s14_s7, [#allocation4], %s3670_s9, %s3670_s9, %s3671_s10  }
   0xd   :  { %3665 = dma.done.wait [#allocation4], 8192  }
   0xe   :  { %3666 = vsyncadd [#allocation4], 4294959104  ;;  %vm23_vm0 = vcmask 80896   ;;  %vm25_vm1 = vcmask 74752   ;;  %v3672_v0 = vmov 0.0   ;;  %v187_v1 = vld [vmem:[#allocation3 + $0x10] sm:$0xff] }
   0xf   :  { %31 = vst.msk [vmem:[#allocation2 + $0x30] sm:$0xff] %vm23_vm0, %v3672_v0  ;;  %24 = vst.msk [vmem:[#allocation2] sm:$0xff] %vm23_vm0, %v3672_v0  ;;  %v185_v2 = vld [vmem:[#allocation3] sm:$0xff]  ;;  %s3673_s0 = smov 1   ;;  %v188_v3 = vld [vmem:[#allocation3 + $0x18] sm:$0xff]  ;;  %vm506_vm2 = vcmask 72712  }
  0x10   :  { %32 = vst.msk [vmem:[#allocation2 + $0x38] sm:$0x3] %vm25_vm1, %v3672_v0  ;;  %26 = vst.msk [vmem:[#allocation2 + $0x8] sm:$0x3] %vm25_vm1, %v3672_v0  ;;  %317 = vrot.lane.b32.xlu1 %v187_v1, %s3673_s0  ;;  %313 = vrot.lane.b32.xlu0 %v185_v2, %s3673_s0  ;;  %v186_v4 = vld [vmem:[#allocation3 + $0x8] sm:$0xff]  ;;  %v189_v6 = vld [vmem:[#allocation3 + $0x20] sm:$0xff] }
  0x11   :  { %27 = vst.msk [vmem:[#allocation2 + $0x10] sm:$0xff] %vm23_vm0, %v3672_v0  ;;  %29 = vst.msk [vmem:[#allocation2 + $0x20] sm:$0xff] %vm23_vm0, %v3672_v0  ;;  %v190_v5 = vld [vmem:[#allocation3 + $0x28] sm:$0xff]  ;;  %v192_v7 = vld [vmem:[#allocation3 + $0x38] sm:$0xff]  ;;  %vm740_vm3 = vcmask 1046528   ;;  %vm805_vm4 = vcmask 1045504  }
  0x12   :  { %28 = vst.msk [vmem:[#allocation2 + $0x18] sm:$0x3] %vm25_vm1, %v3672_v0  ;;  %30 = vst.msk [vmem:[#allocation2 + $0x28] sm:$0x3] %vm25_vm1, %v3672_v0  ;;  %v191_v8 = vld [vmem:[#allocation3 + $0x30] sm:$0xff]  ;;  %v194_v9 = vld [vmem:[#allocation3 + $0x48] sm:$0xff] }
  0x13   :  { %33 = vst.msk [vmem:[#allocation2 + $0x40] sm:$0xff] %vm23_vm0, %v3672_v0  ;;  %35 = vst.msk [vmem:[#allocation2 + $0x50] sm:$0xff] %vm23_vm0, %v3672_v0  ;;  %v193_v10 = vld [vmem:[#allocation3 + $0x40] sm:$0xff]  ;;  %v196_v11 = vld [vmem:[#allocation3 + $0x58] sm:$0xff]  ;;  %s3674_s13 = smov 127   ;;  %s3675_s14 = smov 126  }
  0x14   :  { %34 = vst.msk [vmem:[#allocation2 + $0x48] sm:$0x3] %vm25_vm1, %v3672_v0  ;;  %36 = vst.msk [vmem:[#allocation2 + $0x58] sm:$0x3] %vm25_vm1, %v3672_v0  ;;  %319 = vrot.lane.b32.xlu1 %v188_v3, %s3673_s0  ;;  %315 = vrot.lane.b32.xlu0 %v186_v4, %s3673_s0  ;;  %v195_v12 = vld [vmem:[#allocation3 + $0x50] sm:$0xff]  ;;  %v198_v13 = vld [vmem:[#allocation3 + $0x68] sm:$0xff] }
  0x15   :  { %37 = vst.msk [vmem:[#allocation2 + $0x60] sm:$0xff] %vm23_vm0, %v3672_v0  ;;  %39 = vst.msk [vmem:[#allocation2 + $0x70] sm:$0xff] %vm23_vm0, %v3672_v0  ;;  %v197_v14 = vld [vmem:[#allocation3 + $0x60] sm:$0xff]  ;;  %v200_v15 = vld [vmem:[#allocation3 + $0x78] sm:$0xff]  ;;  %vm942_vm5 = vcmask 64512   ;;  %s3676_s15 = smov [#allocation6]  }
  0x16   :  { %38 = vst.msk [vmem:[#allocation2 + $0x68] sm:$0x3] %vm25_vm1, %v3672_v0  ;;  %40 = vst.msk [vmem:[#allocation2 + $0x78] sm:$0x3] %vm25_vm1, %v3672_v0  ;;  %v199_v16 = vld [vmem:[#allocation3 + $0x70] sm:$0xff]  ;;  %v202_v17 = vld [vmem:[#allocation3 + $0x88] sm:$0xff] }
  0x17   :  { %41 = vst.msk [vmem:[#allocation2 + $0x80] sm:$0xff] %vm23_vm0, %v3672_v0  ;;  %43 = vst.msk [vmem:[#allocation2 + $0x90] sm:$0xff] %vm23_vm0, %v3672_v0  ;;  %v201_v18 = vld [vmem:[#allocation3 + $0x80] sm:$0xff]  ;;  %v204_v19 = vld [vmem:[#allocation3 + $0x98] sm:$0xff]  ;;  %s3602_s16 = sshll.u32 %s3676_s15, 4  ;;  %s3603_s16 = int_to_ptr.vmem [resolvable:$true] %s3602_s16 }
  0x18   :  { %42 = vst.msk [vmem:[#allocation2 + $0x88] sm:$0x3] %vm25_vm1, %v3672_v0  ;;  %44 = vst.msk [vmem:[#allocation2 + $0x98] sm:$0x3] %vm25_vm1, %v3672_v0  ;;  %323 = vrot.lane.b32.xlu1 %v190_v5, %s3673_s0  ;;  %321 = vrot.lane.b32.xlu0 %v189_v6, %s3673_s0  ;;  %v203_v20 = vld [vmem:[#allocation3 + $0x90] sm:$0xff]  ;;  %v206_v21 = vld [vmem:[#allocation3 + $0xa8] sm:$0xff]  ;;  %p3650_p6 = scmp.lt.s32.totalorder %s3603_s16, %s3603_s16 }
  0x19   :  { %45 = vst.msk [vmem:[#allocation2 + $0xa0] sm:$0xff] %vm23_vm0, %v3672_v0  ;;  %47 = vst.msk [vmem:[#allocation2 + $0xb0] sm:$0xff] %vm23_vm0, %v3672_v0  ;;  %v205_v22 = vld [vmem:[#allocation3 + $0xa0] sm:$0xff]  ;;  %v208_v23 = vld [vmem:[#allocation3 + $0xb8] sm:$0xff]  ;;  %s3645_s17 = scalar_lea.vmem %s3603_s16, 8192 }
  0x1a   :  { %46 = vst.msk [vmem:[#allocation2 + $0xa8] sm:$0x3] %vm25_vm1, %v3672_v0  ;;  %48 = vst.msk [vmem:[#allocation2 + $0xb8] sm:$0x3] %vm25_vm1, %v3672_v0  ;;  %v207_v24 = vld [vmem:[#allocation3 + $0xb0] sm:$0xff]  ;;  %v210_v25 = vld [vmem:[#allocation3 + $0xc8] sm:$0xff]  ;;  %p3646_p5 = scmp.ne.s32.totalorder %s3603_s16, %s3645_s17  ;;  %p3651_p7 = scmp.lt.s32.totalorder %s3645_s17, %s3645_s17 }
  0x1b   :  { %49 = vst.msk [vmem:[#allocation2 + $0xc0] sm:$0xff] %vm23_vm0, %v3672_v0  ;;  %51 = vst.msk [vmem:[#allocation2 + $0xd0] sm:$0xff] %vm23_vm0, %v3672_v0  ;;  %v209_v26 = vld [vmem:[#allocation3 + $0xc0] sm:$0xff]  ;;  %v212_v27 = vld [vmem:[#allocation3 + $0xd8] sm:$0xff] }
  0x1c   :  { %50 = vst.msk [vmem:[#allocation2 + $0xc8] sm:$0x3] %vm25_vm1, %v3672_v0  ;;  %52 = vst.msk [vmem:[#allocation2 + $0xd8] sm:$0x3] %vm25_vm1, %v3672_v0  ;;  %327 = vrot.lane.b32.xlu1 %v192_v7, %s3673_s0  ;;  %325 = vrot.lane.b32.xlu0 %v191_v8, %s3673_s0  ;;  %v211_v28 = vld [vmem:[#allocation3 + $0xd0] sm:$0xff]  ;;  %v214_v29 = vld [vmem:[#allocation3 + $0xe8] sm:$0xff]  ;;  %p3652_p8 = por %p3651_p7, %p3650_p6 }
  0x1d   :  { %53 = vst.msk [vmem:[#allocation2 + $0xe0] sm:$0xff] %vm23_vm0, %v3672_v0  ;;  %55 = vst.msk [vmem:[#allocation2 + $0xf0] sm:$0xff] %vm23_vm0, %v3672_v0  ;;  %v213_v30 = vld [vmem:[#allocation3 + $0xe0] sm:$0xff]  ;;  %v216_v31 = vld [vmem:[#allocation3 + $0xf8] sm:$0xff] }
  0x1e   :  { %54 = vst.msk [vmem:[#allocation2 + $0xe8] sm:$0x3] %vm25_vm1, %v3672_v0  ;;  %56 = vst.msk [vmem:[#allocation2 + $0xf8] sm:$0x3] %vm25_vm1, %v3672_v0  ;;  %v215_v32 = vld [vmem:[#allocation3 + $0xf0] sm:$0xff]  ;;  %v218_v33 = vld [vmem:[#allocation3 + $0x108] sm:$0xff]  ;;  %p3653_p9 = pnand %p3652_p8, %p3646_p5 }
  0x1f   :  { %57 = vst.msk [vmem:[#allocation2 + $0x100] sm:$0xff] %vm23_vm0, %v3672_v0  ;;  %59 = vst.msk [vmem:[#allocation2 + $0x110] sm:$0xff] %vm23_vm0, %v3672_v0  ;;  %v217_v34 = vld [vmem:[#allocation3 + $0x100] sm:$0xff]  ;;  %v220_v35 = vld [vmem:[#allocation3 + $0x118] sm:$0xff] }
  0x20   :  { %58 = vst.msk [vmem:[#allocation2 + $0x108] sm:$0x3] %vm25_vm1, %v3672_v0  ;;  %60 = vst.msk [vmem:[#allocation2 + $0x118] sm:$0x3] %vm25_vm1, %v3672_v0  ;;  %331 = vrot.lane.b32.xlu1 %v194_v9, %s3673_s0  ;;  %329 = vrot.lane.b32.xlu0 %v193_v10, %s3673_s0  ;;  %v219_v36 = vld [vmem:[#allocation3 + $0x110] sm:$0xff]  ;;  %v222_v37 = vld [vmem:[#allocation3 + $0x128] sm:$0xff] }
  0x21   :  { %61 = vst.msk [vmem:[#allocation2 + $0x120] sm:$0xff] %vm23_vm0, %v3672_v0  ;;  %63 = vst.msk [vmem:[#allocation2 + $0x130] sm:$0xff] %vm23_vm0, %v3672_v0  ;;  %v221_v38 = vld [vmem:[#allocation3 + $0x120] sm:$0xff]  ;;  %v224_v39 = vld [vmem:[#allocation3 + $0x138] sm:$0xff] }
  0x22   :  { %62 = vst.msk [vmem:[#allocation2 + $0x128] sm:$0x3] %vm25_vm1, %v3672_v0  ;;  %64 = vst.msk [vmem:[#allocation2 + $0x138] sm:$0x3] %vm25_vm1, %v3672_v0  ;;  %v223_v40 = vld [vmem:[#allocation3 + $0x130] sm:$0xff]  ;;  %v226_v41 = vld [vmem:[#allocation3 + $0x148] sm:$0xff] }
  0x23   :  { %65 = vst.msk [vmem:[#allocation2 + $0x140] sm:$0xff] %vm23_vm0, %v3672_v0  ;;  %67 = vst.msk [vmem:[#allocation2 + $0x150] sm:$0xff] %vm23_vm0, %v3672_v0  ;;  %v225_v42 = vld [vmem:[#allocation3 + $0x140] sm:$0xff]  ;;  %v228_v43 = vld [vmem:[#allocation3 + $0x158] sm:$0xff] }
  0x24   :  { %66 = vst.msk [vmem:[#allocation2 + $0x148] sm:$0x3] %vm25_vm1, %v3672_v0  ;;  %68 = vst.msk [vmem:[#allocation2 + $0x158] sm:$0x3] %vm25_vm1, %v3672_v0  ;;  %335 = vrot.lane.b32.xlu1 %v196_v11, %s3673_s0  ;;  %333 = vrot.lane.b32.xlu0 %v195_v12, %s3673_s0  ;;  %v227_v44 = vld [vmem:[#allocation3 + $0x150] sm:$0xff]  ;;  %v230_v45 = vld [vmem:[#allocation3 + $0x168] sm:$0xff] }
  0x25   :  { %69 = vst.msk [vmem:[#allocation2 + $0x160] sm:$0xff] %vm23_vm0, %v3672_v0  ;;  %71 = vst.msk [vmem:[#allocation2 + $0x170] sm:$0xff] %vm23_vm0, %v3672_v0  ;;  %v229_v46 = vld [vmem:[#allocation3 + $0x160] sm:$0xff]  ;;  %v232_v47 = vld [vmem:[#allocation3 + $0x178] sm:$0xff] }
  0x26   :  { %70 = vst.msk [vmem:[#allocation2 + $0x168] sm:$0x3] %vm25_vm1, %v3672_v0  ;;  %72 = vst.msk [vmem:[#allocation2 + $0x178] sm:$0x3] %vm25_vm1, %v3672_v0  ;;  %v231_v48 = vld [vmem:[#allocation3 + $0x170] sm:$0xff]  ;;  %v234_v49 = vld [vmem:[#allocation3 + $0x188] sm:$0xff] }
  0x27   :  { %73 = vst.msk [vmem:[#allocation2 + $0x180] sm:$0xff] %vm23_vm0, %v3672_v0  ;;  %75 = vst.msk [vmem:[#allocation2 + $0x190] sm:$0xff] %vm23_vm0, %v3672_v0  ;;  %v233_v50 = vld [vmem:[#allocation3 + $0x180] sm:$0xff]  ;;  %v236_v51 = vld [vmem:[#allocation3 + $0x198] sm:$0xff] }
  0x28   :  { %74 = vst.msk [vmem:[#allocation2 + $0x188] sm:$0x3] %vm25_vm1, %v3672_v0  ;;  %76 = vst.msk [vmem:[#allocation2 + $0x198] sm:$0x3] %vm25_vm1, %v3672_v0  ;;  %339 = vrot.lane.b32.xlu1 %v198_v13, %s3673_s0  ;;  %337 = vrot.lane.b32.xlu0 %v197_v14, %s3673_s0  ;;  %v235_v52 = vld [vmem:[#allocation3 + $0x190] sm:$0xff]  ;;  %v238_v53 = vld [vmem:[#allocation3 + $0x1a8] sm:$0xff] }
  0x29   :  { %77 = vst.msk [vmem:[#allocation2 + $0x1a0] sm:$0xff] %vm23_vm0, %v3672_v0  ;;  %79 = vst.msk [vmem:[#allocation2 + $0x1b0] sm:$0xff] %vm23_vm0, %v3672_v0  ;;  %v237_v54 = vld [vmem:[#allocation3 + $0x1a0] sm:$0xff]  ;;  %v240_v55 = vld [vmem:[#allocation3 + $0x1b8] sm:$0xff] }
  0x2a   :  { %78 = vst.msk [vmem:[#allocation2 + $0x1a8] sm:$0x3] %vm25_vm1, %v3672_v0  ;;  %80 = vst.msk [vmem:[#allocation2 + $0x1b8] sm:$0x3] %vm25_vm1, %v3672_v0  ;;  %v239_v56 = vld [vmem:[#allocation3 + $0x1b0] sm:$0xff]  ;;  %v242_v57 = vld [vmem:[#allocation3 + $0x1c8] sm:$0xff] }
  0x2b   :  { %81 = vst.msk [vmem:[#allocation2 + $0x1c0] sm:$0xff] %vm23_vm0, %v3672_v0  ;;  %83 = vst.msk [vmem:[#allocation2 + $0x1d0] sm:$0xff] %vm23_vm0, %v3672_v0  ;;  %v241_v58 = vld [vmem:[#allocation3 + $0x1c0] sm:$0xff]  ;;  %v243_v59 = vld [vmem:[#allocation3 + $0x1d0] sm:$0xff] }
  0x2c   :  { %82 = vst.msk [vmem:[#allocation2 + $0x1c8] sm:$0x3] %vm25_vm1, %v3672_v0  ;;  %84 = vst.msk [vmem:[#allocation2 + $0x1d8] sm:$0x3] %vm25_vm1, %v3672_v0  ;;  %343 = vrot.lane.b32.xlu1 %v200_v15, %s3673_s0  ;;  %341 = vrot.lane.b32.xlu0 %v199_v16, %s3673_s0  ;;  %v244_v60 = vld [vmem:[#allocation3 + $0x1d8] sm:$0xff]  ;;  %v571_v63 = vld [vmem:[#allocation2] sm:$0xff] }
  0x2d   :  { %85 = vst.msk [vmem:[#allocation2 + $0x1e0] sm:$0xff] %vm23_vm0, %v3672_v0  ;;  %87 = vst.msk [vmem:[#allocation2 + $0x1f0] sm:$0xff] %vm23_vm0, %v3672_v0  ;;  %v245_v1 = vld [vmem:[#allocation3 + $0x1e0] sm:$0xff]  ;;  %v574_v3 = vld [vmem:[#allocation2 + $0xa8] sm:$0x3] }
  0x2e   :  { %86 = vst.msk [vmem:[#allocation2 + $0x1e8] sm:$0x3] %vm25_vm1, %v3672_v0  ;;  %88 = vst.msk [vmem:[#allocation2 + $0x1f8] sm:$0x3] %vm25_vm1, %v3672_v0  ;;  %v573_v2 = vld [vmem:[#allocation2 + $0xa0] sm:$0xff]  ;;  %v246_v5 = vld [vmem:[#allocation3 + $0x1e8] sm:$0xff] }
  0x2f   :  { %89 = vst.msk [vmem:[#allocation2 + $0x200] sm:$0xff] %vm23_vm0, %v3672_v0  ;;  %91 = vst.msk [vmem:[#allocation2 + $0x210] sm:$0xff] %vm23_vm0, %v3672_v0  ;;  %v587_v4 = vmul.f32 0.27406862, %v571_v63  ;;  %v575_v6 = vld [vmem:[#allocation2 + $0x140] sm:$0xff]  ;;  %v247_v13 = vld [vmem:[#allocation3 + $0x1f0] sm:$0xff] }
  0x30   :  { %90 = vst.msk [vmem:[#allocation2 + $0x208] sm:$0x3] %vm25_vm1, %v3672_v0  ;;  %92 = vst.msk [vmem:[#allocation2 + $0x218] sm:$0x3] %vm25_vm1, %v3672_v0  ;;  %347 = vrot.lane.b32.xlu1 %v202_v17, %s3673_s0  ;;  %345 = vrot.lane.b32.xlu0 %v201_v18, %s3673_s0  ;;  %v576_v7 = vld [vmem:[#allocation2 + $0x148] sm:$0x3] }
  0x31   :  { %93 = vst.msk [vmem:[#allocation2 + $0x220] sm:$0xff] %vm23_vm0, %v3672_v0  ;;  %95 = vst.msk [vmem:[#allocation2 + $0x230] sm:$0xff] %vm23_vm0, %v3672_v0  ;;  %v4077_v14 = vmul.f32 0.27406862, %v573_v2  ;;  %v4079_v15 = vmul.f32 0.27406862, %v574_v3 }
  0x32   :  { %94 = vst.msk [vmem:[#allocation2 + $0x228] sm:$0x3] %vm25_vm1, %v3672_v0  ;;  %96 = vst.msk [vmem:[#allocation2 + $0x238] sm:$0x3] %vm25_vm1, %v3672_v0  ;;  %v4083_v17 = vmul.f32 0.27406862, %v575_v6 }
  0x33   :  { %97 = vst.msk [vmem:[#allocation2 + $0x240] sm:$0xff] %vm23_vm0, %v3672_v0  ;;  %99 = vst.msk [vmem:[#allocation2 + $0x250] sm:$0xff] %vm23_vm0, %v3672_v0  ;;  %v4085_v18 = vmul.f32 0.27406862, %v576_v7 }
  0x34   :  { %98 = vst.msk [vmem:[#allocation2 + $0x248] sm:$0x3] %vm25_vm1, %v3672_v0  ;;  %100 = vst.msk [vmem:[#allocation2 + $0x258] sm:$0x3] %vm25_vm1, %v3672_v0  ;;  %351 = vrot.lane.b32.xlu1 %v204_v19, %s3673_s0  ;;  %349 = vrot.lane.b32.xlu0 %v203_v20, %s3673_s0  ;;  %v577_v11 = vld [vmem:[#allocation2 + $0x1e0] sm:$0xff]  ;;  %v248_v20 = vld [vmem:[#allocation3 + $0x1f8] sm:$0xff] }
  0x35   :  { %101 = vst.msk [vmem:[#allocation2 + $0x260] sm:$0xff] %vm23_vm0, %v3672_v0  ;;  %103 = vst.msk [vmem:[#allocation2 + $0x270] sm:$0xff] %vm23_vm0, %v3672_v0  ;;  %v578_v12 = vld [vmem:[#allocation2 + $0x1e8] sm:$0x3] }
  0x36   :  { %102 = vst.msk [vmem:[#allocation2 + $0x268] sm:$0x3] %vm25_vm1, %v3672_v0  ;;  %104 = vst.msk [vmem:[#allocation2 + $0x278] sm:$0x3] %vm25_vm1, %v3672_v0 }
  0x37   :  { %105 = vst.msk [vmem:[#allocation2 + $0x280] sm:$0xff] %vm23_vm0, %v3672_v0  ;;  %107 = vst.msk [vmem:[#allocation2 + $0x290] sm:$0xff] %vm23_vm0, %v3672_v0 }
  0x38   :  { %106 = vst.msk [vmem:[#allocation2 + $0x288] sm:$0x3] %vm25_vm1, %v3672_v0  ;;  %108 = vst.msk [vmem:[#allocation2 + $0x298] sm:$0x3] %vm25_vm1, %v3672_v0  ;;  %355 = vrot.lane.b32.xlu1 %v206_v21, %s3673_s0  ;;  %353 = vrot.lane.b32.xlu0 %v205_v22, %s3673_s0  ;;  %v4087_v21 = vmul.f32 0.27406862, %v577_v11 }
  0x39   :  { %109 = vst.msk [vmem:[#allocation2 + $0x2a0] sm:$0xff] %vm23_vm0, %v3672_v0  ;;  %111 = vst.msk [vmem:[#allocation2 + $0x2b0] sm:$0xff] %vm23_vm0, %v3672_v0  ;;  %v4089_v22 = vmul.f32 0.27406862, %v578_v12 }
  0x3a   :  { %110 = vst.msk [vmem:[#allocation2 + $0x2a8] sm:$0x3] %vm25_vm1, %v3672_v0  ;;  %112 = vst.msk [vmem:[#allocation2 + $0x2b8] sm:$0x3] %vm25_vm1, %v3672_v0 }
  0x3b   :  { %113 = vst.msk [vmem:[#allocation2 + $0x2c0] sm:$0xff] %vm23_vm0, %v3672_v0  ;;  %115 = vst.msk [vmem:[#allocation2 + $0x2d0] sm:$0xff] %vm23_vm0, %v3672_v0 }
  0x3c   :  { %114 = vst.msk [vmem:[#allocation2 + $0x2c8] sm:$0x3] %vm25_vm1, %v3672_v0  ;;  %116 = vst.msk [vmem:[#allocation2 + $0x2d8] sm:$0x3] %vm25_vm1, %v3672_v0  ;;  %359 = vrot.lane.b32.xlu1 %v208_v23, %s3673_s0  ;;  %357 = vrot.lane.b32.xlu0 %v207_v24, %s3673_s0 }
  0x3d   :  { %117 = vst.msk [vmem:[#allocation2 + $0x2e0] sm:$0xff] %vm23_vm0, %v3672_v0  ;;  %119 = vst.msk [vmem:[#allocation2 + $0x2f0] sm:$0xff] %vm23_vm0, %v3672_v0 }
  0x3e   :  { %118 = vst.msk [vmem:[#allocation2 + $0x2e8] sm:$0x3] %vm25_vm1, %v3672_v0  ;;  %120 = vst.msk [vmem:[#allocation2 + $0x2f8] sm:$0x3] %vm25_vm1, %v3672_v0  ;;  %v579_v16 = vld [vmem:[#allocation2 + $0x280] sm:$0xff] }
  0x3f   :  { %121 = vst.msk [vmem:[#allocation2 + $0x300] sm:$0xff] %vm23_vm0, %v3672_v0  ;;  %123 = vst.msk [vmem:[#allocation2 + $0x310] sm:$0xff] %vm23_vm0, %v3672_v0  ;;  %v580_v19 = vld [vmem:[#allocation2 + $0x288] sm:$0x3] }
  0x40   :  { %122 = vst.msk [vmem:[#allocation2 + $0x308] sm:$0x3] %vm25_vm1, %v3672_v0  ;;  %124 = vst.msk [vmem:[#allocation2 + $0x318] sm:$0x3] %vm25_vm1, %v3672_v0  ;;  %363 = vrot.lane.b32.xlu1 %v210_v25, %s3673_s0  ;;  %361 = vrot.lane.b32.xlu0 %v209_v26, %s3673_s0 }
  0x41   :  { %125 = vst.msk [vmem:[#allocation2 + $0x320] sm:$0xff] %vm23_vm0, %v3672_v0  ;;  %127 = vst.msk [vmem:[#allocation2 + $0x330] sm:$0xff] %vm23_vm0, %v3672_v0 }
  0x42   :  { %126 = vst.msk [vmem:[#allocation2 + $0x328] sm:$0x3] %vm25_vm1, %v3672_v0  ;;  %128 = vst.msk [vmem:[#allocation2 + $0x338] sm:$0x3] %vm25_vm1, %v3672_v0 }
  0x43   :  { %129 = vst.msk [vmem:[#allocation2 + $0x340] sm:$0xff] %vm23_vm0, %v3672_v0  ;;  %131 = vst.msk [vmem:[#allocation2 + $0x350] sm:$0xff] %vm23_vm0, %v3672_v0 }
  0x44   :  { %130 = vst.msk [vmem:[#allocation2 + $0x348] sm:$0x3] %vm25_vm1, %v3672_v0  ;;  %132 = vst.msk [vmem:[#allocation2 + $0x358] sm:$0x3] %vm25_vm1, %v3672_v0  ;;  %367 = vrot.lane.b32.xlu1 %v212_v27, %s3673_s0  ;;  %365 = vrot.lane.b32.xlu0 %v211_v28, %s3673_s0  ;;  %v4091_v28 = vmul.f32 0.27406862, %v579_v16 }
  0x45   :  { %133 = vst.msk [vmem:[#allocation2 + $0x360] sm:$0xff] %vm23_vm0, %v3672_v0  ;;  %135 = vst.msk [vmem:[#allocation2 + $0x370] sm:$0xff] %vm23_vm0, %v3672_v0 }
  0x46   :  { %134 = vst.msk [vmem:[#allocation2 + $0x368] sm:$0x3] %vm25_vm1, %v3672_v0  ;;  %136 = vst.msk [vmem:[#allocation2 + $0x378] sm:$0x3] %vm25_vm1, %v3672_v0 }
  0x47   :  { %137 = vst.msk [vmem:[#allocation2 + $0x380] sm:$0xff] %vm23_vm0, %v3672_v0  ;;  %139 = vst.msk [vmem:[#allocation2 + $0x390] sm:$0xff] %vm23_vm0, %v3672_v0 }
  0x48   :  { %138 = vst.msk [vmem:[#allocation2 + $0x388] sm:$0x3] %vm25_vm1, %v3672_v0  ;;  %140 = vst.msk [vmem:[#allocation2 + $0x398] sm:$0x3] %vm25_vm1, %v3672_v0  ;;  %371 = vrot.lane.b32.xlu1 %v214_v29, %s3673_s0  ;;  %369 = vrot.lane.b32.xlu0 %v213_v30, %s3673_s0  ;;  %v581_v23 = vld [vmem:[#allocation2 + $0x320] sm:$0xff] }
  0x49   :  { %141 = vst.msk [vmem:[#allocation2 + $0x3a0] sm:$0xff] %vm23_vm0, %v3672_v0  ;;  %143 = vst.msk [vmem:[#allocation2 + $0x3b0] sm:$0xff] %vm23_vm0, %v3672_v0 }
  0x4a   :  { %142 = vst.msk [vmem:[#allocation2 + $0x3a8] sm:$0x3] %vm25_vm1, %v3672_v0  ;;  %144 = vst.msk [vmem:[#allocation2 + $0x3b8] sm:$0x3] %vm25_vm1, %v3672_v0 }
  0x4b   :  { %145 = vst.msk [vmem:[#allocation2 + $0x3c0] sm:$0xff] %vm23_vm0, %v3672_v0  ;;  %147 = vst.msk [vmem:[#allocation2 + $0x3d0] sm:$0xff] %vm23_vm0, %v3672_v0 }
  0x4c   :  { %146 = vst.msk [vmem:[#allocation2 + $0x3c8] sm:$0x3] %vm25_vm1, %v3672_v0  ;;  %148 = vst.msk [vmem:[#allocation2 + $0x3d8] sm:$0x3] %vm25_vm1, %v3672_v0  ;;  %375 = vrot.lane.b32.xlu1 %v216_v31, %s3673_s0  ;;  %373 = vrot.lane.b32.xlu0 %v215_v32, %s3673_s0  ;;  %v4095_v31 = vmul.f32 0.27406862, %v580_v19 }
  0x4d   :  { %149 = vst.msk [vmem:[#allocation2 + $0x3e0] sm:$0xff] %vm23_vm0, %v3672_v0  ;;  %151 = vst.msk [vmem:[#allocation2 + $0x3f0] sm:$0xff] %vm23_vm0, %v3672_v0  ;;  %v582_v32 = vld [vmem:[#allocation2 + $0x328] sm:$0x3] }
  0x4e   :  { %150 = vst.msk [vmem:[#allocation2 + $0x3e8] sm:$0x3] %vm25_vm1, %v3672_v0  ;;  %152 = vst.msk [vmem:[#allocation2 + $0x3f8] sm:$0x3] %vm25_vm1, %v3672_v0 }
  0x4f   :  { %153 = vst.msk [vmem:[#allocation2 + $0x400] sm:$0xff] %vm23_vm0, %v3672_v0  ;;  %155 = vst.msk [vmem:[#allocation2 + $0x410] sm:$0xff] %vm23_vm0, %v3672_v0 }
  0x50   :  { %154 = vst.msk [vmem:[#allocation2 + $0x408] sm:$0x3] %vm25_vm1, %v3672_v0  ;;  %156 = vst.msk [vmem:[#allocation2 + $0x418] sm:$0x3] %vm25_vm1, %v3672_v0  ;;  %379 = vrot.lane.b32.xlu1 %v218_v33, %s3673_s0  ;;  %377 = vrot.lane.b32.xlu0 %v217_v34, %s3673_s0  ;;  %v4099_v33 = vmul.f32 0.27406862, %v581_v23 }
  0x51   :  { %157 = vst.msk [vmem:[#allocation2 + $0x420] sm:$0xff] %vm23_vm0, %v3672_v0  ;;  %159 = vst.msk [vmem:[#allocation2 + $0x430] sm:$0xff] %vm23_vm0, %v3672_v0 }
  0x52   :  { %158 = vst.msk [vmem:[#allocation2 + $0x428] sm:$0x3] %vm25_vm1, %v3672_v0  ;;  %160 = vst.msk [vmem:[#allocation2 + $0x438] sm:$0x3] %vm25_vm1, %v3672_v0 }
  0x53   :  { %161 = vst.msk [vmem:[#allocation2 + $0x440] sm:$0xff] %vm23_vm0, %v3672_v0  ;;  %163 = vst.msk [vmem:[#allocation2 + $0x450] sm:$0xff] %vm23_vm0, %v3672_v0 }
  0x54   :  { %162 = vst.msk [vmem:[#allocation2 + $0x448] sm:$0x3] %vm25_vm1, %v3672_v0  ;;  %164 = vst.msk [vmem:[#allocation2 + $0x458] sm:$0x3] %vm25_vm1, %v3672_v0  ;;  %383 = vrot.lane.b32.xlu1 %v220_v35, %s3673_s0  ;;  %381 = vrot.lane.b32.xlu0 %v219_v36, %s3673_s0  ;;  %v583_v35 = vld [vmem:[#allocation2 + $0x3c0] sm:$0xff] }
  0x55   :  { %165 = vst.msk [vmem:[#allocation2 + $0x460] sm:$0xff] %vm23_vm0, %v3672_v0  ;;  %167 = vst.msk [vmem:[#allocation2 + $0x470] sm:$0xff] %vm23_vm0, %v3672_v0  ;;  %v584_v36 = vld [vmem:[#allocation2 + $0x3c8] sm:$0x3] }
  0x56   :  { %166 = vst.msk [vmem:[#allocation2 + $0x468] sm:$0x3] %vm25_vm1, %v3672_v0  ;;  %168 = vst.msk [vmem:[#allocation2 + $0x478] sm:$0x3] %vm25_vm1, %v3672_v0 }
  0x57   :  { %169 = vst.msk [vmem:[#allocation2 + $0x480] sm:$0xff] %vm23_vm0, %v3672_v0  ;;  %171 = vst.msk [vmem:[#allocation2 + $0x490] sm:$0xff] %vm23_vm0, %v3672_v0 }
  0x58   :  { %170 = vst.msk [vmem:[#allocation2 + $0x488] sm:$0x3] %vm25_vm1, %v3672_v0  ;;  %172 = vst.msk [vmem:[#allocation2 + $0x498] sm:$0x3] %vm25_vm1, %v3672_v0  ;;  %387 = vrot.lane.b32.xlu1 %v222_v37, %s3673_s0  ;;  %385 = vrot.lane.b32.xlu0 %v221_v38, %s3673_s0 }
  0x59   :  { %173 = vst.msk [vmem:[#allocation2 + $0x4a0] sm:$0xff] %vm23_vm0, %v3672_v0  ;;  %175 = vst.msk [vmem:[#allocation2 + $0x4b0] sm:$0xff] %vm23_vm0, %v3672_v0 }
  0x5a   :  { %174 = vst.msk [vmem:[#allocation2 + $0x4a8] sm:$0x3] %vm25_vm1, %v3672_v0  ;;  %176 = vst.msk [vmem:[#allocation2 + $0x4b8] sm:$0x3] %vm25_vm1, %v3672_v0 }
  0x5b   :  { %177 = vst.msk [vmem:[#allocation2 + $0x4c0] sm:$0xff] %vm23_vm0, %v3672_v0  ;;  %179 = vst.msk [vmem:[#allocation2 + $0x4d0] sm:$0xff] %vm23_vm0, %v3672_v0 }
  0x5c   :  { %178 = vst.msk [vmem:[#allocation2 + $0x4c8] sm:$0x3] %vm25_vm1, %v3672_v0  ;;  %180 = vst.msk [vmem:[#allocation2 + $0x4d8] sm:$0x3] %vm25_vm1, %v3672_v0  ;;  %391 = vrot.lane.b32.xlu1 %v224_v39, %s3673_s0  ;;  %389 = vrot.lane.b32.xlu0 %v223_v40, %s3673_s0 }
  0x5d   :  { %181 = vst.msk [vmem:[#allocation2 + $0x4e0] sm:$0xff] %vm23_vm0, %v3672_v0  ;;  %183 = vst.msk [vmem:[#allocation2 + $0x4f0] sm:$0xff] %vm23_vm0, %v3672_v0 }
  0x5e   :  { %182 = vst.msk [vmem:[#allocation2 + $0x4e8] sm:$0x3] %vm25_vm1, %v3672_v0  ;;  %184 = vst.msk [vmem:[#allocation2 + $0x4f8] sm:$0x3] %vm25_vm1, %v3672_v0  ;;  %v572_v0 = vld [vmem:[#allocation2 + $0x8] sm:$0x3] }
  0x5f   :  { %v588_v10 = vmul.f32 0.27406862, %v572_v0 }
  0x60   :  { %395 = vrot.lane.b32.xlu1 %v226_v41, %s3673_s0  ;;  %393 = vrot.lane.b32.xlu0 %v225_v42, %s3673_s0 }
  0x64   :  { %399 = vrot.lane.b32.xlu1 %v228_v43, %s3673_s0  ;;  %397 = vrot.lane.b32.xlu0 %v227_v44, %s3673_s0 }
  0x68   :  { %403 = vrot.lane.b32.xlu1 %v230_v45, %s3673_s0  ;;  %401 = vrot.lane.b32.xlu0 %v229_v46, %s3673_s0 }
  0x6c   :  { %407 = vrot.lane.b32.xlu1 %v232_v47, %s3673_s0  ;;  %405 = vrot.lane.b32.xlu0 %v231_v48, %s3673_s0 }
  0x70   :  { %411 = vrot.lane.b32.xlu1 %v234_v49, %s3673_s0  ;;  %409 = vrot.lane.b32.xlu0 %v233_v50, %s3673_s0  ;;  %v4103_v50 = vmul.f32 0.27406862, %v582_v32 }
  0x74   :  { %415 = vrot.lane.b32.xlu1 %v236_v51, %s3673_s0  ;;  %413 = vrot.lane.b32.xlu0 %v235_v52, %s3673_s0 }
  0x78   :  { %419 = vrot.lane.b32.xlu1 %v238_v53, %s3673_s0  ;;  %417 = vrot.lane.b32.xlu0 %v237_v54, %s3673_s0 }
  0x7c   :  { %423 = vrot.lane.b32.xlu1 %v240_v55, %s3673_s0  ;;  %421 = vrot.lane.b32.xlu0 %v239_v56, %s3673_s0 }
  0x80   :  { %427 = vrot.lane.b32.xlu1 %v242_v57, %s3673_s0  ;;  %425 = vrot.lane.b32.xlu0 %v241_v58, %s3673_s0 }
  0x82   :  { %v318_v61 = vpop.permute.xlu1 %317  ;;  %v314_v62 = vpop.permute.xlu0 %313 }
  0x83   :  { %509 = vst.msk [vmem:[#allocation2 + $0x31] sm:$0xff] %vm506_vm2, %v318_v61  ;;  %507 = vst.msk [vmem:[#allocation2 + $0x11] sm:$0xff] %vm506_vm2, %v314_v62 }
  0x84   :  { %429 = vrot.lane.b32.xlu0 %v243_v59, %s3673_s0  ;;  %431 = vrot.lane.b32.xlu1 %v244_v60, %s3673_s0  ;;  %v4105_v59 = vmul.f32 0.27406862, %v583_v35  ;;  %v4107_v60 = vmul.f32 0.27406862, %v584_v36 }
  0x86   :  { %v320_v8 = vpop.permute.xlu1 %319  ;;  %v316_v9 = vpop.permute.xlu0 %315 }
  0x87   :  { %510 = vst.msk [vmem:[#allocation2 + $0x41] sm:$0xff] %vm506_vm2, %v320_v8  ;;  %508 = vst.msk [vmem:[#allocation2 + $0x21] sm:$0xff] %vm506_vm2, %v316_v9 }
  0x88   :  { %433 = vrot.lane.b32.xlu0 %v245_v1, %s3673_s0  ;;  %435 = vrot.lane.b32.xlu1 %v246_v5, %s3673_s0 }
  0x8a   :  { %v324_v24 = vpop.permute.xlu1 %323  ;;  %v322_v25 = vpop.permute.xlu0 %321  ;;  %v603_v26 = vld [vmem:[#allocation2 + $0x10] sm:$0xff]  ;;  %v604_v27 = vld [vmem:[#allocation2 + $0x18] sm:$0x3] }
  0x8b   :  { %512 = vst.msk [vmem:[#allocation2 + $0x61] sm:$0xff] %vm506_vm2, %v324_v24  ;;  %511 = vst.msk [vmem:[#allocation2 + $0x51] sm:$0xff] %vm506_vm2, %v322_v25  ;;  %v619_v29 = vmul.f32 0.45186275, %v603_v26  ;;  %v620_v30 = vmul.f32 0.45186275, %v604_v27 }
  0x8c   :  { %437 = vrot.lane.b32.xlu0 %v247_v13, %s3673_s0  ;;  %439 = vrot.lane.b32.xlu1 %v248_v20, %s3673_s0  ;;  %v952_v34 = vld [vmem:[#allocation2 + $0x18] sm:$0x3]  ;;  %v967_v37 = vmul.f32 0.27406862, %v603_v26  ;;  %v1032_v38 = vld [vmem:[#allocation2 + $0x30] sm:$0xff] }
  0x8d   :  { %v1033_v39 = vld [vmem:[#allocation2 + $0x38] sm:$0x3]  ;;  %v635_v42 = vadd.f32 %v619_v29, %v587_v4  ;;  %v636_v46 = vadd.f32 %v620_v30, %v588_v10  ;;  %v968_v51 = vmul.f32 0.27406862, %v952_v34  ;;  %v1048_v56 = vmul.f32 0.27406862, %v1032_v38 }
  0x8e   :  { %v328_v40 = vpop.permute.xlu1 %327  ;;  %v326_v41 = vpop.permute.xlu0 %325  ;;  %v652_v43 = vld [vmem:[#allocation2 + $0x20] sm:$0xff]  ;;  %v653_v44 = vld [vmem:[#allocation2 + $0x28] sm:$0x3]  ;;  %v1049_v62 = vmul.f32 0.27406862, %v1033_v39 }
  0x8f   :  { %v984_v45 = vld [vmem:[#allocation2 + $0x28] sm:$0x3]  ;;  %514 = vst.msk [vmem:[#allocation2 + $0x81] sm:$0xff] %vm506_vm2, %v328_v40  ;;  %513 = vst.msk [vmem:[#allocation2 + $0x71] sm:$0xff] %vm506_vm2, %v326_v41  ;;  %v668_v47 = vmul.f32 0.27406862, %v652_v43 }
  0x90   :  { %v669_v48 = vmul.f32 0.27406862, %v653_v44  ;;  %v999_v49 = vmul.f32 0.45186275, %v652_v43  ;;  %v1000_v52 = vmul.f32 0.45186275, %v984_v45 }
  0x91   :  { %v684_v53 = vadd.f32 %v668_v47, %v635_v42  ;;  %v585_v4 = vld [vmem:[#allocation2 + $0x460] sm:$0xff]  ;;  %v1330_v7 = vld [vmem:[#allocation2 + $0x28] sm:$0x3]  ;;  %v1362_v11 = vld [vmem:[#allocation2 + $0x38] sm:$0x3] }
  0x92   :  { %v685_v54 = vadd.f32 %v669_v48, %v636_v46  ;;  %v1015_v55 = vadd.f32 %v999_v49, %v967_v37  ;;  %v332_v57 = vpop.permute.xlu1 %331  ;;  %v330_v58 = vpop.permute.xlu0 %329  ;;  %v1016_v61 = vadd.f32 %v1000_v52, %v968_v51  ;;  %v1329_v6 = vld [vmem:[#allocation2 + $0x20] sm:$0xff]  ;;  %v4114_v24 = vmul.f32 0.27406862, %v585_v4  ;;  %v1411_v51 = vld [vmem:[#allocation2 + $0x48] sm:$0x3] }
  0x93   :  { %516 = vst.msk [vmem:[#allocation2 + $0xc1] sm:$0xff] %vm506_vm2, %v332_v57  ;;  %515 = vst.msk [vmem:[#allocation2 + $0xb1] sm:$0xff] %vm506_vm2, %v330_v58  ;;  %v700_v63 = vmul.f32 0.27406862, %v684_v53  ;;  %v708_v0 = vmul.f32 0.45186275, %v684_v53 }
  0x94   :  { %v709_v1 = vmul.f32 0.45186275, %v685_v54  ;;  %v1064_v2 = vadd.f32 %v1048_v56, %v1015_v55  ;;  %v781_v3 = vmul.f32 0.27406862, %v685_v54  ;;  %v1065_v5 = vadd.f32 %v1049_v62, %v1016_v61  ;;  %v1410_v34 = vld [vmem:[#allocation2 + $0x40] sm:$0xff] }
  0x95   :  { %v741_v8 = vrot.slane %v708_v0, 1  ;;  %v806_v10 = vrot.slane %v700_v63, 2  ;;  %v1345_v25 = vmul.f32 0.27406862, %v1329_v6  ;;  %v1346_v26 = vmul.f32 0.27406862, %v1330_v7 }
  0x96   :  { %v742_v9 = vrot.slane %v709_v1, 1  ;;  %v336_v12 = vpop.permute.xlu1 %335  ;;  %v334_v13 = vpop.permute.xlu0 %333  ;;  %v807_v16 = vrot.slane %v781_v3, 2  ;;  %v1088_v19 = vmul.f32 0.45186275, %v1064_v2  ;;  %v1089_v20 = vmul.f32 0.45186275, %v1065_v5 }
  0x97   :  { %518 = vst.msk [vmem:[#allocation2 + $0xe1] sm:$0xff] %vm506_vm2, %v336_v12  ;;  %517 = vst.msk [vmem:[#allocation2 + $0xd1] sm:$0xff] %vm506_vm2, %v334_v13  ;;  %v1377_v32 = vmul.f32 0.45186275, %v1032_v38  ;;  %v1080_v36 = vmul.f32 0.27406862, %v1064_v2 }
  0x98   :  { %v743_v23 = vsel %vm740_vm3, %v741_v8, %v742_v9  ;;  %v1120_v29 = vrot.slane %v1088_v19, 1  ;;  %v1121_v30 = vrot.slane %v1089_v20, 1  ;;  %v808_v35 = vsel %vm805_vm4, %v806_v10, %v807_v16 }
  0x99   :  { %v773_v27 = vadd.f32 %v743_v23, %v700_v63  ;;  %v1160_v37 = vmul.f32 0.27406862, %v1065_v5  ;;  %v1378_v39 = vmul.f32 0.45186275, %v1362_v11  ;;  %v4119_v46 = vmul.f32 0.27406862, %v1410_v34 }
  0x9a   :  { %v340_v40 = vpop.permute.xlu1 %339  ;;  %v338_v41 = vpop.permute.xlu0 %337  ;;  %v605_v43 = vld [vmem:[#allocation2 + $0xb0] sm:$0xff]  ;;  %v606_v44 = vld [vmem:[#allocation2 + $0xb8] sm:$0x3]  ;;  %v654_v45 = vld [vmem:[#allocation2 + $0xc0] sm:$0xff]  ;;  %v1122_v49 = vsel %vm740_vm3, %v1120_v29, %v1121_v30  ;;  %v1393_v55 = vadd.f32 %v1377_v32, %v1345_v25  ;;  %v1184_v58 = vrot.slane %v1080_v36, 2 }
  0x9b   :  { %v4117_v42 = vadd.f32 %v808_v35, %v773_v27  ;;  %5663 = vst [vmem:[#allocation9_spill] sm:$0xff] %v4119_v46  ;;  %520 = vst.msk [vmem:[#allocation2 + $0x101] sm:$0xff] %vm506_vm2, %v340_v40  ;;  %v621_v38 = vmul.f32 0.45186275, %v605_v43  ;;  %v622_v47 = vmul.f32 0.45186275, %v606_v44  ;;  %v1152_v2 = vadd.f32 %v1122_v49, %v1080_v36 }
  0x9c   :  { %519 = vst.msk [vmem:[#allocation2 + $0xf1] sm:$0xff] %vm506_vm2, %v338_v41  ;;  %v655_v48 = vld [vmem:[#allocation2 + $0xc8] sm:$0x3]  ;;  %v670_v53 = vmul.f32 0.27406862, %v654_v45  ;;  %v1185_v61 = vrot.slane %v1160_v37, 2  ;;  %v1394_v5 = vadd.f32 %v1378_v39, %v1346_v26  ;;  %v1442_v16 = vadd.f32 %v4119_v46, %v1393_v55 }
  0x9d   :  { %v854_v52 = vmul.f32 0.45186275, %v4117_v42  ;;  %v671_v54 = vmul.f32 0.27406862, %v655_v48  ;;  %v637_v56 = vadd.f32 %v621_v38, %v4077_v14  ;;  %v638_v57 = vadd.f32 %v622_v47, %v4079_v15  ;;  %v954_v62 = vld [vmem:[#allocation2 + $0xb8] sm:$0x3] }
  0x9e   :  { %v986_v63 = vld [vmem:[#allocation2 + $0xc8] sm:$0x3]  ;;  %v344_v0 = vpop.permute.xlu1 %343  ;;  %v342_v1 = vpop.permute.xlu0 %341  ;;  %v969_v3 = vmul.f32 0.27406862, %v605_v43  ;;  %v1001_v4 = vmul.f32 0.45186275, %v654_v45  ;;  %v1186_v25 = vsel %vm805_vm4, %v1184_v58, %v1185_v61 }
  0x9f   :  { %870 = vrot.lane.b32.xlu0 %v854_v52, %s3674_s13  ;;  %522 = vst.msk [vmem:[#allocation2 + $0x121] sm:$0xff] %vm506_vm2, %v344_v0  ;;  %521 = vst.msk [vmem:[#allocation2 + $0x111] sm:$0xff] %vm506_vm2, %v342_v1  ;;  %v686_v14 = vadd.f32 %v670_v53, %v637_v56  ;;  %v687_v6 = vadd.f32 %v671_v54, %v638_v57  ;;  %v586_v15 = vld [vmem:[#allocation2 + $0x468] sm:$0x3]  ;;  %v970_v7 = vmul.f32 0.27406862, %v954_v62 }
  0xa0   :  { %v1002_v8 = vmul.f32 0.45186275, %v986_v63  ;;  %v4130_v9 = vld [vmem:[#allocation2 + $0xd0] sm:$0xff]  ;;  %v1017_v10 = vadd.f32 %v1001_v4, %v969_v3  ;;  %v1035_v11 = vld [vmem:[#allocation2 + $0xd8] sm:$0x3]  ;;  %v1216_v30 = vadd.f32 %v1186_v25, %v1152_v2 }
  0xa1   :  { %v4133_v12 = vmul.f32 0.27406862, %v4130_v9  ;;  %v1427_v13 = vmul.f32 0.27406862, %v1411_v51  ;;  %v701_v19 = vmul.f32 0.27406862, %v686_v14 }
  0xa2   :  { %v710_v20 = vmul.f32 0.45186275, %v686_v14  ;;  %v711_v23 = vmul.f32 0.45186275, %v687_v6  ;;  %v348_v26 = vpop.permute.xlu1 %347  ;;  %v346_v27 = vpop.permute.xlu0 %345  ;;  %v782_v29 = vmul.f32 0.27406862, %v687_v6  ;;  %v1018_v39 = vadd.f32 %v1002_v8, %v970_v7 }
  0xa3   :  { %5664 = vst [vmem:[#allocation10_spill] sm:$0xff] %v4133_v12  ;;  %v1051_v32 = vmul.f32 0.27406862, %v1035_v11  ;;  %v1066_v34 = vadd.f32 %v4133_v12, %v1017_v10  ;;  %524 = vst.msk [vmem:[#allocation2 + $0x161] sm:$0xff] %vm506_vm2, %v348_v26  ;;  %v809_v37 = vrot.slane %v701_v19, 2  ;;  %v1707_v40 = vld [vmem:[#allocation2 + $0x30] sm:$0xff]  ;;  %v1443_v45 = vadd.f32 %v1427_v13, %v1394_v5 }
  0xa4   :  { %523 = vst.msk [vmem:[#allocation2 + $0x151] sm:$0xff] %vm506_vm2, %v346_v27  ;;  %v744_v35 = vrot.slane %v710_v20, 1  ;;  %v745_v36 = vrot.slane %v711_v23, 1  ;;  %v1708_v41 = vld [vmem:[#allocation2 + $0x38] sm:$0x3]  ;;  %v810_v43 = vrot.slane %v782_v29, 2 }
  0xa5   :  { %v4140_v44 = vmul.f32 0.27406862, %v586_v15  ;;  %v4142_v38 = vmul.f32 0.45186275, %v1442_v16  ;;  %v1067_v48 = vadd.f32 %v1051_v32, %v1018_v39  ;;  %v4145_v49 = vmul.f32 0.27406862, %v1066_v34 }
  0xa6   :  { %v746_v47 = vsel %vm740_vm3, %v744_v35, %v745_v36  ;;  %v4147_v51 = vmul.f32 0.45186275, %v1066_v34  ;;  %v352_v52 = vpop.permute.xlu1 %351  ;;  %v350_v53 = vpop.permute.xlu0 %349  ;;  %v4150_v55 = vmul.f32 0.27406862, %v4117_v42  ;;  %v4152_v56 = vmul.f32 0.27406862, %v1707_v40 }
  0xa7   :  { %v774_v54 = vadd.f32 %v746_v47, %v701_v19  ;;  %v4154_v57 = vmul.f32 0.27406862, %v1708_v41  ;;  %526 = vst.msk [vmem:[#allocation2 + $0x181] sm:$0xff] %vm506_vm2, %v352_v52  ;;  %525 = vst.msk [vmem:[#allocation2 + $0x171] sm:$0xff] %vm506_vm2, %v350_v53  ;;  %v811_v58 = vsel %vm805_vm4, %v809_v37, %v810_v43  ;;  %v4159_v61 = vmul.f32 0.45186275, %v1216_v30 }
  0xa8   :  { %v4161_v62 = vmul.f32 0.27406862, %v1216_v30  ;;  %v4163_v63 = vmul.f32 0.27406862, %v1442_v16  ;;  %v4167_v42 = vmul.f32 0.45186275, %v1443_v45 }
  0xa9   :  { %v4165_v0 = vadd.f32 %v811_v58, %v774_v54  ;;  %v1498_v1 = vrot.slane %v4142_v38, 1  ;;  %v4170_v2 = vmul.f32 0.27406862, %v1443_v45  ;;  %v4172_v3 = vmul.f32 0.45186275, %v1067_v48 }
  0xaa   :  { %5665 = vst [vmem:[#allocation11_spill] sm:$0xff] %v4161_v62  ;;  %v1123_v4 = vrot.slane %v4147_v51, 1  ;;  %v4175_v5 = vmul.f32 0.27406862, %v1067_v48  ;;  %v1187_v14 = vrot.slane %v4145_v49, 2  ;;  %v356_v6 = vpop.permute.xlu1 %355  ;;  %v354_v15 = vpop.permute.xlu0 %353  ;;  %v656_v11 = vld [vmem:[#allocation2 + $0x160] sm:$0xff] }
  0xab   :  { %v855_v7 = vmul.f32 0.45186275, %v4165_v0  ;;  %v607_v8 = vld [vmem:[#allocation2 + $0x150] sm:$0xff]  ;;  %v608_v10 = vld [vmem:[#allocation2 + $0x158] sm:$0x3]  ;;  %528 = vst.msk [vmem:[#allocation2 + $0x1a1] sm:$0xff] %vm506_vm2, %v356_v6 }
  0xac   :  { %527 = vst.msk [vmem:[#allocation2 + $0x191] sm:$0xff] %vm506_vm2, %v354_v15  ;;  %v623_v13 = vmul.f32 0.45186275, %v607_v8  ;;  %v624_v16 = vmul.f32 0.45186275, %v608_v10  ;;  %v1499_v25 = vrot.slane %v4167_v42, 1 }
  0xad   :  { %v657_v19 = vld [vmem:[#allocation2 + $0x168] sm:$0x3]  ;;  %872 = vrot.lane.b32.xlu1 %v855_v7, %s3674_s13  ;;  %v672_v20 = vmul.f32 0.27406862, %v656_v11  ;;  %v1562_v26 = vrot.slane %v4163_v63, 2  ;;  %v1331_v48 = vld [vmem:[#allocation2 + $0xc0] sm:$0xff] }
  0xae   :  { %v673_v23 = vmul.f32 0.27406862, %v657_v19  ;;  %v639_v27 = vadd.f32 %v623_v13, %v4083_v17  ;;  %v640_v29 = vadd.f32 %v624_v16, %v4085_v18  ;;  %v956_v30 = vld [vmem:[#allocation2 + $0x158] sm:$0x3]  ;;  %v971_v32 = vmul.f32 0.27406862, %v607_v8  ;;  %v360_v35 = vpop.permute.xlu1 %359  ;;  %v358_v36 = vpop.permute.xlu0 %357 }
  0xaf   :  { %v988_v34 = vld [vmem:[#allocation2 + $0x168] sm:$0x3]  ;;  %v972_v37 = vmul.f32 0.27406862, %v956_v30  ;;  %v1003_v39 = vmul.f32 0.45186275, %v656_v11 }
  0xb0   :  { %v1004_v40 = vmul.f32 0.45186275, %v988_v34  ;;  %530 = vst.msk [vmem:[#allocation2 + $0x1c1] sm:$0xff] %vm506_vm2, %v360_v35  ;;  %529 = vst.msk [vmem:[#allocation2 + $0x1b1] sm:$0xff] %vm506_vm2, %v358_v36  ;;  %v688_v41 = vadd.f32 %v672_v20, %v639_v27  ;;  %v689_v43 = vadd.f32 %v673_v23, %v640_v29  ;;  %v1036_v45 = vld [vmem:[#allocation2 + $0x170] sm:$0xff]  ;;  %v1124_v17 = vrot.slane %v4172_v3, 1 }
  0xb1   :  { %v1037_v47 = vld [vmem:[#allocation2 + $0x178] sm:$0x3]  ;;  %v1563_v18 = vrot.slane %v4170_v2, 2  ;;  %v1019_v52 = vadd.f32 %v1003_v39, %v971_v32  ;;  %v1052_v54 = vmul.f32 0.27406862, %v1036_v45  ;;  %v1188_v23 = vrot.slane %v4175_v5, 2 }
  0xb2   :  { %v1020_v53 = vadd.f32 %v1004_v40, %v972_v37  ;;  %v1053_v58 = vmul.f32 0.27406862, %v1037_v47  ;;  %v702_v42 = vmul.f32 0.27406862, %v688_v41  ;;  %v712_v6 = vmul.f32 0.45186275, %v688_v41  ;;  %v364_v7 = vpop.permute.xlu1 %363  ;;  %v362_v8 = vpop.permute.xlu0 %361 }
  0xb3   :  { %v713_v15 = vmul.f32 0.45186275, %v689_v43  ;;  %v783_v10 = vmul.f32 0.27406862, %v689_v43  ;;  %v1068_v11 = vadd.f32 %v1052_v54, %v1019_v52  ;;  %v4190_v16 = vmul.f32 0.27406862, %v1331_v48 }
  0xb4   :  { %v1069_v13 = vadd.f32 %v1053_v58, %v1020_v53  ;;  %532 = vst.msk [vmem:[#allocation2 + $0x201] sm:$0xff] %vm506_vm2, %v364_v7  ;;  %531 = vst.msk [vmem:[#allocation2 + $0x1f1] sm:$0xff] %vm506_vm2, %v362_v8  ;;  %v747_v3 = vrot.slane %v712_v6, 1  ;;  %v812_v20 = vrot.slane %v702_v42, 2  ;;  %v1332_v27 = vld [vmem:[#allocation2 + $0xc8] sm:$0x3]  ;;  %v1125_v47 = vsel %vm740_vm3, %v1123_v4, %v1124_v17 }
  0xb5   :  { %v748_v19 = vrot.slane %v713_v15, 1  ;;  %v813_v29 = vrot.slane %v783_v10, 2  ;;  %v4195_v30 = vmul.f32 0.27406862, %v1068_v11  ;;  %v1092_v32 = vmul.f32 0.45186275, %v1068_v11 }
  0xb6   :  { %v1333_v34 = vld [vmem:[#allocation2 + $0x160] sm:$0xff]  ;;  %v1093_v36 = vmul.f32 0.45186275, %v1069_v13  ;;  %v4198_v37 = vmul.f32 0.27406862, %v1069_v13  ;;  %v368_v40 = vpop.permute.xlu1 %367  ;;  %v366_v41 = vpop.permute.xlu0 %365  ;;  %v1500_v5 = vsel %vm740_vm3, %v1498_v1, %v1499_v25 }
  0xb7   :  { %v749_v35 = vsel %vm740_vm3, %v747_v3, %v748_v19  ;;  %v1334_v39 = vld [vmem:[#allocation2 + $0x168] sm:$0x3]  ;;  %v1366_v48 = vld [vmem:[#allocation2 + $0x178] sm:$0x3]  ;;  %v4206_v52 = vmul.f32 0.27406862, %v1332_v27  ;;  %v814_v53 = vsel %vm805_vm4, %v812_v20, %v813_v29  ;;  %v1530_v20 = vadd.f32 %v1500_v5, %v4163_v63 }
  0xb8   :  { %v775_v43 = vadd.f32 %v749_v35, %v702_v42  ;;  %534 = vst.msk [vmem:[#allocation2 + $0x221] sm:$0xff] %vm506_vm2, %v368_v40  ;;  %533 = vst.msk [vmem:[#allocation2 + $0x211] sm:$0xff] %vm506_vm2, %v366_v41  ;;  %v1126_v54 = vrot.slane %v1092_v32, 1  ;;  %v1127_v58 = vrot.slane %v1093_v36, 1  ;;  %v1349_v42 = vmul.f32 0.27406862, %v1333_v34 }
  0xb9   :  { %v1414_v6 = vld [vmem:[#allocation2 + $0x180] sm:$0xff]  ;;  %v1190_v4 = vrot.slane %v4195_v30, 2  ;;  %v1191_v38 = vrot.slane %v4198_v37, 2  ;;  %v1350_v1 = vmul.f32 0.27406862, %v1334_v39  ;;  %v1153_v34 = vadd.f32 %v1125_v47, %v4145_v49 }
  0xba   :  { %v4211_v51 = vadd.f32 %v814_v53, %v775_v43  ;;  %v1415_v25 = vld [vmem:[#allocation2 + $0x188] sm:$0x3]  ;;  %v1381_v17 = vmul.f32 0.45186275, %v1036_v45  ;;  %v1382_v15 = vmul.f32 0.45186275, %v1366_v48  ;;  %v372_v8 = vpop.permute.xlu1 %371  ;;  %v370_v10 = vpop.permute.xlu0 %369  ;;  %v1128_v45 = vsel %vm740_vm3, %v1126_v54, %v1127_v58 }
  0xbb   :  { %v1430_v7 = vmul.f32 0.27406862, %v1414_v6  ;;  %v609_v13 = vld [vmem:[#allocation2 + $0x1f0] sm:$0xff]  ;;  %v610_v3 = vld [vmem:[#allocation2 + $0x1f8] sm:$0x3]  ;;  %v658_v19 = vld [vmem:[#allocation2 + $0x200] sm:$0xff]  ;;  %v1564_v37 = vsel %vm805_vm4, %v1562_v26, %v1563_v18  ;;  %v1189_v43 = vsel %vm805_vm4, %v1187_v14, %v1188_v23  ;;  %v1154_v2 = vadd.f32 %v1128_v45, %v4195_v30 }
  0xbc   :  { %v856_v11 = vmul.f32 0.45186275, %v4211_v51  ;;  %536 = vst.msk [vmem:[#allocation2 + $0x241] sm:$0xff] %vm506_vm2, %v372_v8  ;;  %535 = vst.msk [vmem:[#allocation2 + $0x231] sm:$0xff] %vm506_vm2, %v370_v10  ;;  %v625_v27 = vmul.f32 0.45186275, %v609_v13  ;;  %v1397_v6 = vadd.f32 %v1381_v17, %v1349_v42  ;;  %v1217_v26 = vadd.f32 %v1189_v43, %v1153_v34 }
  0xbd   :  { %v626_v29 = vmul.f32 0.45186275, %v610_v3  ;;  %v659_v32 = vld [vmem:[#allocation2 + $0x208] sm:$0x3]  ;;  %v674_v35 = vmul.f32 0.27406862, %v658_v19  ;;  %v1192_v23 = vsel %vm805_vm4, %v1190_v4, %v1191_v38 }
  0xbe   :  { %874 = vrot.lane.b32.xlu0 %v856_v11, %s3674_s13  ;;  %v675_v36 = vmul.f32 0.27406862, %v659_v32  ;;  %v1431_v39 = vmul.f32 0.27406862, %v1415_v25  ;;  %v641_v40 = vadd.f32 %v625_v27, %v4087_v21  ;;  %v958_v47 = vld [vmem:[#allocation2 + $0x1f8] sm:$0x3]  ;;  %v376_v53 = vpop.permute.xlu1 %375  ;;  %v374_v54 = vpop.permute.xlu0 %373  ;;  %v1398_v11 = vadd.f32 %v1382_v15, %v1350_v1 }
  0xbf   :  { %v642_v41 = vadd.f32 %v626_v29, %v4089_v22  ;;  %v973_v5 = vmul.f32 0.27406862, %v609_v13  ;;  %v990_v48 = vld [vmem:[#allocation2 + $0x208] sm:$0x3]  ;;  %v974_v58 = vmul.f32 0.27406862, %v958_v47  ;;  %v4241_v27 = vadd.f32 %v1192_v23, %v1154_v2 }
  0xc0   :  { %v1005_v63 = vmul.f32 0.45186275, %v658_v19  ;;  %538 = vst.msk [vmem:[#allocation2 + $0x261] sm:$0xff] %vm506_vm2, %v376_v53  ;;  %537 = vst.msk [vmem:[#allocation2 + $0x251] sm:$0xff] %vm506_vm2, %v374_v54  ;;  %v690_v21 = vadd.f32 %v674_v35, %v641_v40  ;;  %v1006_v49 = vmul.f32 0.45186275, %v990_v48  ;;  %v4243_v29 = vadd.f32 %v1564_v37, %v1530_v20 }
  0xc1   :  { %v691_v22 = vadd.f32 %v675_v36, %v642_v41  ;;  %v4235_v18 = vld [vmem:[#allocation2 + $0x210] sm:$0xff]  ;;  %v1039_v14 = vld [vmem:[#allocation2 + $0x218] sm:$0x3]  ;;  %v1446_v32 = vadd.f32 %v1430_v7, %v1397_v6  ;;  %v4248_v1 = vmul.f32 0.27406862, %v4165_v0  ;;  %v4257_v41 = vadd.f32 %v1431_v39, %v1398_v11 }
  0xc2   :  { %v1021_v25 = vadd.f32 %v1005_v63, %v973_v5  ;;  %v4239_v8 = vmul.f32 0.27406862, %v4235_v18  ;;  %v1055_v30 = vmul.f32 0.27406862, %v1039_v14  ;;  %v703_v10 = vmul.f32 0.27406862, %v690_v21  ;;  %v380_v13 = vpop.permute.xlu1 %379  ;;  %v378_v3 = vpop.permute.xlu0 %377 }
  0xc3   :  { %v714_v42 = vmul.f32 0.45186275, %v690_v21  ;;  %v715_v17 = vmul.f32 0.45186275, %v691_v22  ;;  %v784_v19 = vmul.f32 0.27406862, %v691_v22  ;;  %v1022_v34 = vadd.f32 %v1006_v49, %v974_v58 }
  0xc4   :  { %5666 = vst [vmem:[#allocation12_spill] sm:$0xff] %v4239_v8  ;;  %540 = vst.msk [vmem:[#allocation2 + $0x2a1] sm:$0xff] %vm506_vm2, %v380_v13  ;;  %v815_v45 = vrot.slane %v703_v10, 2  ;;  %v1364_v35 = vld [vmem:[#allocation2 + $0xd8] sm:$0x3]  ;;  %v1070_v15 = vadd.f32 %v4239_v8, %v1021_v25 }
  0xc5   :  { %539 = vst.msk [vmem:[#allocation2 + $0x291] sm:$0xff] %vm506_vm2, %v378_v3  ;;  %v750_v4 = vrot.slane %v714_v42, 1  ;;  %v751_v38 = vrot.slane %v715_v17, 1  ;;  %v816_v36 = vrot.slane %v784_v19, 2  ;;  %v4252_v40 = vmul.f32 0.45186275, %v4130_v9 }
  0xc6   :  { %v4255_v20 = vmul.f32 0.45186275, %v1217_v26  ;;  %v1071_v37 = vadd.f32 %v1055_v30, %v1022_v34  ;;  %v384_v43 = vpop.permute.xlu1 %383  ;;  %v382_v47 = vpop.permute.xlu0 %381  ;;  %v4259_v48 = vmul.f32 0.27406862, %v1217_v26  ;;  %v4262_v0 = vmul.f32 0.45186275, %v4243_v29 }
  0xc7   :  { %v752_v7 = vsel %vm740_vm3, %v750_v4, %v751_v38  ;;  %v4264_v53 = vmul.f32 0.45186275, %v1364_v35  ;;  %542 = vst.msk [vmem:[#allocation2 + $0x2c1] sm:$0xff] %vm506_vm2, %v384_v43  ;;  %541 = vst.msk [vmem:[#allocation2 + $0x2b1] sm:$0xff] %vm506_vm2, %v382_v47  ;;  %v817_v9 = vsel %vm805_vm4, %v815_v45, %v816_v36  ;;  %v4270_v54 = vmul.f32 0.27406862, %v4211_v51 }
  0xc8   :  { %v776_v5 = vadd.f32 %v752_v7, %v703_v10  ;;  %5667 = vst [vmem:[#allocation13_spill] sm:$0xff] %v4259_v48  ;;  %5668 = vst [vmem:[#allocation14_spill] sm:$0xff] %v4262_v0  ;;  %v4273_v39 = vmul.f32 0.45186275, %v4241_v27  ;;  %v4275_v2 = vmul.f32 0.27406862, %v1446_v32 }
  0xc9   :  { %5669 = vst [vmem:[#allocation15_spill] sm:$0xff] %v4270_v54  ;;  %v4279_v63 = vmul.f32 0.27406862, %v1070_v15  ;;  %v4281_v6 = vmul.f32 0.45186275, %v1070_v15 }
  0xca   :  { %v4277_v58 = vadd.f32 %v817_v9, %v776_v5  ;;  %v4283_v21 = vmul.f32 0.45186275, %v1446_v32  ;;  %v1095_v22 = vmul.f32 0.45186275, %v1071_v37  ;;  %v4285_v26 = vmul.f32 0.27406862, %v1071_v37  ;;  %v388_v51 = vpop.permute.xlu1 %387  ;;  %v386_v14 = vpop.permute.xlu0 %385 }
  0xcb   :  { %v4288_v49 = vmul.f32 0.45186275, %v4257_v41  ;;  %v660_v10 = vld [vmem:[#allocation2 + $0x2a0] sm:$0xff]  ;;  %544 = vst.msk [vmem:[#allocation2 + $0x2e1] sm:$0xff] %vm506_vm2, %v388_v51  ;;  %543 = vst.msk [vmem:[#allocation2 + $0x2d1] sm:$0xff] %vm506_vm2, %v386_v14  ;;  %v1129_v19 = vrot.slane %v4281_v6, 1 }
  0xcc   :  { %v857_v23 = vmul.f32 0.45186275, %v4277_v58  ;;  %v611_v25 = vld [vmem:[#allocation2 + $0x290] sm:$0xff]  ;;  %v612_v30 = vld [vmem:[#allocation2 + $0x298] sm:$0x3]  ;;  %v1504_v32 = vrot.slane %v4283_v21, 1 }
  0xcd   :  { %v627_v42 = vmul.f32 0.45186275, %v611_v25  ;;  %v628_v17 = vmul.f32 0.45186275, %v612_v30  ;;  %v661_v11 = vld [vmem:[#allocation2 + $0x2a8] sm:$0x3] }
  0xce   :  { %876 = vrot.lane.b32.xlu1 %v857_v23, %s3674_s13  ;;  %v4294_v13 = vmul.f32 0.27406862, %v660_v10  ;;  %v677_v3 = vmul.f32 0.27406862, %v661_v11  ;;  %v960_v45 = vld [vmem:[#allocation2 + $0x298] sm:$0x3]  ;;  %v392_v36 = vpop.permute.xlu1 %391  ;;  %v390_v15 = vpop.permute.xlu0 %389 }
  0xcf   :  { %v643_v4 = vadd.f32 %v627_v42, %v4091_v28  ;;  %v644_v38 = vadd.f32 %v628_v17, %v4095_v31  ;;  %v975_v34 = vmul.f32 0.27406862, %v611_v25  ;;  %v992_v35 = vld [vmem:[#allocation2 + $0x2a8] sm:$0x3]  ;;  %v976_v7 = vmul.f32 0.27406862, %v960_v45 }
  0xd0   :  { %v1007_v37 = vmul.f32 0.45186275, %v660_v10  ;;  %v1008_v43 = vmul.f32 0.45186275, %v992_v35  ;;  %546 = vst.msk [vmem:[#allocation2 + $0x301] sm:$0xff] %vm506_vm2, %v392_v36  ;;  %545 = vst.msk [vmem:[#allocation2 + $0x2f1] sm:$0xff] %vm506_vm2, %v390_v15  ;;  %v1395_v42 = vadd.f32 %v4252_v40, %v4190_v16 }
  0xd1   :  { %v692_v47 = vadd.f32 %v4294_v13, %v643_v4  ;;  %v693_v5 = vadd.f32 %v677_v3, %v644_v38  ;;  %v1040_v9 = vld [vmem:[#allocation2 + $0x2b0] sm:$0xff]  ;;  %v1041_v6 = vld [vmem:[#allocation2 + $0x2b8] sm:$0x3]  ;;  %v1130_v28 = vrot.slane %v1095_v22, 1  ;;  %v1193_v31 = vrot.slane %v4279_v63, 2  ;;  %v1412_v15 = vld [vmem:[#allocation2 + $0xe0] sm:$0xff] }
  0xd2   :  { %v1023_v21 = vadd.f32 %v1007_v37, %v975_v34  ;;  %v1024_v51 = vadd.f32 %v1008_v43, %v976_v7  ;;  %v4304_v14 = vmul.f32 0.27406862, %v1040_v9  ;;  %v1057_v23 = vmul.f32 0.27406862, %v1041_v6  ;;  %v396_v17 = vpop.permute.xlu1 %395  ;;  %v394_v11 = vpop.permute.xlu0 %393  ;;  %v1338_v43 = vld [vmem:[#allocation2 + $0x2a8] sm:$0x3] }
  0xd3   :  { %v704_v25 = vmul.f32 0.27406862, %v692_v47  ;;  %v716_v30 = vmul.f32 0.45186275, %v692_v47  ;;  %v717_v10 = vmul.f32 0.45186275, %v693_v5  ;;  %v1131_v40 = vsel %vm740_vm3, %v1129_v19, %v1130_v28 }
  0xd4   :  { %v785_v4 = vmul.f32 0.27406862, %v693_v5  ;;  %v1072_v3 = vadd.f32 %v4304_v14, %v1023_v21  ;;  %v1073_v38 = vadd.f32 %v1057_v23, %v1024_v51  ;;  %v1505_v22 = vrot.slane %v4288_v49, 1  ;;  %548 = vst.msk [vmem:[#allocation2 + $0x341] sm:$0xff] %vm506_vm2, %v396_v17  ;;  %547 = vst.msk [vmem:[#allocation2 + $0x331] sm:$0xff] %vm506_vm2, %v394_v11 }
  0xd5   :  { %v753_v45 = vrot.slane %v716_v30, 1  ;;  %v754_v34 = vrot.slane %v717_v10, 1  ;;  %v818_v35 = vrot.slane %v704_v25, 2  ;;  %v1540_v36 = vmul.f32 0.27406862, %v4257_v41 }
  0xd6   :  { %v819_v7 = vrot.slane %v785_v4, 2  ;;  %v1096_v16 = vmul.f32 0.45186275, %v1072_v3  ;;  %v1194_v37 = vrot.slane %v4285_v26, 2  ;;  %v4316_v49 = vmul.f32 0.27406862, %v1072_v3  ;;  %v400_v21 = vpop.permute.xlu1 %399  ;;  %v398_v51 = vpop.permute.xlu0 %397 }
  0xd7   :  { %v755_v47 = vsel %vm740_vm3, %v753_v45, %v754_v34  ;;  %v1097_v5 = vmul.f32 0.45186275, %v1073_v38  ;;  %v4318_v6 = vmul.f32 0.27406862, %v1073_v38  ;;  %v1506_v41 = vsel %vm740_vm3, %v1504_v32, %v1505_v22  ;;  %v1370_v10 = vld [vmem:[#allocation2 + $0x2b8] sm:$0x3] }
  0xd8   :  { %v777_v23 = vadd.f32 %v755_v47, %v704_v25  ;;  %v1568_v30 = vrot.slane %v4275_v2, 2  ;;  %v1428_v17 = vmul.f32 0.27406862, %v1412_v15  ;;  %550 = vst.msk [vmem:[#allocation2 + $0x361] sm:$0xff] %vm506_vm2, %v400_v21  ;;  %549 = vst.msk [vmem:[#allocation2 + $0x351] sm:$0xff] %vm506_vm2, %v398_v51  ;;  %v820_v26 = vsel %vm805_vm4, %v818_v35, %v819_v7  ;;  %v4333_v47 = vld [vmem:[#allocation2 + $0x2c0] sm:$0xff] }
  0xd9   :  { %v1132_v19 = vrot.slane %v1096_v16, 1  ;;  %v1133_v28 = vrot.slane %v1097_v5, 1  ;;  %v1569_v11 = vrot.slane %v1540_v36, 2  ;;  %v1155_v3 = vadd.f32 %v1131_v40, %v4279_v63  ;;  %v1419_v38 = vld [vmem:[#allocation2 + $0x2c8] sm:$0x3] }
  0xda   :  { %v4325_v4 = vadd.f32 %v820_v26, %v777_v23  ;;  %v4329_v25 = vmul.f32 0.27406862, %v4241_v27  ;;  %v1354_v32 = vmul.f32 0.27406862, %v1338_v43  ;;  %v1196_v22 = vrot.slane %v4316_v49, 2  ;;  %v404_v35 = vpop.permute.xlu1 %403  ;;  %v402_v7 = vpop.permute.xlu0 %401 }
  0xdb   :  { %v1197_v45 = vrot.slane %v4318_v6, 2  ;;  %v1385_v34 = vmul.f32 0.45186275, %v1040_v9  ;;  %v1386_v15 = vmul.f32 0.45186275, %v1370_v10  ;;  %v613_v16 = vld [vmem:[#allocation2 + $0x330] sm:$0xff]  ;;  %v1195_v27 = vsel %vm805_vm4, %v1193_v31, %v1194_v37 }
  0xdc   :  { %5670 = vst [vmem:[#allocation16_spill] sm:$0xff] %v4329_v25  ;;  %v858_v36 = vmul.f32 0.45186275, %v4325_v4  ;;  %v614_v5 = vld [vmem:[#allocation2 + $0x338] sm:$0x3]  ;;  %v662_v63 = vld [vmem:[#allocation2 + $0x340] sm:$0xff]  ;;  %v1532_v40 = vadd.f32 %v1506_v41, %v4275_v2  ;;  %v4338_v43 = vadd.f32 %v1428_v17, %v1395_v42  ;;  %v1134_v51 = vsel %vm740_vm3, %v1132_v19, %v1133_v28 }
  0xdd   :  { %552 = vst.msk [vmem:[#allocation2 + $0x381] sm:$0xff] %vm506_vm2, %v404_v35  ;;  %551 = vst.msk [vmem:[#allocation2 + $0x371] sm:$0xff] %vm506_vm2, %v402_v7  ;;  %v629_v9 = vmul.f32 0.45186275, %v613_v16  ;;  %v630_v6 = vmul.f32 0.45186275, %v614_v5  ;;  %v1570_v23 = vsel %vm805_vm4, %v1568_v30, %v1569_v11  ;;  %v1219_v31 = vadd.f32 %v1195_v27, %v1155_v3 }
  0xde   :  { %v663_v21 = vld [vmem:[#allocation2 + $0x348] sm:$0x3]  ;;  %878 = vrot.lane.b32.xlu0 %v858_v36, %s3674_s13  ;;  %v678_v10 = vmul.f32 0.27406862, %v662_v63  ;;  %v1434_v2 = vmul.f32 0.27406862, %v4333_v47  ;;  %v1401_v35 = vadd.f32 %v1385_v34, %v4294_v13  ;;  %v408_v5 = vpop.permute.xlu1 %407  ;;  %v406_v19 = vpop.permute.xlu0 %405  ;;  %v1156_v30 = vadd.f32 %v1134_v51, %v4316_v49 }
  0xdf   :  { %v679_v26 = vmul.f32 0.27406862, %v663_v21  ;;  %v645_v42 = vadd.f32 %v629_v9, %v4099_v33  ;;  %v646_v37 = vadd.f32 %v630_v6, %v4103_v50  ;;  %v962_v41 = vld [vmem:[#allocation2 + $0x338] sm:$0x3]  ;;  %v994_v17 = vld [vmem:[#allocation2 + $0x348] sm:$0x3]  ;;  %v4354_v6 = vadd.f32 %v1570_v23, %v1532_v40 }
  0xe0   :  { %v1435_v7 = vmul.f32 0.27406862, %v1419_v38  ;;  %v977_v28 = vmul.f32 0.27406862, %v613_v16  ;;  %v978_v11 = vmul.f32 0.27406862, %v962_v41  ;;  %v1198_v38 = vsel %vm805_vm4, %v1196_v22, %v1197_v45 }
  0xe1   :  { %v1009_v36 = vmul.f32 0.45186275, %v662_v63  ;;  %554 = vst.msk [vmem:[#allocation2 + $0x3a1] sm:$0xff] %vm506_vm2, %v408_v5  ;;  %553 = vst.msk [vmem:[#allocation2 + $0x391] sm:$0xff] %vm506_vm2, %v406_v19  ;;  %v694_v3 = vadd.f32 %v678_v10, %v645_v42  ;;  %v695_v33 = vadd.f32 %v679_v26, %v646_v37  ;;  %v1010_v27 = vmul.f32 0.45186275, %v994_v17 }
  0xe2   :  { %v4352_v50 = vld [vmem:[#allocation2 + $0x350] sm:$0xff]  ;;  %v1043_v9 = vld [vmem:[#allocation2 + $0x358] sm:$0x3]  ;;  %v1413_v13 = vld [vmem:[#allocation2 + $0xe8] sm:$0x3]  ;;  %v1402_v10 = vadd.f32 %v1386_v15, %v1354_v32  ;;  %v412_v26 = vpop.permute.xlu1 %411  ;;  %v410_v42 = vpop.permute.xlu0 %409  ;;  %v4363_v41 = vadd.f32 %v1198_v38, %v1156_v30  ;;  %v1450_v23 = vadd.f32 %v1434_v2, %v1401_v35 }
  0xe3   :  { %v4358_v49 = vmul.f32 0.27406862, %v4352_v50  ;;  %v1059_v34 = vmul.f32 0.27406862, %v1043_v9  ;;  %v4361_v16 = vmul.f32 0.27406862, %v4338_v43  ;;  %v1025_v40 = vadd.f32 %v1009_v36, %v977_v28 }
  0xe4   :  { %v705_v63 = vmul.f32 0.27406862, %v694_v3  ;;  %v718_v21 = vmul.f32 0.45186275, %v694_v3  ;;  %v719_v51 = vmul.f32 0.45186275, %v695_v33  ;;  %v1026_v5 = vadd.f32 %v1010_v27, %v978_v11 }
  0xe5   :  { %5671 = vst [vmem:[#allocation17_spill] sm:$0xff] %v4358_v49  ;;  %v786_v37 = vmul.f32 0.27406862, %v695_v33  ;;  %556 = vst.msk [vmem:[#allocation2 + $0x3e1] sm:$0xff] %vm506_vm2, %v412_v26  ;;  %v4368_v3 = vmul.f32 0.27406862, %v4277_v58  ;;  %v1074_v32 = vadd.f32 %v4358_v49, %v1025_v40  ;;  %v4376_v35 = vadd.f32 %v1435_v7, %v1402_v10 }
  0xe6   :  { %555 = vst.msk [vmem:[#allocation2 + $0x3d1] sm:$0xff] %vm506_vm2, %v410_v42  ;;  %v756_v22 = vrot.slane %v718_v21, 1  ;;  %v757_v45 = vrot.slane %v719_v51, 1  ;;  %v821_v17 = vrot.slane %v705_v63, 2  ;;  %v4371_v15 = vmul.f32 0.27406862, %v1413_v13  ;;  %v416_v36 = vpop.permute.xlu1 %415  ;;  %v414_v33 = vpop.permute.xlu0 %413 }
  0xe7   :  { %v822_v19 = vrot.slane %v786_v37, 2  ;;  %v4374_v28 = vmul.f32 0.45186275, %v1219_v31  ;;  %v1075_v2 = vadd.f32 %v1059_v34, %v1026_v5  ;;  %v4379_v11 = vmul.f32 0.27406862, %v4325_v4  ;;  %558 = vst.msk [vmem:[#allocation2 + $0x401] sm:$0xff] %vm506_vm2, %v416_v36 }
  0xe8   :  { %v758_v30 = vsel %vm740_vm3, %v756_v22, %v757_v45  ;;  %v4381_v27 = vmul.f32 0.27406862, %v1219_v31  ;;  %v4384_v58 = vmul.f32 0.45186275, %v4354_v6  ;;  %557 = vst.msk [vmem:[#allocation2 + $0x3f1] sm:$0xff] %vm506_vm2, %v414_v33 }
  0xe9   :  { %v778_v9 = vadd.f32 %v758_v30, %v705_v63  ;;  %5672 = vst [vmem:[#allocation18_spill] sm:$0xff] %v4379_v11  ;;  %v823_v13 = vsel %vm805_vm4, %v821_v17, %v822_v19  ;;  %v4390_v7 = vmul.f32 0.45186275, %v4363_v41  ;;  %v4392_v38 = vmul.f32 0.27406862, %v1450_v23 }
  0xea   :  { %5673 = vst [vmem:[#allocation19_spill] sm:$0xff] %v4381_v27  ;;  %5674 = vst [vmem:[#allocation20_spill] sm:$0xff] %v4384_v58  ;;  %v4397_v31 = vmul.f32 0.27406862, %v1074_v32  ;;  %v4399_v63 = vmul.f32 0.45186275, %v1074_v32  ;;  %v420_v42 = vpop.permute.xlu1 %419  ;;  %v418_v37 = vpop.permute.xlu0 %417 }
  0xeb   :  { %v4395_v4 = vadd.f32 %v823_v13, %v778_v9  ;;  %v4401_v21 = vmul.f32 0.45186275, %v1450_v23  ;;  %v4403_v51 = vmul.f32 0.45186275, %v1075_v2  ;;  %v4405_v10 = vmul.f32 0.27406862, %v1075_v2 }
  0xec   :  { %v4408_v26 = vmul.f32 0.45186275, %v4376_v35  ;;  %v664_v17 = vld [vmem:[#allocation2 + $0x3e0] sm:$0xff]  ;;  %560 = vst.msk [vmem:[#allocation2 + $0x421] sm:$0xff] %vm506_vm2, %v420_v42  ;;  %559 = vst.msk [vmem:[#allocation2 + $0x411] sm:$0xff] %vm506_vm2, %v418_v37  ;;  %v1135_v2 = vrot.slane %v4399_v63, 1 }
  0xed   :  { %v859_v40 = vmul.f32 0.45186275, %v4395_v4  ;;  %v615_v22 = vld [vmem:[#allocation2 + $0x3d0] sm:$0xff]  ;;  %v616_v45 = vld [vmem:[#allocation2 + $0x3d8] sm:$0x3]  ;;  %v1510_v36 = vrot.slane %v4401_v21, 1 }
  0xee   :  { %v631_v23 = vmul.f32 0.45186275, %v615_v22  ;;  %v632_v5 = vmul.f32 0.45186275, %v616_v45  ;;  %v665_v19 = vld [vmem:[#allocation2 + $0x3e8] sm:$0x3]  ;;  %v424_v37 = vpop.permute.xlu1 %423  ;;  %v422_v46 = vpop.permute.xlu0 %421 }
  0xef   :  { %880 = vrot.lane.b32.xlu1 %v859_v40, %s3674_s13  ;;  %v4414_v32 = vmul.f32 0.27406862, %v664_v17  ;;  %v681_v30 = vmul.f32 0.27406862, %v665_v19  ;;  %v964_v13 = vld [vmem:[#allocation2 + $0x3d8] sm:$0x3] }
  0xf0   :  { %v647_v33 = vadd.f32 %v631_v23, %v4105_v59  ;;  %v648_v9 = vadd.f32 %v632_v5, %v4107_v60  ;;  %v979_v42 = vmul.f32 0.27406862, %v615_v22  ;;  %v996_v34 = vld [vmem:[#allocation2 + $0x3e8] sm:$0x3]  ;;  %v980_v45 = vmul.f32 0.27406862, %v964_v13 }
  0xf1   :  { %v1011_v49 = vmul.f32 0.45186275, %v664_v17  ;;  %v1012_v8 = vmul.f32 0.45186275, %v996_v34  ;;  %562 = vst.msk [vmem:[#allocation2 + $0x441] sm:$0xff] %vm506_vm2, %v424_v37  ;;  %561 = vst.msk [vmem:[#allocation2 + $0x431] sm:$0xff] %vm506_vm2, %v422_v46  ;;  %v1396_v46 = vadd.f32 %v4264_v53, %v4206_v52 }
  0xf2   :  { %v696_v63 = vadd.f32 %v4414_v32, %v647_v33  ;;  %v697_v40 = vadd.f32 %v681_v30, %v648_v9  ;;  %v1044_v21 = vld [vmem:[#allocation2 + $0x3f0] sm:$0xff]  ;;  %v1045_v19 = vld [vmem:[#allocation2 + $0x3f8] sm:$0x3]  ;;  %v1136_v59 = vrot.slane %v4403_v51, 1  ;;  %v1511_v60 = vrot.slane %v4408_v26, 1  ;;  %v428_v37 = vpop.permute.xlu1 %427  ;;  %v426_v33 = vpop.permute.xlu0 %425 }
  0xf3   :  { %v1027_v22 = vadd.f32 %v1011_v49, %v979_v42  ;;  %v1028_v23 = vadd.f32 %v1012_v8, %v980_v45  ;;  %v4425_v5 = vmul.f32 0.27406862, %v1044_v21  ;;  %v1061_v13 = vmul.f32 0.27406862, %v1045_v19  ;;  %564 = vst.msk [vmem:[#allocation2 + $0x481] sm:$0xff] %vm506_vm2, %v428_v37  ;;  %563 = vst.msk [vmem:[#allocation2 + $0x471] sm:$0xff] %vm506_vm2, %v426_v33 }
  0xf4   :  { %v706_v17 = vmul.f32 0.27406862, %v696_v63  ;;  %v720_v34 = vmul.f32 0.45186275, %v696_v63  ;;  %v721_v12 = vmul.f32 0.45186275, %v697_v40  ;;  %v1512_v37 = vsel %vm740_vm3, %v1510_v36, %v1511_v60 }
  0xf5   :  { %5675 = vst [vmem:[#allocation21_spill] sm:$0xff] %v4425_v5  ;;  %v787_v30 = vmul.f32 0.27406862, %v697_v40  ;;  %v1076_v9 = vadd.f32 %v4425_v5, %v1027_v22  ;;  %v1077_v58 = vadd.f32 %v1061_v13, %v1028_v23  ;;  %v1542_v51 = vmul.f32 0.27406862, %v4376_v35 }
  0xf6   :  { %v759_v8 = vrot.slane %v720_v34, 1  ;;  %v760_v49 = vrot.slane %v721_v12, 1  ;;  %v824_v26 = vrot.slane %v706_v17, 2  ;;  %v1199_v42 = vrot.slane %v4397_v31, 2  ;;  %v1342_v45 = vld [vmem:[#allocation2 + $0x3e8] sm:$0x3]  ;;  %v430_v13 = vpop.permute.xlu0 %429  ;;  %v432_v34 = vpop.permute.xlu1 %431 }
  0xf7   :  { %v825_v63 = vrot.slane %v787_v30, 2  ;;  %v4434_v52 = vmul.f32 0.27406862, %v1076_v9  ;;  %v1100_v53 = vmul.f32 0.45186275, %v1076_v9  ;;  %v1137_v40 = vsel %vm740_vm3, %v1135_v2, %v1136_v59  ;;  %565 = vst.msk [vmem:[#allocation2 + $0x491] sm:$0xff] %vm506_vm2, %v430_v13 }
  0xf8   :  { %v761_v19 = vsel %vm740_vm3, %v759_v8, %v760_v49  ;;  %v1101_v22 = vmul.f32 0.45186275, %v1077_v58  ;;  %v1200_v35 = vrot.slane %v4405_v10, 2  ;;  %v1574_v23 = vrot.slane %v4392_v38, 2  ;;  %v1374_v27 = vld [vmem:[#allocation2 + $0x3f8] sm:$0x3] }
  0xf9   :  { %v779_v12 = vadd.f32 %v761_v19, %v706_v17  ;;  %v1575_v33 = vrot.slane %v1542_v51, 2  ;;  %v4442_v30 = vmul.f32 0.45186275, %v4338_v43  ;;  %566 = vst.msk [vmem:[#allocation2 + $0x4a1] sm:$0xff] %vm506_vm2, %v432_v34  ;;  %v826_v2 = vsel %vm805_vm4, %v824_v26, %v825_v63  ;;  %v4453_v51 = vld [vmem:[#allocation2 + $0x400] sm:$0xff] }
  0xfa   :  { %v4447_v59 = vmul.f32 0.27406862, %v1077_v58  ;;  %v1157_v10 = vadd.f32 %v1137_v40, %v4397_v31  ;;  %v1358_v9 = vmul.f32 0.27406862, %v1342_v45  ;;  %v1138_v17 = vrot.slane %v1100_v53, 1  ;;  %5676 = vst [vmem:[#allocation22_spill] sm:$0xff] %v4453_v51  ;;  %v434_v58 = vpop.permute.xlu0 %433  ;;  %v436_v45 = vpop.permute.xlu1 %435 }
  0xfb   :  { %v4450_v8 = vadd.f32 %v826_v2, %v779_v12  ;;  %v1139_v36 = vrot.slane %v1101_v22, 1  ;;  %v1423_v43 = vld [vmem:[#allocation2 + $0x408] sm:$0x3]  ;;  %v1389_v49 = vmul.f32 0.45186275, %v1044_v21  ;;  %v617_v63 = vld [vmem:[#allocation2 + $0x470] sm:$0xff]  ;;  %v1201_v40 = vsel %vm805_vm4, %v1199_v42, %v1200_v35 }
  0xfc   :  { %v1390_v19 = vmul.f32 0.45186275, %v1374_v27  ;;  %v1438_v13 = vmul.f32 0.27406862, %v4453_v51  ;;  %v618_v34 = vld [vmem:[#allocation2 + $0x478] sm:$0x3]  ;;  %v4459_v53 = vadd.f32 %v4371_v15, %v1396_v46  ;;  %v1534_v27 = vadd.f32 %v1512_v37, %v4392_v38 }
  0xfd   :  { %v860_v26 = vmul.f32 0.45186275, %v4450_v8  ;;  %v666_v31 = vld [vmem:[#allocation2 + $0x480] sm:$0xff]  ;;  %567 = vst.msk [vmem:[#allocation2 + $0x4b1] sm:$0xff] %vm506_vm2, %v434_v58  ;;  %v633_v22 = vmul.f32 0.45186275, %v617_v63  ;;  %v1576_v2 = vsel %vm805_vm4, %v1574_v23, %v1575_v33  ;;  %v1221_v51 = vadd.f32 %v1201_v40, %v1157_v10 }
  0xfe   :  { %v634_v12 = vmul.f32 0.45186275, %v618_v34  ;;  %v667_v21 = vld [vmem:[#allocation2 + $0x488] sm:$0x3]  ;;  %568 = vst.msk [vmem:[#allocation2 + $0x4c1] sm:$0xff] %vm506_vm2, %v436_v45  ;;  %v1140_v35 = vsel %vm740_vm3, %v1138_v17, %v1139_v36  ;;  %v438_v45 = vpop.permute.xlu0 %437  ;;  %v440_v48 = vpop.permute.xlu1 %439  ;;  %v1405_v23 = vadd.f32 %v1389_v49, %v4414_v32  ;;  %v1406_v33 = vadd.f32 %v1390_v19, %v1358_v9  ;;  %v4473_v17 = vld [vmem:[#allocation2 + $0x490] sm:$0xff] }
  0xff   :  { %882 = vrot.lane.b32.xlu0 %v860_v26, %s3674_s13  ;;  %v682_v60 = vmul.f32 0.27406862, %v666_v31  ;;  %v683_v5 = vmul.f32 0.27406862, %v667_v21  ;;  %v1439_v42 = vmul.f32 0.27406862, %v1423_v43  ;;  %v649_v15 = vadd.f32 %v633_v22, %v4114_v24 }
 0x100   :  { %v650_v46 = vadd.f32 %v634_v12, %v4140_v44  ;;  %v966_v58 = vld [vmem:[#allocation2 + $0x478] sm:$0x3]  ;;  %v981_v34 = vmul.f32 0.27406862, %v617_v63  ;;  %v998_v0 = vld [vmem:[#allocation2 + $0x488] sm:$0x3]  ;;  %v1158_v26 = vadd.f32 %v1140_v35, %v4434_v52  ;;  %v1454_v63 = vadd.f32 %v1438_v13, %v1405_v23 }
 0x101   :  { %v982_v38 = vmul.f32 0.27406862, %v966_v58  ;;  %v1013_v37 = vmul.f32 0.45186275, %v666_v31  ;;  %569 = vst.msk [vmem:[#allocation2 + $0x4d1] sm:$0xff] %vm506_vm2, %v438_v45  ;;  %v698_v10 = vadd.f32 %v682_v60, %v649_v15  ;;  %570 = vst.msk [vmem:[#allocation2 + $0x4e1] sm:$0xff] %vm506_vm2, %v440_v48  ;;  %v1455_v31 = vadd.f32 %v1439_v42, %v1406_v33 }
 0x102   :  { %v699_v43 = vadd.f32 %v683_v5, %v650_v46  ;;  %v1203_v24 = vrot.slane %v4447_v59, 2  ;;  %v1014_v44 = vmul.f32 0.45186275, %v998_v0  ;;  %v1047_v36 = vld [vmem:[#allocation2 + $0x498] sm:$0x3]  ;;  %v5677_v46 = vrot.slane %v4434_v52, 2 }
 0x103   :  { %910 = vrot.lane.b32.xlu0 %v4150_v55, %s3675_s14  ;;  %v1029_v32 = vadd.f32 %v1013_v37, %v981_v34  ;;  %v4479_v9 = vmul.f32 0.27406862, %v4473_v17  ;;  %v1063_v60 = vmul.f32 0.27406862, %v1047_v36  ;;  %v707_v5 = vmul.f32 0.27406862, %v698_v10 }
 0x104   :  { %v722_v49 = vmul.f32 0.45186275, %v698_v10  ;;  %v723_v48 = vmul.f32 0.45186275, %v699_v43  ;;  %v1030_v19 = vadd.f32 %v1014_v44, %v982_v38  ;;  %v788_v59 = vmul.f32 0.27406862, %v699_v43 }
 0x105   :  { %v1078_v0 = vadd.f32 %v4479_v9, %v1029_v32  ;;  %v827_v12 = vrot.slane %v707_v5, 2  ;;  %v1204_v35 = vsel %vm805_vm4, %v5677_v46, %v1203_v24  ;;  %v4487_v58 = vadd.f32 %v1576_v2, %v1534_v27  ;;  %v1335_v24 = vld [vmem:[#allocation2 + $0x200] sm:$0xff]  ;;  %v1368_v44 = vld [vmem:[#allocation2 + $0x218] sm:$0x3]  ;;  %v1336_v32 = vld [vmem:[#allocation2 + $0x208] sm:$0x3] }
 0x106   :  { %v762_v40 = vrot.slane %v722_v49, 1  ;;  %v763_v22 = vrot.slane %v723_v48, 1  ;;  %v1079_v21 = vadd.f32 %v1063_v60, %v1030_v19  ;;  %v828_v15 = vrot.slane %v788_v59, 2  ;;  %v1417_v60 = vld [vmem:[#allocation2 + $0x228] sm:$0x3] }
 0x107   :  { %914 = vrot.lane.b32.xlu0 %v4270_v54, %s3675_s14  ;;  %v1469_v34 = vmul.f32 0.45186275, %v4459_v53  ;;  %v1222_v13 = vadd.f32 %v1204_v35, %v1158_v26  ;;  %v1102_v42 = vmul.f32 0.45186275, %v1078_v0  ;;  %v4492_v23 = vmul.f32 0.27406862, %v4395_v4 }
 0x108   :  { %v764_v45 = vsel %vm740_vm3, %v762_v40, %v763_v22  ;;  %v1103_v38 = vmul.f32 0.45186275, %v1079_v21  ;;  %v4494_v33 = vmul.f32 0.45186275, %v1221_v51  ;;  %v4497_v10 = vmul.f32 0.27406862, %v4363_v41 }
 0x109   :  { %v780_v37 = vadd.f32 %v764_v45, %v707_v5  ;;  %v829_v52 = vsel %vm805_vm4, %v827_v12, %v828_v15  ;;  %v4500_v27 = vmul.f32 0.27406862, %v1221_v51  ;;  %v1478_v2 = vmul.f32 0.45186275, %v1454_v63  ;;  %v4516_v22 = vld [vmem:[#allocation2 + $0x220] sm:$0xff] }
 0x10a   :  { %5678 = vst [vmem:[#allocation23_spill] sm:$0xff] %v4497_v10  ;;  %v1479_v43 = vmul.f32 0.45186275, %v1455_v31  ;;  %v4507_v4 = vmul.f32 0.45186275, %v4487_v58  ;;  %v1501_v26 = vrot.slane %v4442_v30, 1 }
 0x10b   :  { %918 = vrot.lane.b32.xlu0 %v4379_v11, %s3675_s14  ;;  %v4504_v36 = vadd.f32 %v829_v52, %v780_v37  ;;  %v1502_v41 = vrot.slane %v1469_v34, 1  ;;  %v4511_v51 = vmul.f32 0.27406862, %v4450_v8  ;;  %v4513_v5 = vmul.f32 0.45186275, %v1222_v13  ;;  %v1339_v12 = vld [vmem:[#allocation2 + $0x340] sm:$0xff] }
 0x10c   :  { %v1141_v49 = vrot.slane %v1102_v42, 1  ;;  %v1142_v48 = vrot.slane %v1103_v38, 1  ;;  %v1087_v59 = vmul.f32 0.27406862, %v1078_v0  ;;  %v1167_v40 = vmul.f32 0.27406862, %v1079_v21 }
 0x10d   :  { %5679 = vst [vmem:[#allocation24_spill] sm:$0xff] %v4511_v51  ;;  %v861_v19 = vmul.f32 0.45186275, %v4504_v36  ;;  %v4518_v15 = vmul.f32 0.27406862, %v1222_v13  ;;  %v1516_v46 = vrot.slane %v1478_v2, 1  ;;  %v1503_v8 = vsel %vm740_vm3, %v1501_v26, %v1502_v41 }
 0x10e   :  { %v1464_v30 = vmul.f32 0.27406862, %v1454_v63  ;;  %v1517_v35 = vrot.slane %v1479_v43, 1  ;;  %v1340_v34 = vld [vmem:[#allocation2 + $0x348] sm:$0x3]  ;;  %v1143_v38 = vsel %vm740_vm3, %v1141_v49, %v1142_v48  ;;  %v1205_v52 = vrot.slane %v1087_v59, 2 }
 0x10f   :  { %5680 = vst [vmem:[#allocation25_spill] sm:$0xff] %v4518_v15  ;;  %v1372_v45 = vld [vmem:[#allocation2 + $0x358] sm:$0x3]  ;;  %884 = vrot.lane.b32.xlu1 %v861_v19, %s3674_s13  ;;  %922 = vrot.lane.b32.xlu0 %v4511_v51, %s3675_s14  ;;  %v1351_v42 = vmul.f32 0.27406862, %v1335_v24  ;;  %v1206_v2 = vrot.slane %v1167_v40, 2 }
 0x110   :  { %v1383_v0 = vmul.f32 0.45186275, %v4235_v18  ;;  %v1384_v21 = vmul.f32 0.45186275, %v1368_v44  ;;  %v1352_v13 = vmul.f32 0.27406862, %v1336_v32  ;;  %v1518_v11 = vsel %vm740_vm3, %v1516_v46, %v1517_v35 }
 0x111   :  { %v1432_v63 = vmul.f32 0.27406862, %v4516_v22  ;;  %v1433_v37 = vmul.f32 0.27406862, %v1417_v60  ;;  %v1544_v43 = vmul.f32 0.27406862, %v1455_v31  ;;  %v1159_v44 = vadd.f32 %v1143_v38, %v1087_v59 }
 0x112   :  { %v1539_v19 = vmul.f32 0.27406862, %v4459_v53  ;;  %v1399_v51 = vadd.f32 %v1383_v0, %v1351_v42  ;;  %v1400_v54 = vadd.f32 %v1384_v21, %v1352_v13  ;;  %v1355_v26 = vmul.f32 0.27406862, %v1339_v12  ;;  %v4529_v24 = vld [vmem:[#allocation2 + $0x360] sm:$0xff] }
 0x113   :  { %v1421_v18 = vld [vmem:[#allocation2 + $0x368] sm:$0x3]  ;;  %912 = vrot.lane.b32.xlu1 %v4248_v1, %s3675_s14  ;;  %1248 = vrot.lane.b32.xlu0 %v4159_v61, %s3674_s13  ;;  %v1356_v41 = vmul.f32 0.27406862, %v1340_v34  ;;  %v1387_v31 = vmul.f32 0.45186275, %v4352_v50  ;;  %v1207_v42 = vsel %vm805_vm4, %v1205_v52, %v1206_v2  ;;  %v1536_v0 = vadd.f32 %v1518_v11, %v1464_v30 }
 0x114   :  { %v1388_v32 = vmul.f32 0.45186275, %v1372_v45  ;;  %v1580_v53 = vrot.slane %v1464_v30, 2  ;;  %v1448_v60 = vadd.f32 %v1432_v63, %v1399_v51  ;;  %v1449_v49 = vadd.f32 %v1433_v37, %v1400_v54  ;;  %v1343_v59 = vld [vmem:[#allocation2 + $0x480] sm:$0xff]  ;;  %v1344_v34 = vld [vmem:[#allocation2 + $0x488] sm:$0x3] }
 0x115   :  { %v1436_v48 = vmul.f32 0.27406862, %v4529_v24  ;;  %v1581_v40 = vrot.slane %v1544_v43, 2  ;;  %v1403_v12 = vadd.f32 %v1387_v31, %v1355_v26  ;;  %v1437_v35 = vmul.f32 0.27406862, %v1421_v18  ;;  %v4549_v37 = vld [vmem:[#allocation2 + $0x4a0] sm:$0xff] }
 0x116   :  { %v1404_v46 = vadd.f32 %v1388_v32, %v1356_v41  ;;  %v1472_v21 = vmul.f32 0.45186275, %v1448_v60  ;;  %v1473_v13 = vmul.f32 0.45186275, %v1449_v49  ;;  %v1223_v61 = vadd.f32 %v1207_v42, %v1159_v44  ;;  %v1376_v63 = vld [vmem:[#allocation2 + $0x498] sm:$0x3] }
 0x117   :  { %916 = vrot.lane.b32.xlu1 %v4368_v3, %s3675_s14  ;;  %1252 = vrot.lane.b32.xlu0 %v4273_v39, %s3674_s13  ;;  %v1531_v54 = vadd.f32 %v1503_v8, %v4361_v16  ;;  %v1566_v50 = vrot.slane %v1539_v19, 2  ;;  %v4544_v51 = vmul.f32 0.27406862, %v4243_v29  ;;  %v4547_v45 = vmul.f32 0.27406862, %v4504_v36 }
 0x118   :  { %v1507_v11 = vrot.slane %v1472_v21, 1  ;;  %v1508_v30 = vrot.slane %v1473_v13, 1  ;;  %v1452_v38 = vadd.f32 %v1436_v48, %v1403_v12  ;;  %v1582_v39 = vsel %vm805_vm4, %v1580_v53, %v1581_v40  ;;  %v1425_v29 = vld [vmem:[#allocation2 + $0x4a8] sm:$0x3]  ;;  %v4569_v53 = vld [vmem:[#allocation2 + $0x50] sm:$0xff] }
 0x119   :  { %5681 = vst [vmem:[#allocation26_spill] sm:$0xff] %v4547_v45  ;;  %v1461_v52 = vmul.f32 0.27406862, %v1448_v60  ;;  %v4553_v8 = vmul.f32 0.27406862, %v4354_v6  ;;  %v1453_v2 = vadd.f32 %v1437_v35, %v1404_v46  ;;  %v4555_v43 = vadd.f32 %v1582_v39, %v1536_v0 }
 0x11a   :  { %v1541_v19 = vmul.f32 0.27406862, %v1449_v49  ;;  %v1359_v26 = vmul.f32 0.27406862, %v1343_v59  ;;  %v1391_v36 = vmul.f32 0.45186275, %v4473_v17  ;;  %v1509_v17 = vsel %vm740_vm3, %v1507_v11, %v1508_v30 }
 0x11b   :  { %920 = vrot.lane.b32.xlu1 %v4492_v23, %s3675_s14  ;;  %1256 = vrot.lane.b32.xlu0 %v4390_v7, %s3674_s13  ;;  %v4562_v18 = vmul.f32 0.45186275, %v1223_v61  ;;  %v4564_v44 = vmul.f32 0.27406862, %v1223_v61  ;;  %v5682_v6 = vrot.slane %v4361_v16, 2  ;;  %v1571_v42 = vrot.slane %v1461_v52, 2 }
 0x11c   :  { %v1360_v31 = vmul.f32 0.27406862, %v1344_v34  ;;  %v1740_v32 = vld [vmem:[#allocation2 + $0x48] sm:$0x3]  ;;  %v1476_v60 = vmul.f32 0.45186275, %v1452_v38  ;;  %v1407_v48 = vadd.f32 %v1391_v36, %v1359_v26  ;;  %v1533_v13 = vadd.f32 %v1509_v17, %v1461_v52 }
 0x11d   :  { %v1567_v41 = vsel %vm805_vm4, %v5682_v6, %v1566_v50  ;;  %v1392_v49 = vmul.f32 0.45186275, %v1376_v63  ;;  %v1789_v40 = vld [vmem:[#allocation2 + $0x58] sm:$0x3]  ;;  %v1477_v7 = vmul.f32 0.45186275, %v1453_v2 }
 0x11e   :  { %v4572_v12 = vadd.f32 %v1567_v41, %v1531_v54  ;;  %v1440_v46 = vmul.f32 0.27406862, %v4549_v37  ;;  %v1441_v35 = vmul.f32 0.27406862, %v1425_v29  ;;  %v1572_v16 = vrot.slane %v1541_v19, 2  ;;  %v3622_v59 = vld [vmem:[#allocation2 + $0x40] sm:$0xff] }
 0x11f   :  { %v1463_v0 = vmul.f32 0.27406862, %v1452_v38  ;;  %v1408_v21 = vadd.f32 %v1392_v49, %v1360_v31  ;;  %924 = vrot.lane.b32.xlu1 %v4547_v45, %s3675_s14  ;;  %1260 = vrot.lane.b32.xlu0 %v4513_v5, %s3674_s13  ;;  %v1543_v61 = vmul.f32 0.27406862, %v1453_v2  ;;  %v1755_v54 = vmul.f32 0.45186275, %v3622_v59 }
 0x120   :  { %v1456_v50 = vadd.f32 %v1440_v46, %v1407_v48  ;;  %v1756_v11 = vmul.f32 0.45186275, %v1740_v32  ;;  %v1804_v30 = vmul.f32 0.27406862, %v4569_v53  ;;  %v1805_v63 = vmul.f32 0.27406862, %v1789_v40 }
 0x121   :  { %v1457_v34 = vadd.f32 %v1441_v35, %v1408_v21  ;;  %v1513_v39 = vrot.slane %v1476_v60, 1  ;;  %v1514_v29 = vrot.slane %v1477_v7, 1  ;;  %v1771_v19 = vadd.f32 %v1755_v54, %v4152_v56  ;;  %v1712_v36 = vld [vmem:[#allocation2 + $0x178] sm:$0x3]  ;;  %v1711_v56 = vld [vmem:[#allocation2 + $0x170] sm:$0xff] }
 0x122   :  { %v1480_v38 = vmul.f32 0.45186275, %v1456_v50  ;;  %v4582_v26 = vmul.f32 0.45186275, %v4555_v43  ;;  %v1573_v5 = vsel %vm805_vm4, %v1571_v42, %v1572_v16  ;;  %v1772_v2 = vadd.f32 %v1756_v11, %v4154_v57  ;;  %v1744_v40 = vld [vmem:[#allocation2 + $0x188] sm:$0x3] }
 0x123   :  { %v1481_v52 = vmul.f32 0.45186275, %v1457_v34  ;;  %1250 = vrot.lane.b32.xlu1 %v4255_v20, %s3674_s13  ;;  %1288 = vrot.lane.b32.xlu0 %v4161_v62, %s3675_s14  ;;  %v1465_v6 = vmul.f32 0.27406862, %v1456_v50  ;;  %v1545_v31 = vmul.f32 0.27406862, %v1457_v34  ;;  %v1820_v32 = vadd.f32 %v1804_v30, %v1771_v19 }
 0x124   :  { %v1519_v41 = vrot.slane %v1480_v38, 1  ;;  %v1577_v17 = vrot.slane %v1463_v0, 2  ;;  %v1578_v60 = vrot.slane %v1543_v61, 2  ;;  %v1821_v48 = vadd.f32 %v1805_v63, %v1772_v2  ;;  %v4590_v7 = vld [vmem:[#allocation2 + $0x190] sm:$0xff]  ;;  %v1793_v42 = vld [vmem:[#allocation2 + $0x198] sm:$0x3] }
 0x125   :  { %v1520_v49 = vrot.slane %v1481_v52, 1  ;;  %v4593_v57 = vmul.f32 0.45186275, %v4572_v12  ;;  %v4595_v46 = vadd.f32 %v1573_v5, %v1533_v13  ;;  %v1515_v20 = vsel %vm740_vm3, %v1513_v39, %v1514_v29  ;;  %v1716_v59 = vld [vmem:[#allocation2 + $0x2b8] sm:$0x3]  ;;  %v3623_v39 = vld [vmem:[#allocation2 + $0x180] sm:$0xff] }
 0x126   :  { %v4599_v35 = vmul.f32 0.27406862, %v4487_v58  ;;  %v1844_v21 = vmul.f32 0.45186275, %v1820_v32  ;;  %v1845_v61 = vmul.f32 0.45186275, %v1821_v48  ;;  %v1535_v30 = vadd.f32 %v1515_v20, %v1463_v0 }
 0x127   :  { %v1521_v16 = vsel %vm740_vm3, %v1519_v41, %v1520_v49  ;;  %v1727_v50 = vmul.f32 0.27406862, %v1711_v56  ;;  %1254 = vrot.lane.b32.xlu1 %v4374_v28, %s3674_s13  ;;  %1292 = vrot.lane.b32.xlu0 %v4329_v25, %s3675_s14  ;;  %v1583_v13 = vrot.slane %v1465_v6, 2  ;;  %v1584_v54 = vrot.slane %v1545_v31, 2  ;;  %v1748_v11 = vld [vmem:[#allocation2 + $0x2c8] sm:$0x3] }
 0x128   :  { %v4607_v34 = vmul.f32 0.27406862, %v4555_v43  ;;  %v1728_v58 = vmul.f32 0.27406862, %v1712_v36  ;;  %v1579_v63 = vsel %vm805_vm4, %v1577_v17, %v1578_v60  ;;  %v1759_v29 = vmul.f32 0.45186275, %v3623_v39 }
 0x129   :  { %v1760_v38 = vmul.f32 0.45186275, %v1744_v40  ;;  %v4610_v19 = vld [vmem:[#allocation2 + $0x2d0] sm:$0xff]  ;;  %v1537_v5 = vadd.f32 %v1521_v16, %v1465_v6  ;;  %v1836_v28 = vmul.f32 0.27406862, %v1820_v32  ;;  %v1876_v41 = vrot.slane %v1844_v21, 1 }
 0x12a   :  { %v1808_v52 = vmul.f32 0.27406862, %v4590_v7  ;;  %v1809_v2 = vmul.f32 0.27406862, %v1793_v42  ;;  %v1877_v31 = vrot.slane %v1845_v61, 1  ;;  %v1775_v56 = vadd.f32 %v1759_v29, %v1727_v50 }
 0x12b   :  { %v1776_v43 = vadd.f32 %v1760_v38, %v1728_v58  ;;  %v1797_v49 = vld [vmem:[#allocation2 + $0x2d8] sm:$0x3]  ;;  %1258 = vrot.lane.b32.xlu1 %v4494_v33, %s3674_s13  ;;  %1296 = vrot.lane.b32.xlu0 %v4497_v10, %s3675_s14  ;;  %v1585_v0 = vsel %vm805_vm4, %v1583_v13, %v1584_v54  ;;  %v1916_v36 = vmul.f32 0.27406862, %v1821_v48  ;;  %v1732_v17 = vmul.f32 0.27406862, %v1716_v59 }
 0x12c   :  { %v1763_v6 = vmul.f32 0.45186275, %v4333_v47  ;;  %v1824_v32 = vadd.f32 %v1808_v52, %v1775_v56  ;;  %v1764_v40 = vmul.f32 0.45186275, %v1748_v11  ;;  %v1812_v20 = vmul.f32 0.27406862, %v4610_v19 }
 0x12d   :  { %v1825_v60 = vadd.f32 %v1809_v2, %v1776_v43  ;;  %v1599_v42 = vadd.f32 %v1579_v63, %v1535_v30  ;;  %v4620_v16 = vadd.f32 %v1585_v0, %v1537_v5  ;;  %v1813_v33 = vmul.f32 0.27406862, %v1797_v49  ;;  %v1720_v48 = vld [vmem:[#allocation2 + $0x3f8] sm:$0x3]  ;;  %v1752_v30 = vld [vmem:[#allocation2 + $0x408] sm:$0x3] }
 0x12e   :  { %v1779_v21 = vadd.f32 %v1763_v6, %v4304_v14  ;;  %v1878_v61 = vsel %vm740_vm3, %v1876_v41, %v1877_v31  ;;  %v1848_v50 = vmul.f32 0.45186275, %v1824_v32  ;;  %v1780_v13 = vadd.f32 %v1764_v40, %v1732_v17  ;;  %v4631_v38 = vld [vmem:[#allocation2 + $0x410] sm:$0xff]  ;;  %v1801_v5 = vld [vmem:[#allocation2 + $0x418] sm:$0x3]  ;;  %v5683_v0 = vld [vmem:[#allocation13_spill] sm:$0xff] }
 0x12f   :  { %v1849_v58 = vmul.f32 0.45186275, %v1825_v60  ;;  %1262 = vrot.lane.b32.xlu1 %v4562_v18, %s3674_s13  ;;  %1300 = vrot.lane.b32.xlu0 %v4518_v15, %s3675_s14  ;;  %v1940_v47 = vrot.slane %v1836_v28, 2  ;;  %v1941_v59 = vrot.slane %v1916_v36, 2  ;;  %v1838_v54 = vmul.f32 0.27406862, %v1824_v32 }
 0x130   :  { %v1828_v11 = vadd.f32 %v1812_v20, %v1779_v21  ;;  %v4629_v14 = vmul.f32 0.27406862, %v4572_v12  ;;  %v1882_v63 = vrot.slane %v1848_v50, 1  ;;  %v1829_v29 = vadd.f32 %v1813_v33, %v1780_v13  ;;  %v1710_v52 = vld [vmem:[#allocation2 + $0xd8] sm:$0x3]  ;;  %v5684_v36 = vld [vmem:[#allocation14_spill] sm:$0xff] }
 0x131   :  { %v1883_v39 = vrot.slane %v1849_v58, 1  ;;  %v4634_v18 = vmul.f32 0.45186275, %v4595_v46  ;;  %v4636_v2 = vmul.f32 0.45186275, %v1599_v42  ;;  %v1908_v41 = vadd.f32 %v1878_v61, %v1836_v28  ;;  %v5685_v21 = vld [vmem:[#allocation22_spill] sm:$0xff] }
 0x132   :  { %v4639_v31 = vmul.f32 0.27406862, %v4595_v46  ;;  %v4642_v56 = vmul.f32 0.45186275, %v4620_v16  ;;  %v4644_v12 = vmul.f32 0.27406862, %v1599_v42  ;;  %v1942_v17 = vsel %vm805_vm4, %v1940_v47, %v1941_v59 }
 0x133   :  { %v1736_v43 = vmul.f32 0.27406862, %v1720_v48  ;;  %v1742_v49 = vld [vmem:[#allocation2 + $0xe8] sm:$0x3]  ;;  %1290 = vrot.lane.b32.xlu1 %v5683_v0, %s3675_s14  ;;  %1626 = vrot.lane.b32.xlu0 %v5684_v36, %s3674_s13  ;;  %v1918_v6 = vmul.f32 0.27406862, %v1825_v60  ;;  %v1884_v20 = vsel %vm740_vm3, %v1882_v63, %v1883_v39  ;;  %v4655_v50 = vadd.f32 %v1942_v17, %v1908_v41 }
 0x134   :  { %v1946_v28 = vrot.slane %v1838_v54, 2  ;;  %v1852_v32 = vmul.f32 0.45186275, %v1828_v11  ;;  %v4651_v46 = vld [vmem:[#allocation2 + $0xf0] sm:$0xff]  ;;  %v1791_v40 = vld [vmem:[#allocation2 + $0xf8] sm:$0x3]  ;;  %v1910_v39 = vadd.f32 %v1884_v20, %v1838_v54 }
 0x135   :  { %v1853_v42 = vmul.f32 0.45186275, %v1829_v29  ;;  %v1767_v33 = vmul.f32 0.45186275, %v5685_v21  ;;  %v1768_v61 = vmul.f32 0.45186275, %v1752_v30 }
 0x136   :  { %v1816_v58 = vmul.f32 0.27406862, %v4631_v38  ;;  %v1817_v13 = vmul.f32 0.27406862, %v1801_v5  ;;  %v1726_v48 = vmul.f32 0.27406862, %v1710_v52 }
 0x137   :  { %v1840_v36 = vmul.f32 0.27406862, %v1828_v11  ;;  %v1920_v47 = vmul.f32 0.27406862, %v1829_v29  ;;  %v5686_v60 = vld [vmem:[#allocation21_spill] sm:$0xff]  ;;  %v1784_v0 = vadd.f32 %v1768_v61, %v1736_v43  ;;  %v5687_v15 = vld [vmem:[#allocation19_spill] sm:$0xff] }
 0x138   :  { %v1783_v59 = vadd.f32 %v1767_v33, %v5686_v60  ;;  %1294 = vrot.lane.b32.xlu1 %v5687_v15, %s3675_s14  ;;  %v5688_v63 = vld [vmem:[#allocation20_spill] sm:$0xff]  ;;  %v1947_v21 = vrot.slane %v1918_v6, 2  ;;  %v3624_v30 = vld [vmem:[#allocation2 + $0xe0] sm:$0xff]  ;;  %v1758_v17 = vmul.f32 0.45186275, %v1742_v49  ;;  %v1888_v29 = vrot.slane %v1852_v32, 1 }
 0x139   :  { %1630 = vrot.lane.b32.xlu0 %v5688_v63, %s3674_s13  ;;  %v1757_v41 = vmul.f32 0.45186275, %v3624_v30  ;;  %v1833_v25 = vadd.f32 %v1817_v13, %v1784_v0  ;;  %v1806_v5 = vmul.f32 0.27406862, %v4651_v46  ;;  %v1807_v11 = vmul.f32 0.27406862, %v1791_v40 }
 0x13a   :  { %v1832_v10 = vadd.f32 %v1816_v58, %v1783_v59  ;;  %v1889_v52 = vrot.slane %v1853_v42, 1  ;;  %v5689_v33 = vld [vmem:[#allocation10_spill] sm:$0xff]  ;;  %v1774_v61 = vadd.f32 %v1758_v17, %v1726_v48  ;;  %v1952_v60 = vrot.slane %v1840_v36, 2  ;;  %v1714_v32 = vld [vmem:[#allocation2 + $0x218] sm:$0x3]  ;;  %v4678_v48 = vld [vmem:[#allocation2 + $0x230] sm:$0xff] }
 0x13b   :  { %v1773_v43 = vadd.f32 %v1757_v41, %v5689_v33  ;;  %v1953_v15 = vrot.slane %v1920_v47, 2  ;;  %v1857_v45 = vmul.f32 0.45186275, %v1833_v25  ;;  %v1948_v54 = vsel %vm805_vm4, %v1946_v28, %v1947_v21  ;;  %v1746_v40 = vld [vmem:[#allocation2 + $0x228] sm:$0x3] }
 0x13c   :  { %v1856_v62 = vmul.f32 0.45186275, %v1832_v10  ;;  %1298 = vrot.lane.b32.xlu1 %v4500_v27, %s3675_s14  ;;  %v4671_v49 = vmul.f32 0.27406862, %v4620_v16  ;;  %v1823_v6 = vadd.f32 %v1807_v11, %v1774_v61  ;;  %v4674_v20 = vmul.f32 0.45186275, %v4655_v50 }
 0x13d   :  { %1634 = vrot.lane.b32.xlu0 %v4507_v4, %s3674_s13  ;;  %v1822_v0 = vadd.f32 %v1806_v5, %v1773_v43  ;;  %v4676_v42 = vadd.f32 %v1948_v54, %v1910_v39  ;;  %v1895_v13 = vrot.slane %v1857_v45, 1  ;;  %v1795_v47 = vld [vmem:[#allocation2 + $0x238] sm:$0x3]  ;;  %v1890_v4 = vsel %vm740_vm3, %v1888_v29, %v1889_v52 }
 0x13e   :  { %v1894_v58 = vrot.slane %v1856_v62, 1  ;;  %v1842_v28 = vmul.f32 0.27406862, %v1832_v10  ;;  %v1922_v59 = vmul.f32 0.27406862, %v1833_v25  ;;  %v1954_v63 = vsel %vm805_vm4, %v1952_v60, %v1953_v15  ;;  %v5690_v52 = vld [vmem:[#allocation12_spill] sm:$0xff] }
 0x13f   :  { %v1846_v16 = vmul.f32 0.45186275, %v1822_v0  ;;  %v1847_v21 = vmul.f32 0.45186275, %v1823_v6  ;;  %v1730_v30 = vmul.f32 0.27406862, %v1714_v32  ;;  %v1912_v15 = vadd.f32 %v1890_v4, %v1840_v36 }
 0x140   :  { %v1761_v41 = vmul.f32 0.45186275, %v4516_v22  ;;  %v1718_v17 = vld [vmem:[#allocation2 + $0x358] sm:$0x3]  ;;  %1302 = vrot.lane.b32.xlu1 %v4564_v44, %s3675_s14  ;;  %v1896_v62 = vsel %vm740_vm3, %v1894_v58, %v1895_v13  ;;  %v1837_v45 = vmul.f32 0.27406862, %v1822_v0 }
 0x141   :  { %1638 = vrot.lane.b32.xlu0 %v4582_v26, %s3674_s13  ;;  %v1879_v39 = vrot.slane %v1846_v16, 1  ;;  %v1917_v10 = vmul.f32 0.27406862, %v1823_v6  ;;  %v1750_v25 = vld [vmem:[#allocation2 + $0x368] sm:$0x3]  ;;  %v1880_v11 = vrot.slane %v1847_v21, 1  ;;  %v1914_v26 = vadd.f32 %v1896_v62, %v1842_v28 }
 0x142   :  { %v4689_v5 = vmul.f32 0.45186275, %v4676_v42  ;;  %v1762_v29 = vmul.f32 0.45186275, %v1746_v40  ;;  %v1958_v22 = vrot.slane %v1842_v28, 2  ;;  %v1777_v33 = vadd.f32 %v1761_v41, %v5690_v52  ;;  %v4693_v60 = vld [vmem:[#allocation2 + $0x370] sm:$0xff] }
 0x143   :  { %v1810_v43 = vmul.f32 0.27406862, %v4678_v48  ;;  %v1811_v61 = vmul.f32 0.27406862, %v1795_v47  ;;  %v1959_v54 = vrot.slane %v1922_v59, 2  ;;  %v1881_v0 = vsel %vm740_vm3, %v1879_v39, %v1880_v11  ;;  %v5691_v39 = vld [vmem:[#allocation17_spill] sm:$0xff] }
 0x144   :  { %v1778_v6 = vadd.f32 %v1762_v29, %v1730_v30  ;;  %v1799_v32 = vld [vmem:[#allocation2 + $0x378] sm:$0x3]  ;;  %1628 = vrot.lane.b32.xlu1 %v4593_v57, %s3674_s13  ;;  %v1943_v36 = vrot.slane %v1837_v45, 2  ;;  %v1944_v40 = vrot.slane %v1917_v10, 2  ;;  %v1734_v13 = vmul.f32 0.27406862, %v1718_v17 }
 0x145   :  { %1666 = vrot.lane.b32.xlu0 %v4544_v51, %s3675_s14  ;;  %v1826_v58 = vadd.f32 %v1810_v43, %v1777_v33  ;;  %v1765_v47 = vmul.f32 0.45186275, %v4529_v24  ;;  %v1766_v16 = vmul.f32 0.45186275, %v1750_v25  ;;  %v1814_v28 = vmul.f32 0.27406862, %v4693_v60 }
 0x146   :  { %v1827_v4 = vadd.f32 %v1811_v61, %v1778_v6  ;;  %v1976_v59 = vadd.f32 %v1954_v63, %v1912_v15  ;;  %v1909_v21 = vadd.f32 %v1881_v0, %v1837_v45  ;;  %v1815_v41 = vmul.f32 0.27406862, %v1799_v32  ;;  %v1722_v52 = vld [vmem:[#allocation2 + $0x498] sm:$0x3]  ;;  %v1754_v10 = vld [vmem:[#allocation2 + $0x4a8] sm:$0x3] }
 0x147   :  { %v1850_v30 = vmul.f32 0.45186275, %v1826_v58  ;;  %v1960_v62 = vsel %vm805_vm4, %v1958_v22, %v1959_v54  ;;  %v1781_v11 = vadd.f32 %v1765_v47, %v5691_v39  ;;  %v1782_v29 = vadd.f32 %v1766_v16, %v1734_v13  ;;  %v4711_v43 = vld [vmem:[#allocation2 + $0x4b0] sm:$0xff]  ;;  %v1803_v61 = vld [vmem:[#allocation2 + $0x4b8] sm:$0x3] }
 0x148   :  { %v1851_v57 = vmul.f32 0.45186275, %v1827_v4  ;;  %1632 = vrot.lane.b32.xlu1 %v4634_v18, %s3674_s13  ;;  %v4708_v24 = vadd.f32 %v1960_v62, %v1914_v26  ;;  %v1945_v63 = vsel %vm805_vm4, %v1943_v36, %v1944_v40  ;;  %v1839_v17 = vmul.f32 0.27406862, %v1826_v58 }
 0x149   :  { %1670 = vrot.lane.b32.xlu0 %v4553_v8, %s3675_s14  ;;  %v1885_v45 = vrot.slane %v1850_v30, 1  ;;  %v1919_v15 = vmul.f32 0.27406862, %v1827_v4  ;;  %v1830_v22 = vadd.f32 %v1814_v28, %v1781_v11  ;;  %v1831_v33 = vadd.f32 %v1815_v41, %v1782_v29  ;;  %v2118_v29 = vld [vmem:[#allocation2 + $0x58] sm:$0x3] }
 0x14a   :  { %v1886_v25 = vrot.slane %v1851_v57, 1  ;;  %v4713_v54 = vadd.f32 %v1945_v63, %v1909_v21  ;;  %v1738_v0 = vmul.f32 0.27406862, %v1722_v52  ;;  %v1769_v18 = vmul.f32 0.45186275, %v4549_v37 }
 0x14b   :  { %v1770_v6 = vmul.f32 0.45186275, %v1754_v10  ;;  %v4716_v32 = vmul.f32 0.45186275, %v1976_v59  ;;  %v4719_v26 = vmul.f32 0.27406862, %v4655_v50 }
 0x14c   :  { %v1887_v36 = vsel %vm740_vm3, %v1885_v45, %v1886_v25  ;;  %v1854_v40 = vmul.f32 0.45186275, %v1830_v22  ;;  %1636 = vrot.lane.b32.xlu1 %v4636_v2, %s3674_s13  ;;  %v4727_v58 = vmul.f32 0.27406862, %v4676_v42  ;;  %v4729_v13 = vmul.f32 0.27406862, %v1830_v22 }
 0x14d   :  { %5692 = vst [vmem:[#allocation14_spill] sm:$0xff] %v4719_v26  ;;  %1674 = vrot.lane.b32.xlu0 %v4599_v35, %s3675_s14  ;;  %v1855_v37 = vmul.f32 0.45186275, %v1831_v33  ;;  %v1785_v4 = vadd.f32 %v1769_v18, %v4479_v9  ;;  %v1949_v47 = vrot.slane %v1839_v17, 2  ;;  %v1950_v50 = vrot.slane %v1919_v15, 2 }
 0x14e   :  { %5693 = vst [vmem:[#allocation22_spill] sm:$0xff] %v4727_v58  ;;  %v1786_v16 = vadd.f32 %v1770_v6, %v1738_v0  ;;  %v1818_v28 = vmul.f32 0.27406862, %v4711_v43  ;;  %v2086_v21 = vld [vmem:[#allocation2 + $0x48] sm:$0x3]  ;;  %v1911_v41 = vadd.f32 %v1887_v36, %v1839_v17  ;;  %v1891_v62 = vrot.slane %v1854_v40, 1 }
 0x14f   :  { %v4734_v30 = vmul.f32 0.45186275, %v4708_v24  ;;  %v4737_v2 = vmul.f32 0.45186275, %v4713_v54  ;;  %v1819_v42 = vmul.f32 0.27406862, %v1803_v61  ;;  %v1951_v17 = vsel %vm805_vm4, %v1949_v47, %v1950_v50 }
 0x150   :  { %v1892_v57 = vrot.slane %v1855_v37, 1  ;;  %v1921_v39 = vmul.f32 0.27406862, %v1831_v33  ;;  %v1834_v11 = vadd.f32 %v1818_v28, %v1785_v4  ;;  %1640 = vrot.lane.b32.xlu1 %v4642_v56, %s3674_s13  ;;  %v1955_v9 = vrot.slane %v4729_v13, 2  ;;  %v2167_v45 = vld [vmem:[#allocation2 + $0x68] sm:$0x3] }
 0x151   :  { %1678 = vrot.lane.b32.xlu0 %v4607_v34, %s3675_s14  ;;  %v4744_v52 = vmul.f32 0.27406862, %v1976_v59  ;;  %v1835_v10 = vadd.f32 %v1819_v42, %v1786_v16  ;;  %v2102_v63 = vmul.f32 0.27406862, %v2086_v21  ;;  %v2133_v22 = vmul.f32 0.45186275, %v4569_v53 }
 0x152   :  { %v1843_v25 = vmul.f32 0.27406862, %v1834_v11  ;;  %v1858_v15 = vmul.f32 0.45186275, %v1834_v11  ;;  %v4748_v33 = vadd.f32 %v1951_v17, %v1911_v41  ;;  %v2134_v0 = vmul.f32 0.45186275, %v2118_v29 }
 0x153   :  { %5694 = vst [vmem:[#allocation21_spill] sm:$0xff] %v4744_v52  ;;  %v1859_v61 = vmul.f32 0.45186275, %v1835_v10  ;;  %v1923_v56 = vmul.f32 0.27406862, %v1835_v10  ;;  %v1893_v18 = vsel %vm740_vm3, %v1891_v62, %v1892_v57  ;;  %v1956_v6 = vrot.slane %v1921_v39, 2 }
 0x154   :  { %v1897_v36 = vrot.slane %v1858_v15, 1  ;;  %v1961_v59 = vrot.slane %v1843_v25, 2  ;;  %v4751_v40 = vld [vmem:[#allocation2 + $0x60] sm:$0xff]  ;;  %1668 = vrot.lane.b32.xlu1 %v4629_v14, %s3675_s14  ;;  %v2150_v16 = vadd.f32 %v2134_v0, %v2102_v63  ;;  %v2090_v28 = vld [vmem:[#allocation2 + $0x188] sm:$0x3]  ;;  %v1913_v39 = vadd.f32 %v1893_v18, %v4729_v13 }
 0x155   :  { %v2089_v37 = vld [vmem:[#allocation2 + $0x180] sm:$0xff]  ;;  %2004 = vrot.lane.b32.xlu0 %v4674_v20, %s3674_s13  ;;  %v1898_v53 = vrot.slane %v1859_v61, 1  ;;  %v1962_v4 = vrot.slane %v1923_v56, 2  ;;  %v2122_v21 = vld [vmem:[#allocation2 + $0x198] sm:$0x3] }
 0x156   :  { %v5695_v47 = vld [vmem:[#allocation9_spill] sm:$0xff]  ;;  %v4759_v41 = vmul.f32 0.27406862, %v4708_v24  ;;  %v2182_v42 = vmul.f32 0.27406862, %v4751_v40 }
 0x157   :  { %v2149_v50 = vadd.f32 %v2133_v22, %v5695_v47  ;;  %v2183_v62 = vmul.f32 0.27406862, %v2167_v45  ;;  %v4763_v57 = vmul.f32 0.45186275, %v4748_v33  ;;  %v1899_v20 = vsel %vm740_vm3, %v1897_v36, %v1898_v53  ;;  %v4770_v29 = vld [vmem:[#allocation2 + $0x1a0] sm:$0xff] }
 0x158   :  { %5696 = vst [vmem:[#allocation20_spill] sm:$0xff] %v4759_v41  ;;  %v4768_v11 = vmul.f32 0.27406862, %v4713_v54  ;;  %v2105_v17 = vmul.f32 0.27406862, %v2089_v37  ;;  %1672 = vrot.lane.b32.xlu1 %v4639_v31, %s3675_s14  ;;  %v1963_v13 = vsel %vm805_vm4, %v1961_v59, %v1962_v4  ;;  %v1915_v61 = vadd.f32 %v1899_v20, %v1843_v25 }
 0x159   :  { %v2198_v10 = vadd.f32 %v2182_v42, %v2149_v50  ;;  %v2199_v63 = vadd.f32 %v2183_v62, %v2150_v16  ;;  %v2106_v24 = vmul.f32 0.27406862, %v2090_v28  ;;  %v2171_v15 = vld [vmem:[#allocation2 + $0x1a8] sm:$0x3]  ;;  %2008 = vrot.lane.b32.xlu0 %v4689_v5, %s3674_s13  ;;  %v2137_v45 = vmul.f32 0.45186275, %v4590_v7 }
 0x15a   :  { %5697 = vst [vmem:[#allocation10_spill] sm:$0xff] %v4768_v11  ;;  %v2138_v22 = vmul.f32 0.45186275, %v2122_v21  ;;  %v2186_v54 = vmul.f32 0.27406862, %v4770_v29  ;;  %v2093_v50 = vld [vmem:[#allocation2 + $0x2c0] sm:$0xff]  ;;  %v1957_v16 = vsel %vm805_vm4, %v1955_v9, %v1956_v6  ;;  %v1979_v20 = vadd.f32 %v1963_v13, %v1915_v61 }
 0x15b   :  { %v2214_v56 = vmul.f32 0.27406862, %v2198_v10  ;;  %v2222_v0 = vmul.f32 0.45186275, %v2198_v10  ;;  %v2223_v18 = vmul.f32 0.45186275, %v2199_v63  ;;  %v2153_v37 = vadd.f32 %v2137_v45, %v2105_v17 }
 0x15c   :  { %v2294_v36 = vmul.f32 0.27406862, %v2199_v63  ;;  %v2154_v53 = vadd.f32 %v2138_v22, %v2106_v24  ;;  %v2187_v47 = vmul.f32 0.27406862, %v2171_v15  ;;  %v2094_v59 = vld [vmem:[#allocation2 + $0x2c8] sm:$0x3]  ;;  %1676 = vrot.lane.b32.xlu1 %v4644_v12, %s3675_s14  ;;  %v1977_v7 = vadd.f32 %v1957_v16, %v1913_v39 }
 0x15d   :  { %v2254_v28 = vrot.slane %v2222_v0, 1  ;;  %v2255_v5 = vrot.slane %v2223_v18, 1  ;;  %v2318_v42 = vrot.slane %v2214_v56, 2  ;;  %2012 = vrot.lane.b32.xlu0 %v4716_v32, %s3674_s13  ;;  %v2202_v4 = vadd.f32 %v2186_v54, %v2153_v37  ;;  %v2126_v62 = vld [vmem:[#allocation2 + $0x2d8] sm:$0x3]  ;;  %v4786_v6 = vld [vmem:[#allocation2 + $0x2e0] sm:$0xff] }
 0x15e   :  { %v2319_v25 = vrot.slane %v2294_v36, 2  ;;  %v2203_v21 = vadd.f32 %v2187_v47, %v2154_v53  ;;  %v2109_v63 = vmul.f32 0.27406862, %v2093_v50  ;;  %v2141_v9 = vmul.f32 0.45186275, %v4610_v19  ;;  %v2097_v47 = vld [vmem:[#allocation2 + $0x400] sm:$0xff] }
 0x15f   :  { %v2256_v10 = vsel %vm740_vm3, %v2254_v28, %v2255_v5  ;;  %v2226_v15 = vmul.f32 0.45186275, %v2202_v4  ;;  %v2110_v45 = vmul.f32 0.27406862, %v2094_v59  ;;  %v2175_v22 = vld [vmem:[#allocation2 + $0x2e8] sm:$0x3]  ;;  %v871_v28 = vpop.permute.xlu0 %870 }
 0x160   :  { %v2286_v17 = vadd.f32 %v2256_v10, %v2214_v56  ;;  %v2320_v24 = vsel %vm805_vm4, %v2318_v42, %v2319_v25  ;;  %v4789_v32 = vmul.f32 0.27406862, %v2202_v4  ;;  %v2227_v39 = vmul.f32 0.45186275, %v2203_v21  ;;  %1680 = vrot.lane.b32.xlu1 %v4671_v49, %s3675_s14  ;;  %v2098_v50 = vld [vmem:[#allocation2 + $0x408] sm:$0x3] }
 0x161   :  { %v2142_v54 = vmul.f32 0.45186275, %v2126_v62  ;;  %v2157_v0 = vadd.f32 %v2141_v9, %v2109_v63  ;;  %2016 = vrot.lane.b32.xlu0 %v4734_v30, %s3674_s13  ;;  %v4795_v19 = vmul.f32 0.45186275, %v1977_v7  ;;  %v2260_v61 = vrot.slane %v2226_v15, 1 }
 0x162   :  { %v4797_v13 = vadd.f32 %v2320_v24, %v2286_v17  ;;  %v2190_v56 = vmul.f32 0.27406862, %v4786_v6  ;;  %v4801_v18 = vmul.f32 0.27406862, %v4748_v33  ;;  %v2261_v36 = vrot.slane %v2227_v39, 1  ;;  %v4818_v17 = vld [vmem:[#allocation2 + $0x420] sm:$0xff] }
 0x163   :  { %v2158_v37 = vadd.f32 %v2142_v54, %v2110_v45  ;;  %v2191_v53 = vmul.f32 0.27406862, %v2175_v22  ;;  %v2130_v16 = vld [vmem:[#allocation2 + $0x418] sm:$0x3]  ;;  %v4803_v5 = vmul.f32 0.45186275, %v1979_v20  ;;  %v4821_v45 = vadd.f32 %v871_v28, %v4150_v55 }
 0x164   :  { %v2296_v30 = vmul.f32 0.27406862, %v2203_v21  ;;  %v4805_v42 = vmul.f32 0.27406862, %v1977_v7  ;;  %v2206_v59 = vadd.f32 %v2190_v56, %v2157_v0  ;;  %v4808_v25 = vmul.f32 0.45186275, %v4797_v13  ;;  %2006 = vrot.lane.b32.xlu1 %v4737_v2, %s3674_s13 }
 0x165   :  { %v2324_v4 = vrot.slane %v4789_v32, 2  ;;  %v2207_v33 = vadd.f32 %v2191_v53, %v2158_v37  ;;  %v4811_v62 = vmul.f32 0.27406862, %v1979_v20  ;;  %v2179_v10 = vld [vmem:[#allocation2 + $0x428] sm:$0x3]  ;;  %2044 = vrot.lane.b32.xlu0 %v4719_v26, %s3675_s14  ;;  %v2262_v21 = vsel %vm740_vm3, %v2260_v61, %v2261_v36  ;;  %v2087_v24 = vld [vmem:[#allocation2 + $0xe0] sm:$0xff] }
 0x166   :  { %v2218_v7 = vmul.f32 0.27406862, %v2206_v59  ;;  %v2230_v63 = vmul.f32 0.45186275, %v2206_v59  ;;  %v2113_v9 = vmul.f32 0.27406862, %v2097_v47  ;;  %v2288_v61 = vadd.f32 %v2262_v21, %v4789_v32  ;;  %v873_v59 = vpop.permute.xlu1 %872 }
 0x167   :  { %v2088_v15 = vld [vmem:[#allocation2 + $0xe8] sm:$0x3]  ;;  %v2231_v20 = vmul.f32 0.45186275, %v2207_v33  ;;  %v2298_v22 = vmul.f32 0.27406862, %v2207_v33 }
 0x168   :  { %v2145_v39 = vmul.f32 0.45186275, %v4631_v38  ;;  %v2325_v2 = vrot.slane %v2296_v30, 2  ;;  %v2266_v54 = vrot.slane %v2230_v63, 1  ;;  %v2114_v0 = vmul.f32 0.27406862, %v2098_v50  ;;  %2010 = vrot.lane.b32.xlu1 %v4763_v57, %s3674_s13  ;;  %v875_v63 = vpop.permute.xlu0 %874 }
 0x169   :  { %v2146_v56 = vmul.f32 0.45186275, %v2130_v16  ;;  %v2267_v36 = vrot.slane %v2231_v20, 1  ;;  %v2194_v53 = vmul.f32 0.27406862, %v4818_v17  ;;  %2048 = vrot.lane.b32.xlu0 %v4727_v58, %s3675_s14  ;;  %v2330_v55 = vrot.slane %v2218_v7, 2 }
 0x16a   :  { %v2161_v37 = vadd.f32 %v2145_v39, %v2113_v9  ;;  %v2120_v47 = vld [vmem:[#allocation2 + $0xf8] sm:$0x3]  ;;  %v2331_v38 = vrot.slane %v2298_v22, 2  ;;  %v2195_v30 = vmul.f32 0.27406862, %v2179_v10  ;;  %v4831_v21 = vld [vmem:[#allocation2 + $0x100] sm:$0xff]  ;;  %v4835_v58 = vadd.f32 %v873_v59, %v4248_v1 }
 0x16b   :  { %v2162_v28 = vadd.f32 %v2146_v56, %v2114_v0  ;;  %v2268_v50 = vsel %vm740_vm3, %v2266_v54, %v2267_v36  ;;  %v2103_v32 = vmul.f32 0.27406862, %v2087_v24  ;;  %v2104_v33 = vmul.f32 0.27406862, %v2088_v15  ;;  %v2169_v26 = vld [vmem:[#allocation2 + $0x108] sm:$0x3] }
 0x16c   :  { %v2210_v16 = vadd.f32 %v2194_v53, %v2161_v37  ;;  %v2290_v9 = vadd.f32 %v2268_v50, %v2218_v7  ;;  %v2135_v39 = vmul.f32 0.45186275, %v4651_v46  ;;  %v2136_v57 = vmul.f32 0.45186275, %v2120_v47  ;;  %2014 = vrot.lane.b32.xlu1 %v4795_v19, %s3674_s13  ;;  %v2091_v54 = vld [vmem:[#allocation2 + $0x220] sm:$0xff]  ;;  %v879_v47 = vpop.permute.xlu0 %878 }
 0x16d   :  { %v2211_v20 = vadd.f32 %v2195_v30, %v2162_v28  ;;  %v2184_v10 = vmul.f32 0.27406862, %v4831_v21  ;;  %2052 = vrot.lane.b32.xlu0 %v4744_v52, %s3675_s14  ;;  %v2326_v7 = vsel %vm805_vm4, %v2324_v4, %v2325_v2  ;;  %v2332_v56 = vsel %vm805_vm4, %v2330_v55, %v2331_v38  ;;  %v2092_v53 = vld [vmem:[#allocation2 + $0x228] sm:$0x3]  ;;  %v2124_v50 = vld [vmem:[#allocation2 + $0x238] sm:$0x3] }
 0x16e   :  { %v2220_v22 = vmul.f32 0.27406862, %v2210_v16  ;;  %v2234_v0 = vmul.f32 0.45186275, %v2210_v16  ;;  %v2151_v46 = vadd.f32 %v2135_v39, %v2103_v32  ;;  %v2152_v36 = vadd.f32 %v2136_v57, %v2104_v33  ;;  %v2173_v55 = vld [vmem:[#allocation2 + $0x248] sm:$0x3] }
 0x16f   :  { %v2235_v24 = vmul.f32 0.45186275, %v2211_v20  ;;  %v2300_v15 = vmul.f32 0.27406862, %v2211_v20  ;;  %v2185_v37 = vmul.f32 0.27406862, %v2169_v26  ;;  %v4844_v59 = vadd.f32 %v2326_v7, %v2288_v61 }
 0x170   :  { %v2272_v1 = vrot.slane %v2234_v0, 1  ;;  %v4846_v19 = vadd.f32 %v2332_v56, %v2290_v9  ;;  %v2200_v30 = vadd.f32 %v2184_v10, %v2151_v46  ;;  %v2336_v4 = vrot.slane %v2220_v22, 2  ;;  %v4848_v20 = vld [vmem:[#allocation2 + $0x240] sm:$0xff]  ;;  %2018 = vrot.lane.b32.xlu1 %v4803_v5, %s3674_s13  ;;  %v2096_v10 = vld [vmem:[#allocation2 + $0x368] sm:$0x3]  ;;  %v5698_v7 = vld [vmem:[#allocation15_spill] sm:$0xff] }
 0x171   :  { %v2273_v28 = vrot.slane %v2235_v24, 1  ;;  %v2337_v2 = vrot.slane %v2300_v15, 2  ;;  %v2201_v16 = vadd.f32 %v2185_v37, %v2152_v36  ;;  %v2107_v32 = vmul.f32 0.27406862, %v2091_v54  ;;  %2056 = vrot.lane.b32.xlu0 %v4759_v41, %s3675_s14  ;;  %v4857_v15 = vpop.permute.xlu0 %882  ;;  %v5699_v56 = vld [vmem:[#allocation18_spill] sm:$0xff] }
 0x172   :  { %v2215_v61 = vmul.f32 0.27406862, %v2200_v30  ;;  %v2224_v38 = vmul.f32 0.45186275, %v2200_v30  ;;  %v2108_v33 = vmul.f32 0.27406862, %v2092_v53  ;;  %v896_v24 = vadd.f32 %v875_v63, %v5698_v7 }
 0x173   :  { %v2274_v26 = vsel %vm740_vm3, %v2272_v1, %v2273_v28  ;;  %v2225_v39 = vmul.f32 0.45186275, %v2201_v16  ;;  %v2295_v57 = vmul.f32 0.27406862, %v2201_v16  ;;  %v2139_v0 = vmul.f32 0.45186275, %v4678_v48 }
 0x174   :  { %v2292_v9 = vadd.f32 %v2274_v26, %v2220_v22  ;;  %v2257_v46 = vrot.slane %v2224_v38, 1  ;;  %v2140_v5 = vmul.f32 0.45186275, %v2124_v50  ;;  %v2188_v54 = vmul.f32 0.27406862, %v4848_v20  ;;  %v2095_v53 = vld [vmem:[#allocation2 + $0x360] sm:$0xff]  ;;  %2046 = vrot.lane.b32.xlu1 %v4768_v11, %s3675_s14 }
 0x175   :  { %v4861_v36 = vadd.f32 %v879_v47, %v5699_v56  ;;  %v2368_v1 = vmul.f32 0.45186275, %v4844_v59  ;;  %v2370_v22 = vmul.f32 0.45186275, %v4846_v19  ;;  %v2258_v37 = vrot.slane %v2225_v39, 1  ;;  %2382 = vrot.lane.b32.xlu0 %v4808_v25, %s3674_s13  ;;  %v4873_v39 = vld [vmem:[#allocation2 + $0x380] sm:$0xff]  ;;  %v911_v7 = vpop.permute.xlu0 %910 }
 0x176   :  { %v2338_v48 = vsel %vm805_vm4, %v2336_v4, %v2337_v2  ;;  %v2155_v63 = vadd.f32 %v2139_v0, %v2107_v32  ;;  %v2156_v28 = vadd.f32 %v2140_v5, %v2108_v33  ;;  %v2189_v30 = vmul.f32 0.27406862, %v2173_v55  ;;  %v2128_v50 = vld [vmem:[#allocation2 + $0x378] sm:$0x3]  ;;  %v2177_v25 = vld [vmem:[#allocation2 + $0x388] sm:$0x3] }
 0x177   :  { %v4870_v47 = vadd.f32 %v2338_v48, %v2292_v9  ;;  %v2259_v16 = vsel %vm740_vm3, %v2257_v46, %v2258_v37  ;;  %v2321_v26 = vrot.slane %v2215_v61, 2  ;;  %v2322_v38 = vrot.slane %v2295_v57, 2 }
 0x178   :  { %v2204_v56 = vadd.f32 %v2188_v54, %v2155_v63  ;;  %v2205_v11 = vadd.f32 %v2189_v30, %v2156_v28  ;;  %v2111_v41 = vmul.f32 0.27406862, %v2095_v53  ;;  %v2112_v52 = vmul.f32 0.27406862, %v2096_v10  ;;  %2050 = vrot.lane.b32.xlu1 %v4801_v18, %s3675_s14  ;;  %v2099_v54 = vld [vmem:[#allocation2 + $0x4a0] sm:$0xff] }
 0x179   :  { %v934_v4 = vadd.f32 %v911_v7, %v4821_v45  ;;  %v2143_v2 = vmul.f32 0.45186275, %v4693_v60  ;;  %v2144_v32 = vmul.f32 0.45186275, %v2128_v50  ;;  %v2192_v55 = vmul.f32 0.27406862, %v4873_v39  ;;  %2386 = vrot.lane.b32.xlu0 %v2368_v1, %s3674_s13  ;;  %v4882_v60 = vpop.permute.xlu1 %876  ;;  %v915_v37 = vpop.permute.xlu0 %914 }
 0x17a   :  { %v2287_v33 = vadd.f32 %v2259_v16, %v2215_v61  ;;  %v2217_v9 = vmul.f32 0.27406862, %v2204_v56  ;;  %v2228_v57 = vmul.f32 0.45186275, %v2204_v56  ;;  %v2229_v0 = vmul.f32 0.45186275, %v2205_v11 }
 0x17b   :  { %943 = vst.msk [vmem:[#allocation6] sm:$0xff] %vm942_vm5, %v934_v4  ;;  %v2297_v10 = vmul.f32 0.27406862, %v2205_v11  ;;  %v2159_v46 = vadd.f32 %v2143_v2, %v2111_v41  ;;  %v2160_v5 = vadd.f32 %v2144_v32, %v2112_v52  ;;  %v2193_v45 = vmul.f32 0.27406862, %v2177_v25 }
 0x17c   :  { %v2323_v53 = vsel %vm805_vm4, %v2321_v26, %v2322_v38  ;;  %v2263_v48 = vrot.slane %v2228_v57, 1  ;;  %v2264_v63 = vrot.slane %v2229_v0, 1  ;;  %v2327_v28 = vrot.slane %v2217_v9, 2  ;;  %v2100_v1 = vld [vmem:[#allocation2 + $0x4a8] sm:$0x3]  ;;  %2054 = vrot.lane.b32.xlu1 %v4805_v42, %s3675_s14  ;;  %v4892_v38 = vld [vmem:[#allocation2 + $0x4c0] sm:$0xff] }
 0x17d   :  { %v936_v61 = vadd.f32 %v915_v37, %v896_v24  ;;  %v2328_v30 = vrot.slane %v2297_v10, 2  ;;  %v2208_v50 = vadd.f32 %v2192_v55, %v2159_v46  ;;  %v2209_v16 = vadd.f32 %v2193_v45, %v2160_v5  ;;  %v2132_v7 = vld [vmem:[#allocation2 + $0x4b8] sm:$0x3]  ;;  %2390 = vrot.lane.b32.xlu0 %v2370_v22, %s3674_s13  ;;  %v2181_v56 = vld [vmem:[#allocation2 + $0x4c8] sm:$0x3]  ;;  %v881_v32 = vpop.permute.xlu1 %880  ;;  %v919_v55 = vpop.permute.xlu0 %918 }
 0x17e   :  { %v2372_v52 = vmul.f32 0.45186275, %v4870_v47  ;;  %v4889_v41 = vadd.f32 %v2323_v53, %v2287_v33  ;;  %v2265_v11 = vsel %vm740_vm3, %v2263_v48, %v2264_v63  ;;  %v2115_v26 = vmul.f32 0.27406862, %v2099_v54  ;;  %v2463_v54 = vld [vmem:[#allocation2 + $0x50] sm:$0xff] }
 0x17f   :  { %945 = vst.msk [vmem:[#allocation6 + $0x80] sm:$0xff] %vm942_vm5, %v936_v61  ;;  %v2289_v24 = vadd.f32 %v2265_v11, %v2217_v9  ;;  %v2219_v25 = vmul.f32 0.27406862, %v2208_v50  ;;  %v2232_v4 = vmul.f32 0.45186275, %v2208_v50  ;;  %v2329_v22 = vsel %vm805_vm4, %v2327_v28, %v2328_v30  ;;  %v5700_v28 = vld [vmem:[#allocation24_spill] sm:$0xff] }
 0x180   :  { %v2116_v2 = vmul.f32 0.27406862, %v2100_v1  ;;  %v2233_v57 = vmul.f32 0.45186275, %v2209_v16  ;;  %v2299_v0 = vmul.f32 0.27406862, %v2209_v16  ;;  %v938_v10 = vadd.f32 %v919_v55, %v4861_v36  ;;  %2058 = vrot.lane.b32.xlu1 %v4811_v62, %s3675_s14 }
 0x181   :  { %v2147_v33 = vmul.f32 0.45186275, %v4711_v43  ;;  %v4898_v46 = vadd.f32 %v2329_v22, %v2289_v24  ;;  %v2269_v5 = vrot.slane %v2232_v4, 1  ;;  %v2333_v45 = vrot.slane %v2219_v25, 2  ;;  %2394 = vrot.lane.b32.xlu0 %v2372_v52, %s3674_s13  ;;  %v2464_v63 = vld [vmem:[#allocation2 + $0x58] sm:$0x3]  ;;  %v4910_v30 = vpop.permute.xlu1 %884  ;;  %v923_v50 = vpop.permute.xlu0 %922 }
 0x182   :  { %v2270_v9 = vrot.slane %v2233_v57, 1  ;;  %v2334_v37 = vrot.slane %v2299_v0, 2  ;;  %v2148_v53 = vmul.f32 0.45186275, %v2132_v7  ;;  %v900_v43 = vadd.f32 %v4857_v15, %v5700_v28  ;;  %947 = vst.msk [vmem:[#allocation6 + $0x100] sm:$0xff] %vm942_vm5, %v938_v10  ;;  %v4922_v57 = vld [vmem:[#allocation2 + $0x70] sm:$0xff] }
 0x183   :  { %v2163_v48 = vadd.f32 %v2147_v33, %v2115_v26  ;;  %v4907_v36 = vmul.f32 0.27406862, %v4797_v13  ;;  %v2196_v1 = vmul.f32 0.27406862, %v4892_v38  ;;  %v2197_v61 = vmul.f32 0.27406862, %v2181_v56 }
 0x184   :  { %v2367_v16 = vmul.f32 0.45186275, %v4889_v41  ;;  %v4914_v7 = vmul.f32 0.27406862, %v4844_v59  ;;  %v2271_v52 = vsel %vm740_vm3, %v2269_v5, %v2270_v9  ;;  %v2164_v11 = vadd.f32 %v2148_v53, %v2116_v2  ;;  %v2496_v4 = vld [vmem:[#allocation2 + $0x68] sm:$0x3] }
 0x185   :  { %v940_v15 = vadd.f32 %v923_v50, %v900_v43  ;;  %v2369_v26 = vmul.f32 0.45186275, %v4898_v46  ;;  %v2291_v24 = vadd.f32 %v2271_v52, %v2219_v25  ;;  %v2212_v13 = vadd.f32 %v2196_v1, %v2163_v48  ;;  %2422 = vrot.lane.b32.xlu0 %v4907_v36, %s3675_s14  ;;  %v2545_v0 = vld [vmem:[#allocation2 + $0x78] sm:$0x3]  ;;  %v913_v9 = vpop.permute.xlu1 %912  ;;  %v4930_v53 = vpop.permute.xlu0 %1248 }
 0x186   :  { %5701 = vst [vmem:[#allocation12_spill] sm:$0xff] %v4914_v7  ;;  %2384 = vrot.lane.b32.xlu1 %v2367_v16, %s3674_s13  ;;  %v2335_v56 = vsel %vm805_vm4, %v2333_v45, %v2334_v37  ;;  %v2213_v55 = vadd.f32 %v2197_v61, %v2164_v11  ;;  %v2479_v22 = vmul.f32 0.27406862, %v2463_v54  ;;  %v2480_v59 = vmul.f32 0.27406862, %v2464_v63  ;;  %v2467_v61 = vld [vmem:[#allocation2 + $0x190] sm:$0xff] }
 0x187   :  { %949 = vst.msk [vmem:[#allocation6 + $0x180] sm:$0xff] %vm942_vm5, %v940_v15  ;;  %v4925_v2 = vadd.f32 %v2335_v56, %v2291_v24  ;;  %v2221_v25 = vmul.f32 0.27406862, %v2212_v13  ;;  %v2236_v33 = vmul.f32 0.45186275, %v2212_v13  ;;  %v897_v5 = vadd.f32 %v4882_v60, %v4368_v3 }
 0x188   :  { %v2511_v10 = vmul.f32 0.45186275, %v4751_v40  ;;  %v2237_v45 = vmul.f32 0.45186275, %v2213_v55  ;;  %v2301_v54 = vmul.f32 0.27406862, %v2213_v55  ;;  %v899_v63 = vadd.f32 %v881_v32, %v4492_v23 }
 0x189   :  { %v2512_v37 = vmul.f32 0.45186275, %v2496_v4  ;;  %v2468_v48 = vld [vmem:[#allocation2 + $0x198] sm:$0x3]  ;;  %v935_v28 = vadd.f32 %v913_v9, %v4835_v58  ;;  %v4935_v43 = vmul.f32 0.27406862, %v4846_v19  ;;  %2426 = vrot.lane.b32.xlu0 %v4914_v7, %s3675_s14  ;;  %v917_v11 = vpop.permute.xlu1 %916  ;;  %v4950_v15 = vpop.permute.xlu0 %1252 }
 0x18a   :  { %v2275_v1 = vrot.slane %v2236_v33, 1  ;;  %v2500_v40 = vld [vmem:[#allocation2 + $0x1a8] sm:$0x3]  ;;  %2388 = vrot.lane.b32.xlu1 %v2369_v26, %s3674_s13  ;;  %v2276_v3 = vrot.slane %v2237_v45, 1  ;;  %v2339_v60 = vrot.slane %v2221_v25, 2  ;;  %v2340_v50 = vrot.slane %v2301_v54, 2 }
 0x18b   :  { %5702 = vst [vmem:[#allocation17_spill] sm:$0xff] %v4935_v43  ;;  %v4941_v16 = vmul.f32 0.27406862, %v4870_v47  ;;  %v4943_v23 = vld [vmem:[#allocation2 + $0x1b0] sm:$0xff]  ;;  %944 = vst.msk [vmem:[#allocation6 + $0x40] sm:$0xff] %vm942_vm5, %v935_v28  ;;  %v2527_v19 = vadd.f32 %v2511_v10, %v2479_v22  ;;  %v2528_v47 = vadd.f32 %v2512_v37, %v2480_v59  ;;  %v937_v56 = vadd.f32 %v917_v11, %v897_v5  ;;  %v5704_v37 = vld [vmem:[#allocation26_spill] sm:$0xff] }
 0x18c   :  { %v2371_v58 = vmul.f32 0.45186275, %v4925_v2  ;;  %v4948_v32 = vmul.f32 0.27406862, %v4922_v57  ;;  %v2561_v52 = vmul.f32 0.27406862, %v2545_v0  ;;  %v2277_v26 = vsel %vm740_vm3, %v2275_v1, %v2276_v3 }
 0x18d   :  { %5703 = vst [vmem:[#allocation9_spill] sm:$0xff] %v4941_v16  ;;  %v2341_v24 = vsel %vm805_vm4, %v2339_v60, %v2340_v50  ;;  %v2483_v13 = vmul.f32 0.27406862, %v2467_v61  ;;  %v2549_v4 = vld [vmem:[#allocation2 + $0x1b8] sm:$0x3]  ;;  %v2293_v55 = vadd.f32 %v2277_v26, %v2221_v25  ;;  %2430 = vrot.lane.b32.xlu0 %v4935_v43, %s3675_s14  ;;  %946 = vst.msk [vmem:[#allocation6 + $0xc0] sm:$0xff] %vm942_vm5, %v937_v56  ;;  %v921_v28 = vpop.permute.xlu1 %920  ;;  %v4967_v1 = vpop.permute.xlu0 %1256 }
 0x18e   :  { %v2576_v33 = vadd.f32 %v4948_v32, %v2527_v19  ;;  %v2484_v9 = vmul.f32 0.27406862, %v2468_v48  ;;  %2392 = vrot.lane.b32.xlu1 %v2371_v58, %s3674_s13  ;;  %v2577_v22 = vadd.f32 %v2561_v52, %v2528_v47  ;;  %v2515_v0 = vmul.f32 0.45186275, %v4770_v29  ;;  %v2472_v52 = vld [vmem:[#allocation2 + $0x2d8] sm:$0x3] }
 0x18f   :  { %v2516_v10 = vmul.f32 0.45186275, %v2500_v40  ;;  %v4960_v45 = vmul.f32 0.27406862, %v4943_v23  ;;  %v4963_v59 = vadd.f32 %v2341_v24, %v2293_v55  ;;  %v2565_v54 = vmul.f32 0.27406862, %v2549_v4 }
 0x190   :  { %v2592_v25 = vmul.f32 0.27406862, %v2576_v33  ;;  %v2600_v5 = vmul.f32 0.45186275, %v2576_v33  ;;  %v901_v48 = vadd.f32 %v4910_v30, %v5704_v37  ;;  %v2601_v61 = vmul.f32 0.45186275, %v2577_v22 }
 0x191   :  { %v2672_v3 = vmul.f32 0.27406862, %v2577_v22  ;;  %v2531_v29 = vadd.f32 %v2515_v0, %v2483_v13  ;;  %v2471_v40 = vld [vmem:[#allocation2 + $0x2d0] sm:$0xff]  ;;  %v939_v60 = vadd.f32 %v921_v28, %v899_v63  ;;  %v2373_v50 = vmul.f32 0.45186275, %v4963_v59  ;;  %2434 = vrot.lane.b32.xlu0 %v4941_v16, %s3675_s14  ;;  %v4982_v22 = vpop.permute.xlu0 %1260 }
 0x192   :  { %v2632_v58 = vrot.slane %v2600_v5, 1  ;;  %v2532_v19 = vadd.f32 %v2516_v10, %v2484_v9  ;;  %v2633_v11 = vrot.slane %v2601_v61, 1  ;;  %v2696_v26 = vrot.slane %v2592_v25, 2  ;;  %v2504_v47 = vld [vmem:[#allocation2 + $0x2e8] sm:$0x3]  ;;  %v5705_v4 = vld [vmem:[#allocation11_spill] sm:$0xff]  ;;  %v925_v9 = vpop.permute.xlu1 %924 }
 0x193   :  { %v2697_v24 = vrot.slane %v2672_v3, 2  ;;  %v2580_v30 = vadd.f32 %v4960_v45, %v2531_v29  ;;  %v1272_v56 = vadd.f32 %v4930_v53, %v5705_v4  ;;  %948 = vst.msk [vmem:[#allocation6 + $0x140] sm:$0xff] %vm942_vm5, %v939_v60  ;;  %2396 = vrot.lane.b32.xlu1 %v2373_v50, %s3674_s13  ;;  %v4978_v63 = vmul.f32 0.27406862, %v4889_v41  ;;  %v4980_v33 = vld [vmem:[#allocation2 + $0x2f0] sm:$0xff] }
 0x194   :  { %v2581_v13 = vadd.f32 %v2565_v54, %v2532_v19  ;;  %v2487_v55 = vmul.f32 0.27406862, %v2471_v40  ;;  %v2634_v0 = vsel %vm740_vm3, %v2632_v58, %v2633_v11  ;;  %v2488_v37 = vmul.f32 0.27406862, %v2472_v52  ;;  %v2553_v29 = vld [vmem:[#allocation2 + $0x2f8] sm:$0x3] }
 0x195   :  { %5706 = vst [vmem:[#allocation15_spill] sm:$0xff] %v4978_v63  ;;  %v2594_v10 = vmul.f32 0.27406862, %v2580_v30  ;;  %v2604_v5 = vmul.f32 0.45186275, %v2580_v30  ;;  %v941_v53 = vadd.f32 %v925_v9, %v901_v48  ;;  %v2664_v28 = vadd.f32 %v2634_v0, %v2592_v25  ;;  %v1289_v52 = vpop.permute.xlu0 %1288  ;;  %v2475_v30 = vld [vmem:[#allocation2 + $0x410] sm:$0xff] }
 0x196   :  { %v2698_v61 = vsel %vm805_vm4, %v2696_v26, %v2697_v24  ;;  %v2605_v3 = vmul.f32 0.45186275, %v2581_v13  ;;  %v2674_v60 = vmul.f32 0.27406862, %v2581_v13  ;;  %v2519_v40 = vmul.f32 0.45186275, %v4786_v6  ;;  %v4993_v48 = vpop.permute.xlu1 %1250 }
 0x197   :  { %v2638_v41 = vrot.slane %v2604_v5, 1  ;;  %v2702_v54 = vrot.slane %v2594_v10, 2  ;;  %950 = vst.msk [vmem:[#allocation6 + $0x1c0] sm:$0xff] %vm942_vm5, %v941_v53  ;;  %2424 = vrot.lane.b32.xlu1 %v4978_v63, %s3675_s14  ;;  %v4990_v50 = vadd.f32 %v2698_v61, %v2664_v28  ;;  %v2520_v19 = vmul.f32 0.45186275, %v2504_v47  ;;  %v5708_v5 = vld [vmem:[#allocation16_spill] sm:$0xff] }
 0x198   :  { %v2639_v58 = vrot.slane %v2605_v3, 1  ;;  %v2568_v25 = vmul.f32 0.27406862, %v4980_v33  ;;  %v2703_v11 = vrot.slane %v2674_v60, 2  ;;  %v2535_v26 = vadd.f32 %v2519_v40, %v2487_v55  ;;  %v2476_v4 = vld [vmem:[#allocation2 + $0x418] sm:$0x3] }
 0x199   :  { %v2569_v24 = vmul.f32 0.27406862, %v2553_v29  ;;  %v2744_v6 = vmul.f32 0.45186275, %v4990_v50  ;;  %v1312_v13 = vadd.f32 %v1289_v52, %v1272_v56  ;;  %v4997_v9 = vmul.f32 0.27406862, %v4898_v46 }
 0x19a   :  { %v2640_v0 = vsel %vm740_vm3, %v2638_v41, %v2639_v58  ;;  %v1274_v47 = vadd.f32 %v4950_v15, %v5708_v5  ;;  %v2536_v28 = vadd.f32 %v2520_v19, %v2488_v37  ;;  %v2584_v61 = vadd.f32 %v2568_v25, %v2535_v26  ;;  %v2508_v3 = vld [vmem:[#allocation2 + $0x428] sm:$0x3]  ;;  %v5002_v60 = vld [vmem:[#allocation2 + $0x430] sm:$0xff]  ;;  %v1293_v37 = vpop.permute.xlu0 %1292  ;;  %v2557_v19 = vld [vmem:[#allocation2 + $0x438] sm:$0x3] }
 0x19b   :  { %5707 = vst [vmem:[#allocation18_spill] sm:$0xff] %v4997_v9  ;;  %v2666_v53 = vadd.f32 %v2640_v0, %v2594_v10  ;;  %2760 = vrot.lane.b32.xlu0 %v2744_v6, %s3674_s13  ;;  %1321 = vst.msk [vmem:[#allocation6 + $0x8] sm:$0xff] %vm942_vm5, %v1312_v13  ;;  %2428 = vrot.lane.b32.xlu1 %v4997_v9, %s3675_s14  ;;  %v2704_v46 = vsel %vm805_vm4, %v2702_v54, %v2703_v11  ;;  %v2491_v56 = vmul.f32 0.27406862, %v2475_v30  ;;  %v5012_v10 = vpop.permute.xlu1 %1254  ;;  %v2466_v6 = vld [vmem:[#allocation2 + $0xf8] sm:$0x3] }
 0x19c   :  { %v2492_v55 = vmul.f32 0.27406862, %v2476_v4  ;;  %v2523_v29 = vmul.f32 0.45186275, %v4818_v17  ;;  %v2585_v41 = vadd.f32 %v2569_v24, %v2536_v28  ;;  %v2596_v40 = vmul.f32 0.27406862, %v2584_v61 }
 0x19d   :  { %v5010_v15 = vadd.f32 %v2704_v46, %v2666_v53  ;;  %v2608_v58 = vmul.f32 0.45186275, %v2584_v61  ;;  %v1314_v25 = vadd.f32 %v1293_v37, %v1274_v47  ;;  %v5015_v52 = vmul.f32 0.27406862, %v4925_v2  ;;  %v5710_v54 = vld [vmem:[#allocation23_spill] sm:$0xff] }
 0x19e   :  { %v2524_v26 = vmul.f32 0.45186275, %v2508_v3  ;;  %v1276_v11 = vadd.f32 %v4967_v1, %v5710_v54  ;;  %v2609_v30 = vmul.f32 0.45186275, %v2585_v41  ;;  %v2465_v13 = vld [vmem:[#allocation2 + $0xf0] sm:$0xff]  ;;  %v2539_v0 = vadd.f32 %v2523_v29, %v2491_v56  ;;  %v1297_v28 = vpop.permute.xlu0 %1296 }
 0x19f   :  { %5709 = vst [vmem:[#allocation24_spill] sm:$0xff] %v5015_v52  ;;  %v2746_v17 = vmul.f32 0.45186275, %v5010_v15  ;;  %v2644_v4 = vrot.slane %v2608_v58, 1  ;;  %1323 = vst.msk [vmem:[#allocation6 + $0x88] sm:$0xff] %vm942_vm5, %v1314_v25  ;;  %2432 = vrot.lane.b32.xlu1 %v5015_v52, %s3675_s14  ;;  %v2708_v53 = vrot.slane %v2596_v40, 2  ;;  %v1259_v1 = vpop.permute.xlu1 %1258 }
 0x1a0   :  { %v2676_v24 = vmul.f32 0.27406862, %v2585_v41  ;;  %v2572_v2 = vmul.f32 0.27406862, %v5002_v60  ;;  %v2573_v5 = vmul.f32 0.27406862, %v2557_v19  ;;  %v2540_v3 = vadd.f32 %v2524_v26, %v2492_v55 }
 0x1a1   :  { %2764 = vrot.lane.b32.xlu0 %v2746_v17, %s3674_s13  ;;  %v2645_v47 = vrot.slane %v2609_v30, 1  ;;  %v5026_v61 = vmul.f32 0.27406862, %v4963_v59  ;;  %v2498_v46 = vld [vmem:[#allocation2 + $0x108] sm:$0x3]  ;;  %v1316_v58 = vadd.f32 %v1297_v28, %v1276_v11  ;;  %v5030_v17 = vld [vmem:[#allocation2 + $0x110] sm:$0xff] }
 0x1a2   :  { %v2709_v37 = vrot.slane %v2676_v24, 2  ;;  %v2588_v25 = vadd.f32 %v2572_v2, %v2539_v0  ;;  %v2481_v54 = vmul.f32 0.27406862, %v2465_v13  ;;  %v2589_v29 = vadd.f32 %v2573_v5, %v2540_v3  ;;  %v5712_v11 = vld [vmem:[#allocation25_spill] sm:$0xff]  ;;  %v2547_v2 = vld [vmem:[#allocation2 + $0x118] sm:$0x3] }
 0x1a3   :  { %5711 = vst [vmem:[#allocation26_spill] sm:$0xff] %v5026_v61  ;;  %v2646_v56 = vsel %vm740_vm3, %v2644_v4, %v2645_v47  ;;  %v2482_v41 = vmul.f32 0.27406862, %v2466_v6  ;;  %v2513_v19 = vmul.f32 0.45186275, %v4831_v21  ;;  %1325 = vst.msk [vmem:[#allocation6 + $0x108] sm:$0xff] %vm942_vm5, %v1316_v58  ;;  %2436 = vrot.lane.b32.xlu1 %v5026_v61, %s3675_s14  ;;  %v1278_v13 = vadd.f32 %v4982_v22, %v5712_v11  ;;  %v1263_v0 = vpop.permute.xlu1 %1262  ;;  %v1301_v21 = vpop.permute.xlu0 %1300 }
 0x1a4   :  { %v2668_v30 = vadd.f32 %v2646_v56, %v2596_v40  ;;  %v2598_v59 = vmul.f32 0.27406862, %v2588_v25  ;;  %v2612_v55 = vmul.f32 0.45186275, %v2588_v25  ;;  %v2514_v26 = vmul.f32 0.45186275, %v2498_v46 }
 0x1a5   :  { %v2710_v4 = vsel %vm805_vm4, %v2708_v53, %v2709_v37  ;;  %v2613_v24 = vmul.f32 0.45186275, %v2589_v29  ;;  %v2678_v6 = vmul.f32 0.27406862, %v2589_v29  ;;  %v2529_v28 = vadd.f32 %v2513_v19, %v2481_v54  ;;  %v2469_v25 = vld [vmem:[#allocation2 + $0x230] sm:$0xff]  ;;  %v5713_v61 = vld [vmem:[#allocation13_spill] sm:$0xff] }
 0x1a6   :  { %v5038_v5 = vadd.f32 %v2710_v4, %v2668_v30  ;;  %v2650_v40 = vrot.slane %v2612_v55, 1  ;;  %v2714_v47 = vrot.slane %v2598_v59, 2  ;;  %v1318_v56 = vadd.f32 %v1301_v21, %v1278_v13  ;;  %v2470_v11 = vld [vmem:[#allocation2 + $0x238] sm:$0x3]  ;;  %v5714_v52 = vld [vmem:[#allocation19_spill] sm:$0xff] }
 0x1a7   :  { %v2651_v3 = vrot.slane %v2613_v24, 1  ;;  %v2715_v58 = vrot.slane %v2678_v6, 2  ;;  %v2562_v46 = vmul.f32 0.27406862, %v5030_v17  ;;  %v1273_v22 = vadd.f32 %v4993_v48, %v5713_v61  ;;  %v1291_v13 = vpop.permute.xlu1 %1290  ;;  %v5049_v4 = vpop.permute.xlu0 %1626  ;;  %v2502_v24 = vld [vmem:[#allocation2 + $0x248] sm:$0x3] }
 0x1a8   :  { %v2748_v53 = vmul.f32 0.45186275, %v5038_v5  ;;  %v2530_v37 = vadd.f32 %v2514_v26, %v2482_v41  ;;  %v2563_v29 = vmul.f32 0.27406862, %v2547_v2  ;;  %v1275_v30 = vadd.f32 %v5012_v10, %v5714_v52  ;;  %1327 = vst.msk [vmem:[#allocation6 + $0x188] sm:$0xff] %vm942_vm5, %v1318_v56  ;;  %v5052_v6 = vld [vmem:[#allocation2 + $0x250] sm:$0xff] }
 0x1a9   :  { %v1277_v55 = vadd.f32 %v1259_v1, %v4500_v27  ;;  %v2652_v54 = vsel %vm740_vm3, %v2650_v40, %v2651_v3  ;;  %v2578_v19 = vadd.f32 %v2562_v46, %v2529_v28  ;;  %v1313_v41 = vadd.f32 %v1291_v13, %v1273_v22  ;;  %v2551_v10 = vld [vmem:[#allocation2 + $0x258] sm:$0x3] }
 0x1aa   :  { %2768 = vrot.lane.b32.xlu0 %v2748_v53, %s3674_s13  ;;  %v2670_v48 = vadd.f32 %v2652_v54, %v2598_v59  ;;  %v2579_v61 = vadd.f32 %v2563_v29, %v2530_v37  ;;  %v2485_v26 = vmul.f32 0.27406862, %v2469_v25  ;;  %v2716_v27 = vsel %vm805_vm4, %v2714_v47, %v2715_v58  ;;  %v2473_v59 = vld [vmem:[#allocation2 + $0x370] sm:$0xff]  ;;  %v2474_v54 = vld [vmem:[#allocation2 + $0x378] sm:$0x3] }
 0x1ab   :  { %v2593_v52 = vmul.f32 0.27406862, %v2578_v19  ;;  %v2602_v1 = vmul.f32 0.45186275, %v2578_v19  ;;  %v2486_v21 = vmul.f32 0.27406862, %v2470_v11  ;;  %v1295_v53 = vpop.permute.xlu1 %1294  ;;  %v5060_v37 = vpop.permute.xlu0 %1630  ;;  %v1279_v19 = vadd.f32 %v1263_v0, %v4564_v44 }
 0x1ac   :  { %v5055_v2 = vadd.f32 %v2716_v27, %v2670_v48  ;;  %v2603_v40 = vmul.f32 0.45186275, %v2579_v61  ;;  %v2673_v28 = vmul.f32 0.27406862, %v2579_v61  ;;  %1322 = vst.msk [vmem:[#allocation6 + $0x48] sm:$0xff] %vm942_vm5, %v1313_v41 }
 0x1ad   :  { %v2517_v3 = vmul.f32 0.45186275, %v4848_v20  ;;  %v2635_v56 = vrot.slane %v2602_v1, 1  ;;  %v2699_v46 = vrot.slane %v2593_v52, 2  ;;  %v2518_v25 = vmul.f32 0.45186275, %v2502_v24 }
 0x1ae   :  { %v2566_v22 = vmul.f32 0.27406862, %v5052_v6  ;;  %v2750_v47 = vmul.f32 0.45186275, %v5055_v2  ;;  %v2636_v58 = vrot.slane %v2603_v40, 1  ;;  %v2700_v29 = vrot.slane %v2673_v28, 2 }
 0x1af   :  { %v2533_v11 = vadd.f32 %v2517_v3, %v2485_v26  ;;  %v2534_v13 = vadd.f32 %v2518_v25, %v2486_v21  ;;  %v2567_v48 = vmul.f32 0.27406862, %v2551_v10  ;;  %v1315_v20 = vadd.f32 %v1295_v53, %v1275_v30  ;;  %v2506_v1 = vld [vmem:[#allocation2 + $0x388] sm:$0x3]  ;;  %v5070_v40 = vld [vmem:[#allocation2 + $0x390] sm:$0xff]  ;;  %v1299_v10 = vpop.permute.xlu1 %1298  ;;  %v5073_v21 = vpop.permute.xlu0 %1634 }
 0x1b0   :  { %2772 = vrot.lane.b32.xlu0 %v2750_v47, %s3674_s13  ;;  %v2637_v24 = vsel %vm740_vm3, %v2635_v56, %v2636_v58  ;;  %v2701_v61 = vsel %vm805_vm4, %v2699_v46, %v2700_v29  ;;  %v5068_v41 = vmul.f32 0.27406862, %v4990_v50  ;;  %v2489_v44 = vmul.f32 0.27406862, %v2473_v59  ;;  %v2555_v30 = vld [vmem:[#allocation2 + $0x398] sm:$0x3] }
 0x1b1   :  { %v2582_v27 = vadd.f32 %v2566_v22, %v2533_v11  ;;  %v2665_v26 = vadd.f32 %v2637_v24, %v2593_v52  ;;  %v2583_v28 = vadd.f32 %v2567_v48, %v2534_v13  ;;  %1324 = vst.msk [vmem:[#allocation6 + $0xc8] sm:$0xff] %vm942_vm5, %v1315_v20  ;;  %v2490_v0 = vmul.f32 0.27406862, %v2474_v54  ;;  %v2477_v25 = vld [vmem:[#allocation2 + $0x4b0] sm:$0xff]  ;;  %v2478_v22 = vld [vmem:[#allocation2 + $0x4b8] sm:$0x3] }
 0x1b2   :  { %5715 = vst [vmem:[#allocation11_spill] sm:$0xff] %v5068_v41  ;;  %v2521_v46 = vmul.f32 0.45186275, %v4873_v39  ;;  %v1317_v50 = vadd.f32 %v1299_v10, %v1277_v55  ;;  %v2522_v58 = vmul.f32 0.45186275, %v2506_v1 }
 0x1b3   :  { %v2595_v3 = vmul.f32 0.27406862, %v2582_v27  ;;  %v2606_v56 = vmul.f32 0.45186275, %v2582_v27  ;;  %v5076_v53 = vadd.f32 %v2701_v61, %v2665_v26  ;;  %v2607_v47 = vmul.f32 0.45186275, %v2583_v28  ;;  %v1303_v24 = vpop.permute.xlu1 %1302  ;;  %v5086_v61 = vpop.permute.xlu0 %1638 }
 0x1b4   :  { %v2675_v52 = vmul.f32 0.27406862, %v2583_v28  ;;  %2800 = vrot.lane.b32.xlu0 %v5068_v41, %s3675_s14  ;;  %v2537_v11 = vadd.f32 %v2521_v46, %v2489_v44  ;;  %v2570_v54 = vmul.f32 0.27406862, %v5070_v40  ;;  %1326 = vst.msk [vmem:[#allocation6 + $0x148] sm:$0xff] %vm942_vm5, %v1317_v50  ;;  %v2538_v27 = vadd.f32 %v2522_v58, %v2490_v0  ;;  %v5091_v44 = vld [vmem:[#allocation2 + $0x4d0] sm:$0xff] }
 0x1b5   :  { %v2641_v59 = vrot.slane %v2606_v56, 1  ;;  %v2705_v29 = vrot.slane %v2595_v3, 2  ;;  %v2510_v13 = vld [vmem:[#allocation2 + $0x4c8] sm:$0x3]  ;;  %v2745_v39 = vmul.f32 0.45186275, %v5076_v53 }
 0x1b6   :  { %v2642_v55 = vrot.slane %v2607_v47, 1  ;;  %v2706_v48 = vrot.slane %v2675_v52, 2  ;;  %v5084_v20 = vmul.f32 0.27406862, %v5010_v15  ;;  %v2571_v1 = vmul.f32 0.27406862, %v2555_v30 }
 0x1b7   :  { %v2586_v26 = vadd.f32 %v2570_v54, %v2537_v11  ;;  %v5089_v28 = vmul.f32 0.27406862, %v5038_v5  ;;  %2762 = vrot.lane.b32.xlu1 %v2745_v39, %s3674_s13  ;;  %v2493_v46 = vmul.f32 0.27406862, %v2477_v25  ;;  %v2494_v15 = vmul.f32 0.27406862, %v2478_v22  ;;  %v5100_v39 = vpop.permute.xlu1 %1628 }
 0x1b8   :  { %5716 = vst [vmem:[#allocation16_spill] sm:$0xff] %v5084_v20  ;;  %v2643_v10 = vsel %vm740_vm3, %v2641_v59, %v2642_v55  ;;  %v2707_v56 = vsel %vm805_vm4, %v2705_v29, %v2706_v48  ;;  %2804 = vrot.lane.b32.xlu0 %v5084_v20, %s3675_s14  ;;  %v2587_v0 = vadd.f32 %v2571_v1, %v2538_v27  ;;  %v2559_v52 = vld [vmem:[#allocation2 + $0x4d8] sm:$0x3]  ;;  %v2525_v5 = vmul.f32 0.45186275, %v4892_v38  ;;  %v1667_v59 = vpop.permute.xlu0 %1666  ;;  %v2841_v38 = vld [vmem:[#allocation2 + $0x60] sm:$0xff] }
 0x1b9   :  { %5717 = vst [vmem:[#allocation23_spill] sm:$0xff] %v5089_v28  ;;  %v2667_v50 = vadd.f32 %v2643_v10, %v2595_v3  ;;  %v2597_v30 = vmul.f32 0.27406862, %v2586_v26  ;;  %v2610_v47 = vmul.f32 0.45186275, %v2586_v26  ;;  %v1319_v54 = vadd.f32 %v1303_v24, %v1279_v19 }
 0x1ba   :  { %v2526_v58 = vmul.f32 0.45186275, %v2510_v13  ;;  %v2574_v11 = vmul.f32 0.27406862, %v5091_v44  ;;  %v2611_v25 = vmul.f32 0.45186275, %v2587_v0  ;;  %v1650_v55 = vadd.f32 %v5049_v4, %v4544_v51 }
 0x1bb   :  { %v5102_v29 = vadd.f32 %v2707_v56, %v2667_v50  ;;  %v2647_v3 = vrot.slane %v2610_v47, 1  ;;  %v2677_v22 = vmul.f32 0.27406862, %v2587_v0  ;;  %v2541_v48 = vadd.f32 %v2525_v5, %v2493_v46  ;;  %1328 = vst.msk [vmem:[#allocation6 + $0x1c8] sm:$0xff] %vm942_vm5, %v1319_v54  ;;  %v2842_v13 = vld [vmem:[#allocation2 + $0x68] sm:$0x3]  ;;  %v5118_v50 = vpop.permute.xlu1 %1632 }
 0x1bc   :  { %v2542_v27 = vadd.f32 %v2526_v58, %v2494_v15  ;;  %v2575_v1 = vmul.f32 0.27406862, %v2559_v52  ;;  %v2648_v24 = vrot.slane %v2611_v25, 1  ;;  %v2711_v26 = vrot.slane %v2597_v30, 2  ;;  %2808 = vrot.lane.b32.xlu0 %v5089_v28, %s3675_s14  ;;  %v2874_v15 = vld [vmem:[#allocation2 + $0x78] sm:$0x3]  ;;  %v5120_v0 = vpop.permute.xlu0 %1670 }
 0x1bd   :  { %v2747_v19 = vmul.f32 0.45186275, %v5102_v29  ;;  %v2712_v10 = vrot.slane %v2677_v22, 2  ;;  %v5112_v56 = vadd.f32 %v5060_v37, %v4553_v8  ;;  %v5116_v51 = vadd.f32 %v5073_v21, %v4599_v35  ;;  %v2923_v5 = vld [vmem:[#allocation2 + $0x88] sm:$0x3] }
 0x1be   :  { %v2590_v4 = vadd.f32 %v2574_v11, %v2541_v48  ;;  %v2591_v46 = vadd.f32 %v2575_v1, %v2542_v27  ;;  %v2649_v47 = vsel %vm740_vm3, %v2647_v3, %v2648_v24  ;;  %v5125_v52 = vmul.f32 0.27406862, %v5055_v2  ;;  %v2850_v20 = vld [vmem:[#allocation2 + $0x2e8] sm:$0x3]  ;;  %v2880_v63 = vld [vmem:[#allocation2 + $0x258] sm:$0x3] }
 0x1bf   :  { %2766 = vrot.lane.b32.xlu1 %v2747_v19, %s3674_s13  ;;  %v2857_v8 = vmul.f32 0.27406862, %v2841_v38  ;;  %v2858_v37 = vmul.f32 0.27406862, %v2842_v13  ;;  %v2669_v58 = vadd.f32 %v2649_v47, %v2597_v30  ;;  %v2713_v54 = vsel %vm805_vm4, %v2711_v26, %v2712_v10  ;;  %v5133_v38 = vld [vmem:[#allocation2 + $0x80] sm:$0xff]  ;;  %v5135_v30 = vpop.permute.xlu1 %1636 }
 0x1c0   :  { %5718 = vst [vmem:[#allocation25_spill] sm:$0xff] %v5125_v52  ;;  %v2599_v35 = vmul.f32 0.27406862, %v2590_v4  ;;  %v2614_v21 = vmul.f32 0.45186275, %v2590_v4  ;;  %2812 = vrot.lane.b32.xlu0 %v5125_v52, %s3675_s14  ;;  %v5137_v13 = vpop.permute.xlu0 %1674  ;;  %v2845_v4 = vld [vmem:[#allocation2 + $0x1a0] sm:$0xff]  ;;  %v5145_v52 = vadd.f32 %v5086_v61, %v4607_v34 }
 0x1c1   :  { %v2615_v11 = vmul.f32 0.45186275, %v2591_v46  ;;  %v2679_v25 = vmul.f32 0.27406862, %v2591_v46  ;;  %v2889_v22 = vmul.f32 0.45186275, %v4922_v57  ;;  %v5131_v3 = vadd.f32 %v2713_v54, %v2669_v58 }
 0x1c2   :  { %v2890_v48 = vmul.f32 0.45186275, %v2874_v15  ;;  %v2653_v2 = vrot.slane %v2614_v21, 1  ;;  %v2717_v1 = vrot.slane %v2599_v35, 2  ;;  %v2938_v10 = vmul.f32 0.27406862, %v5133_v38 }
 0x1c3   :  { %v2654_v27 = vrot.slane %v2615_v11, 1  ;;  %v2718_v19 = vrot.slane %v2679_v25, 2  ;;  %v2905_v24 = vadd.f32 %v2889_v22, %v2857_v8  ;;  %v2846_v46 = vld [vmem:[#allocation2 + $0x1a8] sm:$0x3]  ;;  %v2749_v57 = vmul.f32 0.45186275, %v5131_v3 }
 0x1c4   :  { %v2906_v26 = vadd.f32 %v2890_v48, %v2858_v37  ;;  %v2939_v47 = vmul.f32 0.27406862, %v2923_v5  ;;  %v1690_v58 = vadd.f32 %v1667_v59, %v1650_v55  ;;  %v2878_v21 = vld [vmem:[#allocation2 + $0x1b8] sm:$0x3]  ;;  %v5147_v37 = vld [vmem:[#allocation2 + $0x1c0] sm:$0xff]  ;;  %v5152_v55 = vpop.permute.xlu1 %1640 }
 0x1c5   :  { %v2655_v15 = vsel %vm740_vm3, %v2653_v2, %v2654_v27  ;;  %v2719_v54 = vsel %vm805_vm4, %v2717_v1, %v2718_v19  ;;  %v2954_v8 = vadd.f32 %v2938_v10, %v2905_v24  ;;  %v2927_v25 = vld [vmem:[#allocation2 + $0x1c8] sm:$0x3]  ;;  %2770 = vrot.lane.b32.xlu1 %v2749_v57, %s3674_s13  ;;  %v2861_v48 = vmul.f32 0.27406862, %v2845_v4 }
 0x1c6   :  { %v2671_v11 = vadd.f32 %v2655_v15, %v2599_v35  ;;  %v2955_v22 = vadd.f32 %v2939_v47, %v2906_v26  ;;  %1699 = vst.msk [vmem:[#allocation6 + $0x10] sm:$0xff] %vm942_vm5, %v1690_v58  ;;  %v2862_v5 = vmul.f32 0.27406862, %v2846_v46  ;;  %v2893_v59 = vmul.f32 0.45186275, %v4943_v23  ;;  %v5154_v35 = vpop.permute.xlu0 %1678  ;;  %v2849_v46 = vld [vmem:[#allocation2 + $0x2e0] sm:$0xff] }
 0x1c7   :  { %v2970_v34 = vmul.f32 0.27406862, %v2954_v8  ;;  %v2978_v61 = vmul.f32 0.45186275, %v2954_v8  ;;  %v2894_v27 = vmul.f32 0.45186275, %v2878_v21 }
 0x1c8   :  { %v2735_v2 = vadd.f32 %v2719_v54, %v2671_v11  ;;  %v2979_v1 = vmul.f32 0.45186275, %v2955_v22  ;;  %v3050_v19 = vmul.f32 0.27406862, %v2955_v22  ;;  %v2909_v24 = vadd.f32 %v2893_v59, %v2861_v48  ;;  %v5157_v41 = vpop.permute.xlu1 %1668  ;;  %v2882_v22 = vld [vmem:[#allocation2 + $0x2f8] sm:$0x3] }
 0x1c9   :  { %v2942_v10 = vmul.f32 0.27406862, %v5147_v37  ;;  %v3010_v57 = vrot.slane %v2978_v61, 1  ;;  %v3074_v15 = vrot.slane %v2970_v34, 2  ;;  %v2910_v4 = vadd.f32 %v2894_v27, %v2862_v5  ;;  %v2931_v27 = vld [vmem:[#allocation2 + $0x308] sm:$0x3] }
 0x1ca   :  { %v2751_v26 = vmul.f32 0.45186275, %v2735_v2  ;;  %v3011_v47 = vrot.slane %v2979_v1, 1  ;;  %v3075_v23 = vrot.slane %v3050_v19, 2  ;;  %v2943_v58 = vmul.f32 0.27406862, %v2927_v25  ;;  %v5159_v11 = vpop.permute.xlu0 %2004 }
 0x1cb   :  { %v2958_v28 = vadd.f32 %v2942_v10, %v2909_v24  ;;  %v5163_v21 = vmul.f32 0.27406862, %v5076_v53  ;;  %v5167_v54 = vadd.f32 %v5100_v39, %v4629_v14  ;;  %v5170_v8 = vmul.f32 0.27406862, %v5102_v29 }
 0x1cc   :  { %2774 = vrot.lane.b32.xlu1 %v2751_v26, %s3674_s13  ;;  %v1692_v25 = vadd.f32 %v5120_v0, %v5112_v56  ;;  %v3012_v48 = vsel %vm740_vm3, %v3010_v57, %v3011_v47  ;;  %v2959_v5 = vadd.f32 %v2943_v58, %v2910_v4  ;;  %v2865_v61 = vmul.f32 0.27406862, %v2849_v46  ;;  %v5178_v56 = vld [vmem:[#allocation2 + $0x300] sm:$0xff]  ;;  %v5180_v0 = vpop.permute.xlu1 %1672  ;;  %v2854_v4 = vld [vmem:[#allocation2 + $0x428] sm:$0x3] }
 0x1cd   :  { %5719 = vst [vmem:[#allocation13_spill] sm:$0xff] %v5163_v21  ;;  %5720 = vst [vmem:[#allocation19_spill] sm:$0xff] %v5170_v8  ;;  %v2972_v59 = vmul.f32 0.27406862, %v2958_v28  ;;  %v3042_v1 = vadd.f32 %v3012_v48, %v2970_v34  ;;  %v2982_v53 = vmul.f32 0.45186275, %v2958_v28  ;;  %v3076_v39 = vsel %vm805_vm4, %v3074_v15, %v3075_v23 }
 0x1ce   :  { %1701 = vst.msk [vmem:[#allocation6 + $0x90] sm:$0xff] %vm942_vm5, %v1692_v25  ;;  %v2866_v19 = vmul.f32 0.27406862, %v2850_v20  ;;  %v2897_v14 = vmul.f32 0.45186275, %v4980_v33  ;;  %v5182_v26 = vpop.permute.xlu0 %2008  ;;  %v2853_v33 = vld [vmem:[#allocation2 + $0x420] sm:$0xff] }
 0x1cf   :  { %v2983_v29 = vmul.f32 0.45186275, %v2959_v5  ;;  %v3052_v24 = vmul.f32 0.27406862, %v2959_v5  ;;  %v3080_v10 = vrot.slane %v2972_v59, 2  ;;  %v5186_v28 = vadd.f32 %v3076_v39, %v3042_v1 }
 0x1d0   :  { %2802 = vrot.lane.b32.xlu1 %v5163_v21, %s3675_s14  ;;  %v3016_v34 = vrot.slane %v2982_v53, 1  ;;  %v2898_v20 = vmul.f32 0.45186275, %v2882_v22  ;;  %v2913_v57 = vadd.f32 %v2897_v14, %v2865_v61  ;;  %v2946_v47 = vmul.f32 0.27406862, %v5178_v56 }
 0x1d1   :  { %v3017_v15 = vrot.slane %v2983_v29, 1  ;;  %v3081_v46 = vrot.slane %v3052_v24, 2  ;;  %v2947_v23 = vmul.f32 0.27406862, %v2931_v27  ;;  %v3122_v58 = vmul.f32 0.45186275, %v5186_v28  ;;  %v5198_v29 = vpop.permute.xlu1 %1676 }
 0x1d2   :  { %v5191_v25 = vmul.f32 0.27406862, %v5131_v3  ;;  %v2914_v48 = vadd.f32 %v2898_v20, %v2866_v19  ;;  %v1694_v5 = vadd.f32 %v5137_v13, %v5116_v51  ;;  %v2886_v1 = vld [vmem:[#allocation2 + $0x438] sm:$0x3]  ;;  %v2962_v61 = vadd.f32 %v2946_v47, %v2913_v57  ;;  %v2935_v39 = vld [vmem:[#allocation2 + $0x448] sm:$0x3]  ;;  %v5200_v27 = vpop.permute.xlu0 %2012 }
 0x1d3   :  { %v3018_v22 = vsel %vm740_vm3, %v3016_v34, %v3017_v15  ;;  %v5196_v53 = vmul.f32 0.27406862, %v2735_v2  ;;  %v2869_v14 = vmul.f32 0.27406862, %v2853_v33  ;;  %3138 = vrot.lane.b32.xlu0 %v3122_v58, %s3674_s13  ;;  %v2870_v51 = vmul.f32 0.27406862, %v2854_v4 }
 0x1d4   :  { %5721 = vst [vmem:[#allocation27_spill] sm:$0xff] %v5191_v25  ;;  %2806 = vrot.lane.b32.xlu1 %v5170_v8, %s3675_s14  ;;  %v3044_v3 = vadd.f32 %v3018_v22, %v2972_v59  ;;  %v2963_v19 = vadd.f32 %v2947_v23, %v2914_v48  ;;  %1703 = vst.msk [vmem:[#allocation6 + $0x110] sm:$0xff] %vm942_vm5, %v1694_v5  ;;  %v2901_v13 = vmul.f32 0.45186275, %v5002_v60  ;;  %v5207_v2 = vld [vmem:[#allocation2 + $0x440] sm:$0xff] }
 0x1d5   :  { %5722 = vst [vmem:[#allocation28_spill] sm:$0xff] %v5196_v53  ;;  %v2843_v24 = vld [vmem:[#allocation2 + $0x100] sm:$0xff]  ;;  %v3082_v34 = vsel %vm805_vm4, %v3080_v10, %v3081_v46  ;;  %v2974_v20 = vmul.f32 0.27406862, %v2962_v61  ;;  %v2986_v57 = vmul.f32 0.45186275, %v2962_v61  ;;  %v5213_v22 = vpop.permute.xlu1 %1680 }
 0x1d6   :  { %v2902_v33 = vmul.f32 0.45186275, %v2886_v1  ;;  %v5210_v15 = vadd.f32 %v3082_v34, %v3044_v3  ;;  %v2987_v47 = vmul.f32 0.45186275, %v2963_v19  ;;  %v3054_v58 = vmul.f32 0.27406862, %v2963_v19  ;;  %v5215_v21 = vpop.permute.xlu0 %2016 }
 0x1d7   :  { %v2917_v8 = vadd.f32 %v2901_v13, %v2869_v14  ;;  %v2844_v59 = vld [vmem:[#allocation2 + $0x108] sm:$0x3]  ;;  %v3022_v23 = vrot.slane %v2986_v57, 1  ;;  %v3086_v48 = vrot.slane %v2974_v20, 2  ;;  %v2950_v4 = vmul.f32 0.27406862, %v5207_v2 }
 0x1d8   :  { %v2918_v5 = vadd.f32 %v2902_v33, %v2870_v51  ;;  %v2876_v60 = vld [vmem:[#allocation2 + $0x118] sm:$0x3]  ;;  %v3124_v10 = vmul.f32 0.45186275, %v5210_v15  ;;  %2810 = vrot.lane.b32.xlu1 %v5191_v25, %s3675_s14  ;;  %v3023_v46 = vrot.slane %v2987_v47, 1  ;;  %v3087_v1 = vrot.slane %v3054_v58, 2 }
 0x1d9   :  { %v2951_v61 = vmul.f32 0.27406862, %v2935_v39  ;;  %v2966_v14 = vadd.f32 %v2950_v4, %v2917_v8  ;;  %v1696_v3 = vadd.f32 %v5154_v35, %v5145_v52  ;;  %v2859_v19 = vmul.f32 0.27406862, %v2843_v24  ;;  %v5222_v13 = vld [vmem:[#allocation2 + $0x120] sm:$0xff]  ;;  %v5229_v35 = vpop.permute.xlu1 %2006 }
 0x1da   :  { %v2860_v51 = vmul.f32 0.27406862, %v2844_v59  ;;  %3142 = vrot.lane.b32.xlu0 %v3124_v10, %s3674_s13  ;;  %v3024_v34 = vsel %vm740_vm3, %v3022_v23, %v3023_v46  ;;  %v3088_v57 = vsel %vm805_vm4, %v3086_v48, %v3087_v1  ;;  %v2891_v25 = vmul.f32 0.45186275, %v5030_v17  ;;  %v2925_v47 = vld [vmem:[#allocation2 + $0x128] sm:$0x3]  ;;  %v5231_v24 = vpop.permute.xlu0 %2044 }
 0x1db   :  { %v2967_v33 = vadd.f32 %v2951_v61, %v2918_v5  ;;  %v3220_v58 = vld [vmem:[#allocation2 + $0x78] sm:$0x3]  ;;  %v3046_v39 = vadd.f32 %v3024_v34, %v2974_v20  ;;  %v2976_v8 = vmul.f32 0.27406862, %v2966_v14  ;;  %v2990_v4 = vmul.f32 0.45186275, %v2966_v14 }
 0x1dc   :  { %1705 = vst.msk [vmem:[#allocation6 + $0x190] sm:$0xff] %vm942_vm5, %v1696_v3  ;;  %v2892_v52 = vmul.f32 0.45186275, %v2876_v60  ;;  %2814 = vrot.lane.b32.xlu1 %v5196_v53, %s3675_s14  ;;  %v2907_v48 = vadd.f32 %v2891_v25, %v2859_v19  ;;  %v2940_v17 = vmul.f32 0.27406862, %v5222_v13  ;;  %v1691_v25 = vadd.f32 %v5157_v41, %v5167_v54 }
 0x1dd   :  { %v2991_v59 = vmul.f32 0.45186275, %v2967_v33  ;;  %v3056_v23 = vmul.f32 0.27406862, %v2967_v33  ;;  %v5236_v5 = vadd.f32 %v3088_v57, %v3046_v39  ;;  %v3028_v20 = vrot.slane %v2990_v4, 1  ;;  %v5242_v19 = vpop.permute.xlu1 %2010  ;;  %v3300_v4 = vld [vmem:[#allocation2 + $0x90] sm:$0xff] }
 0x1de   :  { %v3092_v10 = vrot.slane %v2976_v8, 2  ;;  %v2908_v46 = vadd.f32 %v2892_v52, %v2860_v51  ;;  %v2941_v60 = vmul.f32 0.27406862, %v2925_v47  ;;  %v2956_v14 = vadd.f32 %v2940_v17, %v2907_v48  ;;  %v3252_v3 = vld [vmem:[#allocation2 + $0x88] sm:$0x3]  ;;  %v5244_v57 = vpop.permute.xlu0 %2048  ;;  %1700 = vst.msk [vmem:[#allocation6 + $0x50] sm:$0xff] %vm942_vm5, %v1691_v25 }
 0x1df   :  { %v3029_v1 = vrot.slane %v2991_v59, 1  ;;  %v3093_v61 = vrot.slane %v3056_v23, 2  ;;  %v3126_v34 = vmul.f32 0.45186275, %v5236_v5  ;;  %v3236_v9 = vmul.f32 0.27406862, %v3220_v58 }
 0x1e0   :  { %v3267_v53 = vmul.f32 0.45186275, %v5133_v38  ;;  %v5248_v51 = vadd.f32 %v5118_v50, %v4639_v31  ;;  %v2957_v47 = vadd.f32 %v2941_v60, %v2908_v46  ;;  %v2971_v39 = vmul.f32 0.27406862, %v2956_v14  ;;  %v3301_v52 = vld [vmem:[#allocation2 + $0x98] sm:$0x3] }
 0x1e1   :  { %v3030_v33 = vsel %vm740_vm3, %v3028_v20, %v3029_v1  ;;  %v2847_v58 = vld [vmem:[#allocation2 + $0x240] sm:$0xff]  ;;  %3146 = vrot.lane.b32.xlu0 %v3126_v34, %s3674_s13  ;;  %v2980_v59 = vmul.f32 0.45186275, %v2956_v14  ;;  %v3268_v41 = vmul.f32 0.45186275, %v3252_v3  ;;  %v3094_v31 = vsel %vm805_vm4, %v3092_v10, %v3093_v61  ;;  %v5257_v34 = vpop.permute.xlu1 %2014 }
 0x1e2   :  { %v3048_v38 = vadd.f32 %v3030_v33, %v2976_v8  ;;  %v3283_v54 = vadd.f32 %v3267_v53, %v4948_v32  ;;  %v2848_v23 = vld [vmem:[#allocation2 + $0x248] sm:$0x3]  ;;  %v2981_v50 = vmul.f32 0.45186275, %v2957_v47  ;;  %v3051_v48 = vmul.f32 0.27406862, %v2957_v47  ;;  %v5259_v8 = vpop.permute.xlu0 %2052 }
 0x1e3   :  { %v3077_v17 = vrot.slane %v2971_v39, 2  ;;  %v3013_v46 = vrot.slane %v2980_v59, 1  ;;  %v3284_v1 = vadd.f32 %v3268_v41, %v3236_v9  ;;  %v3316_v60 = vmul.f32 0.27406862, %v3300_v4  ;;  %v5263_v47 = vld [vmem:[#allocation2 + $0x260] sm:$0xff] }
 0x1e4   :  { %v5255_v20 = vadd.f32 %v3094_v31, %v3048_v38  ;;  %v3014_v14 = vrot.slane %v2981_v50, 1  ;;  %v3078_v32 = vrot.slane %v3051_v48, 2  ;;  %v3317_v53 = vmul.f32 0.27406862, %v3301_v52  ;;  %v2929_v41 = vld [vmem:[#allocation2 + $0x268] sm:$0x3] }
 0x1e5   :  { %v2863_v3 = vmul.f32 0.27406862, %v2847_v58  ;;  %v3332_v10 = vadd.f32 %v3316_v60, %v3283_v54  ;;  %v2864_v61 = vmul.f32 0.27406862, %v2848_v23  ;;  %v2895_v33 = vmul.f32 0.45186275, %v5052_v6  ;;  %v5268_v23 = vpop.permute.xlu1 %2018 }
 0x1e6   :  { %v3128_v25 = vmul.f32 0.45186275, %v5255_v20  ;;  %v3015_v9 = vsel %vm740_vm3, %v3013_v46, %v3014_v14  ;;  %v3079_v4 = vsel %vm805_vm4, %v3077_v17, %v3078_v32  ;;  %v3333_v38 = vadd.f32 %v3317_v53, %v3284_v1  ;;  %v3224_v31 = vld [vmem:[#allocation2 + $0x1b8] sm:$0x3]  ;;  %v3256_v54 = vld [vmem:[#allocation2 + $0x1c8] sm:$0x3]  ;;  %v5270_v6 = vpop.permute.xlu0 %2056 }
 0x1e7   :  { %v2896_v59 = vmul.f32 0.45186275, %v2880_v63  ;;  %v3043_v52 = vadd.f32 %v3015_v9, %v2971_v39  ;;  %v3348_v58 = vmul.f32 0.27406862, %v3332_v10  ;;  %v3356_v50 = vmul.f32 0.45186275, %v3332_v10 }
 0x1e8   :  { %3150 = vrot.lane.b32.xlu0 %v3128_v25, %s3674_s13  ;;  %v2911_v48 = vadd.f32 %v2895_v33, %v2863_v3  ;;  %v3357_v60 = vmul.f32 0.45186275, %v3333_v38  ;;  %v3428_v16 = vmul.f32 0.27406862, %v3333_v38  ;;  %v2944_v17 = vmul.f32 0.27406862, %v5263_v47 }
 0x1e9   :  { %v2912_v46 = vadd.f32 %v2896_v59, %v2864_v61  ;;  %v5273_v1 = vadd.f32 %v3079_v4, %v3043_v52  ;;  %v3388_v63 = vrot.slane %v3356_v50, 1  ;;  %v3452_v14 = vrot.slane %v3348_v58, 2  ;;  %v3304_v3 = vld [vmem:[#allocation2 + $0x1d0] sm:$0xff]  ;;  %v5277_v38 = vpop.permute.xlu1 %2046 }
 0x1ea   :  { %v2945_v32 = vmul.f32 0.27406862, %v2929_v41  ;;  %v3389_v53 = vrot.slane %v3357_v60, 1  ;;  %v3453_v39 = vrot.slane %v3428_v16, 2  ;;  %v2960_v25 = vadd.f32 %v2944_v17, %v2911_v48  ;;  %v5279_v61 = vpop.permute.xlu0 %2382  ;;  %v3305_v16 = vld [vmem:[#allocation2 + $0x1d8] sm:$0x3] }
 0x1eb   :  { %5723 = vst [vmem:[#allocation29_spill] sm:$0xff] %v5273_v1  ;;  %v3240_v10 = vmul.f32 0.27406862, %v3224_v31  ;;  %v3123_v33 = vmul.f32 0.45186275, %v5273_v1  ;;  %5724 = vst [vmem:[#allocation30_spill] sm:$0xff] %v5279_v61 }
 0x1ec   :  { %v2961_v9 = vadd.f32 %v2945_v32, %v2912_v46  ;;  %v3271_v43 = vmul.f32 0.45186275, %v5147_v37  ;;  %v3272_v7 = vmul.f32 0.45186275, %v3256_v54  ;;  %v3390_v4 = vsel %vm740_vm3, %v3388_v63, %v3389_v53  ;;  %v2851_v37 = vld [vmem:[#allocation2 + $0x380] sm:$0xff] }
 0x1ed   :  { %v3454_v59 = vsel %vm805_vm4, %v3452_v14, %v3453_v39  ;;  %v2973_v41 = vmul.f32 0.27406862, %v2960_v25  ;;  %v2984_v52 = vmul.f32 0.45186275, %v2960_v25  ;;  %3140 = vrot.lane.b32.xlu1 %v3123_v33, %s3674_s13  ;;  %v3420_v31 = vadd.f32 %v3390_v4, %v3348_v58  ;;  %v2852_v39 = vld [vmem:[#allocation2 + $0x388] sm:$0x3]  ;;  %v5287_v25 = vpop.permute.xlu1 %2050 }
 0x1ee   :  { %v2985_v50 = vmul.f32 0.45186275, %v2961_v9  ;;  %v3053_v48 = vmul.f32 0.27406862, %v2961_v9  ;;  %v3287_v60 = vadd.f32 %v3271_v43, %v4960_v45  ;;  %v3288_v17 = vadd.f32 %v3272_v7, %v3240_v10  ;;  %v5289_v61 = vpop.permute.xlu0 %2386  ;;  %v2884_v7 = vld [vmem:[#allocation2 + $0x398] sm:$0x3] }
 0x1ef   :  { %v3019_v54 = vrot.slane %v2984_v52, 1  ;;  %v3083_v46 = vrot.slane %v2973_v41, 2  ;;  %v3320_v32 = vmul.f32 0.27406862, %v3304_v3  ;;  %v5285_v1 = vadd.f32 %v3454_v59, %v3420_v31  ;;  %v2933_v59 = vld [vmem:[#allocation2 + $0x3a8] sm:$0x3] }
 0x1f0   :  { %v3020_v63 = vrot.slane %v2985_v50, 1  ;;  %v3084_v53 = vrot.slane %v3053_v48, 2  ;;  %v3321_v14 = vmul.f32 0.27406862, %v3305_v16  ;;  %v1655_v58 = vadd.f32 %v5135_v30, %v4644_v12  ;;  %v3227_v52 = vld [vmem:[#allocation2 + $0x2f0] sm:$0xff]  ;;  %v5299_v30 = vld [vmem:[#allocation2 + $0x3a0] sm:$0xff] }
 0x1f1   :  { %v3336_v33 = vadd.f32 %v3320_v32, %v3287_v60  ;;  %v1693_v43 = vadd.f32 %v5180_v0, %v5248_v51  ;;  %v2867_v45 = vmul.f32 0.27406862, %v2851_v37  ;;  %v3500_v10 = vmul.f32 0.45186275, %v5285_v1  ;;  %v3228_v0 = vld [vmem:[#allocation2 + $0x2f8] sm:$0x3] }
 0x1f2   :  { %v3021_v3 = vsel %vm740_vm3, %v3019_v54, %v3020_v63  ;;  %v3085_v9 = vsel %vm805_vm4, %v3083_v46, %v3084_v53  ;;  %v3337_v4 = vadd.f32 %v3321_v14, %v3288_v17  ;;  %v2868_v12 = vmul.f32 0.27406862, %v2852_v39  ;;  %v5304_v54 = vpop.permute.xlu1 %2054  ;;  %v5306_v46 = vpop.permute.xlu0 %2390  ;;  %v3260_v53 = vld [vmem:[#allocation2 + $0x308] sm:$0x3] }
 0x1f3   :  { %v3045_v16 = vadd.f32 %v3021_v3, %v2973_v41  ;;  %v3350_v31 = vmul.f32 0.27406862, %v3336_v33  ;;  %v3360_v50 = vmul.f32 0.45186275, %v3336_v33  ;;  %1702 = vst.msk [vmem:[#allocation6 + $0xd0] sm:$0xff] %vm942_vm5, %v1693_v43  ;;  %3516 = vrot.lane.b32.xlu0 %v3500_v10, %s3674_s13  ;;  %v1695_v37 = vadd.f32 %v5198_v29, %v1655_v58  ;;  %5725 = vst [vmem:[#allocation31_spill] sm:$0xff] %v5306_v46 }
 0x1f4   :  { %v3361_v51 = vmul.f32 0.45186275, %v3337_v4  ;;  %v3430_v48 = vmul.f32 0.27406862, %v3337_v4  ;;  %v2899_v60 = vmul.f32 0.45186275, %v5070_v40 }
 0x1f5   :  { %v5308_v41 = vadd.f32 %v3085_v9, %v3045_v16  ;;  %v3394_v17 = vrot.slane %v3360_v50, 1  ;;  %v3458_v32 = vrot.slane %v3350_v31, 2  ;;  %v2900_v63 = vmul.f32 0.45186275, %v2884_v7  ;;  %v3308_v10 = vld [vmem:[#allocation2 + $0x310] sm:$0xff]  ;;  %1704 = vst.msk [vmem:[#allocation6 + $0x150] sm:$0xff] %vm942_vm5, %v1695_v37 }
 0x1f6   :  { %v3395_v14 = vrot.slane %v3361_v51, 1  ;;  %v3459_v39 = vrot.slane %v3430_v48, 2  ;;  %v2915_v33 = vadd.f32 %v2899_v60, %v2867_v45  ;;  %v2948_v43 = vmul.f32 0.27406862, %v5299_v30  ;;  %v3309_v50 = vld [vmem:[#allocation2 + $0x318] sm:$0x3]  ;;  %v5318_v45 = vpop.permute.xlu1 %2058  ;;  %v5320_v51 = vpop.permute.xlu0 %2394 }
 0x1f7   :  { %5726 = vst [vmem:[#allocation32_spill] sm:$0xff] %v5308_v41  ;;  %v3125_v40 = vmul.f32 0.45186275, %v5308_v41  ;;  %v2916_v29 = vadd.f32 %v2900_v63, %v2868_v12  ;;  %v2949_v58 = vmul.f32 0.27406862, %v2933_v59  ;;  %v5315_v9 = vadd.f32 %v5152_v55, %v4671_v49  ;;  %5727 = vst [vmem:[#allocation33_spill] sm:$0xff] %v5320_v51 }
 0x1f8   :  { %v3243_v3 = vmul.f32 0.27406862, %v3227_v52  ;;  %v3396_v7 = vsel %vm740_vm3, %v3394_v17, %v3395_v14  ;;  %v2964_v4 = vadd.f32 %v2948_v43, %v2915_v33  ;;  %v3244_v16 = vmul.f32 0.27406862, %v3228_v0  ;;  %v2855_v12 = vld [vmem:[#allocation2 + $0x4c0] sm:$0xff] }
 0x1f9   :  { %3144 = vrot.lane.b32.xlu1 %v3125_v40, %s3674_s13  ;;  %v3422_v48 = vadd.f32 %v3396_v7, %v3350_v31  ;;  %v2965_v60 = vadd.f32 %v2949_v58, %v2916_v29  ;;  %v3275_v59 = vmul.f32 0.45186275, %v5178_v56  ;;  %v3276_v52 = vmul.f32 0.45186275, %v3260_v53  ;;  %v2856_v43 = vld [vmem:[#allocation2 + $0x4c8] sm:$0x3] }
 0x1fa   :  { %v3460_v49 = vsel %vm805_vm4, %v3458_v32, %v3459_v39  ;;  %v2975_v55 = vmul.f32 0.27406862, %v2964_v4  ;;  %v2988_v37 = vmul.f32 0.45186275, %v2964_v4  ;;  %v3324_v17 = vmul.f32 0.27406862, %v3308_v10  ;;  %v5329_v56 = vpop.permute.xlu0 %2422 }
 0x1fb   :  { %v5325_v63 = vadd.f32 %v3460_v49, %v3422_v48  ;;  %v2989_v0 = vmul.f32 0.45186275, %v2965_v60  ;;  %v3055_v14 = vmul.f32 0.27406862, %v2965_v60  ;;  %v3291_v33 = vadd.f32 %v3275_v59, %v3243_v3  ;;  %v5327_v29 = vld [vmem:[#allocation2 + $0x4e0] sm:$0xff]  ;;  %5728 = vst [vmem:[#allocation34_spill] sm:$0xff] %v5329_v56  ;;  %v5333_v49 = vpop.permute.xlu1 %2384 }
 0x1fc   :  { %v3025_v41 = vrot.slane %v2988_v37, 1  ;;  %v3089_v51 = vrot.slane %v2975_v55, 2  ;;  %v3292_v40 = vadd.f32 %v3276_v52, %v3244_v16  ;;  %v3325_v31 = vmul.f32 0.27406862, %v3309_v50  ;;  %v2888_v10 = vld [vmem:[#allocation2 + $0x4d8] sm:$0x3] }
 0x1fd   :  { %v3502_v53 = vmul.f32 0.45186275, %v5325_v63  ;;  %v3026_v32 = vrot.slane %v2989_v0, 1  ;;  %v3090_v39 = vrot.slane %v3055_v14, 2  ;;  %v3340_v58 = vadd.f32 %v3324_v17, %v3291_v33  ;;  %v2937_v60 = vld [vmem:[#allocation2 + $0x4e8] sm:$0x3] }
 0x1fe   :  { %v3341_v7 = vadd.f32 %v3325_v31, %v3292_v40  ;;  %v2871_v4 = vmul.f32 0.27406862, %v2855_v12  ;;  %v2872_v48 = vmul.f32 0.27406862, %v2856_v43  ;;  %v2903_v3 = vmul.f32 0.45186275, %v5091_v44 }
 0x1ff   :  { %v3231_v59 = vld [vmem:[#allocation2 + $0x430] sm:$0xff]  ;;  %5729 = vst [vmem:[#allocation35_spill] sm:$0xff] %v5333_v49  ;;  %3520 = vrot.lane.b32.xlu0 %v3502_v53, %s3674_s13  ;;  %v3027_v16 = vsel %vm740_vm3, %v3025_v41, %v3026_v32  ;;  %v3091_v50 = vsel %vm805_vm4, %v3089_v51, %v3090_v39  ;;  %v3352_v52 = vmul.f32 0.27406862, %v3340_v58  ;;  %v3364_v37 = vmul.f32 0.45186275, %v3340_v58  ;;  %v5339_v49 = vpop.permute.xlu0 %2426 }
 0x200   :  { %v3232_v0 = vld [vmem:[#allocation2 + $0x438] sm:$0x3]  ;;  %v3047_v17 = vadd.f32 %v3027_v16, %v2975_v55  ;;  %v3365_v14 = vmul.f32 0.45186275, %v3341_v7  ;;  %v3432_v33 = vmul.f32 0.27406862, %v3341_v7  ;;  %v2919_v44 = vadd.f32 %v2903_v3, %v2871_v4 }
 0x201   :  { %v2904_v12 = vmul.f32 0.45186275, %v2888_v10  ;;  %v3400_v43 = vrot.slane %v3364_v37, 1  ;;  %v3464_v40 = vrot.slane %v3352_v52, 2  ;;  %v2952_v31 = vmul.f32 0.27406862, %v5327_v29 }
 0x202   :  { %v3312_v56 = vld [vmem:[#allocation2 + $0x450] sm:$0xff]  ;;  %5730 = vst [vmem:[#allocation36_spill] sm:$0xff] %v5339_v49  ;;  %v5341_v53 = vadd.f32 %v3091_v50, %v3047_v17  ;;  %v3401_v41 = vrot.slane %v3365_v14, 1  ;;  %v3465_v32 = vrot.slane %v3432_v33, 2  ;;  %v3264_v39 = vld [vmem:[#allocation2 + $0x448] sm:$0x3]  ;;  %v5347_v49 = vpop.permute.xlu1 %2388 }
 0x203   :  { %v2920_v51 = vadd.f32 %v2904_v12, %v2872_v48  ;;  %v3313_v58 = vld [vmem:[#allocation2 + $0x458] sm:$0x3]  ;;  %v2953_v46 = vmul.f32 0.27406862, %v2937_v60  ;;  %v2968_v55 = vadd.f32 %v2952_v31, %v2919_v44  ;;  %v3247_v16 = vmul.f32 0.27406862, %v3231_v59 }
 0x204   :  { %v3248_v7 = vmul.f32 0.27406862, %v3232_v0  ;;  %v3127_v10 = vmul.f32 0.45186275, %v5341_v53  ;;  %v3402_v4 = vsel %vm740_vm3, %v3400_v43, %v3401_v41  ;;  %v3466_v3 = vsel %vm805_vm4, %v3464_v40, %v3465_v32  ;;  %v3221_v40 = vld [vmem:[#allocation2 + $0x110] sm:$0xff]  ;;  %v5352_v41 = vpop.permute.xlu0 %2430 }
 0x205   :  { %v3279_v37 = vmul.f32 0.45186275, %v5207_v2  ;;  %v3424_v50 = vadd.f32 %v3402_v4, %v3352_v52  ;;  %v2969_v17 = vadd.f32 %v2953_v46, %v2920_v51  ;;  %v2977_v14 = vmul.f32 0.27406862, %v2968_v55  ;;  %v3222_v51 = vld [vmem:[#allocation2 + $0x118] sm:$0x3] }
 0x206   :  { %v2992_v48 = vmul.f32 0.45186275, %v2968_v55  ;;  %3148 = vrot.lane.b32.xlu1 %v3127_v10, %s3674_s13  ;;  %v3280_v60 = vmul.f32 0.45186275, %v3264_v39  ;;  %v3328_v59 = vmul.f32 0.27406862, %v3312_v56  ;;  %v1697_v46 = vadd.f32 %v5213_v22, %v5315_v9 }
 0x207   :  { %v3295_v33 = vadd.f32 %v3279_v37, %v3247_v16  ;;  %v3329_v0 = vmul.f32 0.27406862, %v3313_v58  ;;  %v5350_v12 = vadd.f32 %v3466_v3, %v3424_v50  ;;  %v2993_v44 = vmul.f32 0.45186275, %v2969_v17  ;;  %v3302_v55 = vld [vmem:[#allocation2 + $0x130] sm:$0xff]  ;;  %v5731_v39 = vld [vmem:[#allocation14_spill] sm:$0xff] }
 0x208   :  { %v3031_v43 = vrot.slane %v2992_v48, 1  ;;  %v3057_v31 = vmul.f32 0.27406862, %v2969_v17  ;;  %v3095_v2 = vrot.slane %v2977_v14, 2  ;;  %v3296_v32 = vadd.f32 %v3280_v60, %v3248_v7  ;;  %v3254_v4 = vld [vmem:[#allocation2 + $0x128] sm:$0x3]  ;;  %v5360_v17 = vpop.permute.xlu1 %2392 }
 0x209   :  { %v3344_v52 = vadd.f32 %v3328_v59, %v3295_v33  ;;  %v2028_v56 = vadd.f32 %v5159_v11, %v5731_v39  ;;  %v3504_v58 = vmul.f32 0.45186275, %v5350_v12  ;;  %v3032_v16 = vrot.slane %v2993_v44, 1  ;;  %1706 = vst.msk [vmem:[#allocation6 + $0x1d0] sm:$0xff] %vm942_vm5, %v1697_v46  ;;  %v3303_v60 = vld [vmem:[#allocation2 + $0x138] sm:$0x3]  ;;  %v5366_v46 = vpop.permute.xlu0 %2434 }
 0x20a   :  { %v3096_v10 = vrot.slane %v3057_v31, 2  ;;  %v3345_v3 = vadd.f32 %v3329_v0, %v3296_v32  ;;  %v3237_v7 = vmul.f32 0.27406862, %v3221_v40  ;;  %v3238_v11 = vmul.f32 0.27406862, %v3222_v51 }
 0x20b   :  { %v3354_v37 = vmul.f32 0.27406862, %v3344_v52  ;;  %v3368_v50 = vmul.f32 0.45186275, %v3344_v52  ;;  %3524 = vrot.lane.b32.xlu0 %v3504_v58, %s3674_s13  ;;  %v3033_v22 = vsel %vm740_vm3, %v3031_v43, %v3032_v16  ;;  %v3269_v48 = vmul.f32 0.45186275, %v5222_v13 }
 0x20c   :  { %v3097_v9 = vsel %vm805_vm4, %v3095_v2, %v3096_v10  ;;  %v3049_v33 = vadd.f32 %v3033_v22, %v2977_v14  ;;  %v3369_v59 = vmul.f32 0.45186275, %v3345_v3  ;;  %v3434_v44 = vmul.f32 0.27406862, %v3345_v3  ;;  %v5732_v2 = vld [vmem:[#allocation22_spill] sm:$0xff]  ;;  %v3225_v14 = vld [vmem:[#allocation2 + $0x250] sm:$0xff] }
 0x20d   :  { %v3406_v0 = vrot.slane %v3368_v50, 1  ;;  %v3470_v31 = vrot.slane %v3354_v37, 2  ;;  %v3270_v32 = vmul.f32 0.45186275, %v3254_v4  ;;  %v3285_v52 = vadd.f32 %v3269_v48, %v3237_v7  ;;  %v3226_v22 = vld [vmem:[#allocation2 + $0x258] sm:$0x3] }
 0x20e   :  { %v3318_v40 = vmul.f32 0.27406862, %v3302_v55  ;;  %v5368_v39 = vadd.f32 %v3097_v9, %v3049_v33  ;;  %v3407_v58 = vrot.slane %v3369_v59, 1  ;;  %v3471_v43 = vrot.slane %v3434_v44, 2  ;;  %v5733_v50 = vld [vmem:[#allocation21_spill] sm:$0xff]  ;;  %v3306_v48 = vld [vmem:[#allocation2 + $0x270] sm:$0xff] }
 0x20f   :  { %v3319_v16 = vmul.f32 0.27406862, %v3303_v60  ;;  %v2030_v51 = vadd.f32 %v5182_v26, %v5732_v2  ;;  %v3286_v13 = vadd.f32 %v3270_v32, %v3238_v11  ;;  %v5374_v3 = vadd.f32 %v5200_v27, %v5733_v50  ;;  %v3258_v9 = vld [vmem:[#allocation2 + $0x268] sm:$0x3]  ;;  %v5379_v60 = vpop.permute.xlu1 %2396  ;;  %v3307_v44 = vld [vmem:[#allocation2 + $0x278] sm:$0x3] }
 0x210   :  { %v3334_v10 = vadd.f32 %v3318_v40, %v3285_v52  ;;  %v3129_v55 = vmul.f32 0.45186275, %v5368_v39  ;;  %v3408_v4 = vsel %vm740_vm3, %v3406_v0, %v3407_v58  ;;  %v2068_v7 = vadd.f32 %v5231_v24, %v2028_v56  ;;  %v3230_v24 = vld [vmem:[#allocation2 + $0x398] sm:$0x3] }
 0x211   :  { %v3426_v33 = vadd.f32 %v3408_v4, %v3354_v37  ;;  %v3335_v26 = vadd.f32 %v3319_v16, %v3286_v13  ;;  %v3472_v27 = vsel %vm805_vm4, %v3470_v31, %v3471_v43  ;;  %v3241_v32 = vmul.f32 0.27406862, %v3225_v14  ;;  %v5387_v16 = vpop.permute.xlu0 %2760 }
 0x212   :  { %v3349_v11 = vmul.f32 0.27406862, %v3334_v10  ;;  %v3358_v59 = vmul.f32 0.45186275, %v3334_v10  ;;  %3152 = vrot.lane.b32.xlu1 %v3129_v55, %s3674_s13  ;;  %2077 = vst.msk [vmem:[#allocation6 + $0x18] sm:$0xff] %vm942_vm5, %v2068_v7  ;;  %v3229_v55 = vld [vmem:[#allocation2 + $0x390] sm:$0xff] }
 0x213   :  { %v3242_v52 = vmul.f32 0.27406862, %v3226_v22  ;;  %v3273_v0 = vmul.f32 0.45186275, %v5263_v47  ;;  %v5385_v56 = vadd.f32 %v3472_v27, %v3426_v33  ;;  %v3359_v40 = vmul.f32 0.45186275, %v3335_v26  ;;  %v5394_v27 = vpop.permute.xlu1 %2424 }
 0x214   :  { %v3391_v58 = vrot.slane %v3358_v59, 1  ;;  %v3429_v37 = vmul.f32 0.27406862, %v3335_v26  ;;  %v3455_v2 = vrot.slane %v3349_v11, 2  ;;  %v3274_v13 = vmul.f32 0.45186275, %v3258_v9 }
 0x215   :  { %v3289_v10 = vadd.f32 %v3273_v0, %v3241_v32  ;;  %v3322_v50 = vmul.f32 0.27406862, %v3306_v48  ;;  %v3506_v31 = vmul.f32 0.45186275, %v5385_v56  ;;  %v3392_v43 = vrot.slane %v3359_v40, 1  ;;  %v3310_v59 = vld [vmem:[#allocation2 + $0x3b0] sm:$0xff] }
 0x216   :  { %v3456_v14 = vrot.slane %v3429_v37, 2  ;;  %v3323_v22 = vmul.f32 0.27406862, %v3307_v44  ;;  %v5391_v47 = vmul.f32 0.27406862, %v5186_v28  ;;  %v3290_v4 = vadd.f32 %v3274_v13, %v3242_v52 }
 0x217   :  { %v3338_v7 = vadd.f32 %v3322_v50, %v3289_v10  ;;  %v2070_v33 = vadd.f32 %v5244_v57, %v2030_v51  ;;  %v3262_v26 = vld [vmem:[#allocation2 + $0x3a8] sm:$0x3]  ;;  %3528 = vrot.lane.b32.xlu0 %v3506_v31, %s3674_s13  ;;  %v3393_v9 = vsel %vm740_vm3, %v3391_v58, %v3392_v43  ;;  %v5399_v48 = vmul.f32 0.27406862, %v5210_v15  ;;  %v3311_v57 = vld [vmem:[#allocation2 + $0x3b8] sm:$0x3]  ;;  %v5404_v50 = vpop.permute.xlu0 %2764 }
 0x218   :  { %v3245_v32 = vmul.f32 0.27406862, %v3229_v55  ;;  %v3246_v44 = vmul.f32 0.27406862, %v3230_v24  ;;  %v3421_v0 = vadd.f32 %v3393_v9, %v3349_v11  ;;  %v3339_v28 = vadd.f32 %v3323_v22, %v3290_v4  ;;  %v3233_v11 = vld [vmem:[#allocation2 + $0x4d0] sm:$0xff] }
 0x219   :  { %v3351_v40 = vmul.f32 0.27406862, %v3338_v7  ;;  %v3362_v52 = vmul.f32 0.45186275, %v3338_v7  ;;  %2079 = vst.msk [vmem:[#allocation6 + $0x98] sm:$0xff] %vm942_vm5, %v2070_v33  ;;  %v3457_v51 = vsel %vm805_vm4, %v3455_v2, %v3456_v14 }
 0x21a   :  { %v3277_v37 = vmul.f32 0.45186275, %v5299_v30  ;;  %v3278_v13 = vmul.f32 0.45186275, %v3262_v26  ;;  %v3326_v10 = vmul.f32 0.27406862, %v3310_v59  ;;  %v5406_v58 = vadd.f32 %v3457_v51, %v3421_v0  ;;  %v5414_v26 = vpop.permute.xlu1 %2428 }
 0x21b   :  { %v3363_v15 = vmul.f32 0.45186275, %v3339_v28  ;;  %v3397_v55 = vrot.slane %v3362_v52, 1  ;;  %v3431_v24 = vmul.f32 0.27406862, %v3339_v28  ;;  %3178 = vrot.lane.b32.xlu0 %v5391_v47, %s3675_s14  ;;  %v3461_v31 = vrot.slane %v3351_v40, 2 }
 0x21c   :  { %v3293_v43 = vadd.f32 %v3277_v37, %v3245_v32  ;;  %v3294_v22 = vadd.f32 %v3278_v13, %v3246_v44  ;;  %v3327_v4 = vmul.f32 0.27406862, %v3311_v57  ;;  %v3234_v2 = vld [vmem:[#allocation2 + $0x4d8] sm:$0x3]  ;;  %v3501_v30 = vmul.f32 0.45186275, %v5406_v58 }
 0x21d   :  { %v3398_v14 = vrot.slane %v3363_v15, 1  ;;  %v3462_v7 = vrot.slane %v3431_v24, 2  ;;  %v5412_v33 = vmul.f32 0.27406862, %v5236_v5  ;;  %v2072_v0 = vadd.f32 %v5259_v8, %v5374_v3  ;;  %v3266_v52 = vld [vmem:[#allocation2 + $0x4e8] sm:$0x3]  ;;  %v5425_v3 = vpop.permute.xlu0 %2768 }
 0x21e   :  { %v3342_v59 = vadd.f32 %v3326_v10, %v3293_v43  ;;  %v3343_v9 = vadd.f32 %v3327_v4, %v3294_v22  ;;  %v3249_v28 = vmul.f32 0.27406862, %v3233_v11  ;;  %v3314_v32 = vld [vmem:[#allocation2 + $0x4f0] sm:$0xff]  ;;  %3518 = vrot.lane.b32.xlu1 %v3501_v30, %s3674_s13  ;;  %v3250_v51 = vmul.f32 0.27406862, %v3234_v2 }
 0x21f   :  { %v3399_v44 = vsel %vm740_vm3, %v3397_v55, %v3398_v14  ;;  %v3463_v57 = vsel %vm805_vm4, %v3461_v31, %v3462_v7  ;;  %v3281_v5 = vmul.f32 0.45186275, %v5327_v29  ;;  %v3315_v37 = vld [vmem:[#allocation2 + $0x4f8] sm:$0x3]  ;;  %3182 = vrot.lane.b32.xlu0 %v5399_v48, %s3675_s14  ;;  %2081 = vst.msk [vmem:[#allocation6 + $0x118] sm:$0xff] %vm942_vm5, %v2072_v0  ;;  %v5429_v7 = vpop.permute.xlu1 %2432 }
 0x220   :  { %v3423_v13 = vadd.f32 %v3399_v44, %v3351_v40  ;;  %v3353_v10 = vmul.f32 0.27406862, %v3342_v59  ;;  %v3366_v15 = vmul.f32 0.45186275, %v3342_v59  ;;  %v3367_v8 = vmul.f32 0.45186275, %v3343_v9 }
 0x221   :  { %v3433_v24 = vmul.f32 0.27406862, %v3343_v9  ;;  %v3282_v11 = vmul.f32 0.45186275, %v3266_v52  ;;  %v3297_v55 = vadd.f32 %v3281_v5, %v3249_v28  ;;  %v3330_v43 = vmul.f32 0.27406862, %v3314_v32 }
 0x222   :  { %v5427_v31 = vadd.f32 %v3463_v57, %v3423_v13  ;;  %v3403_v22 = vrot.slane %v3366_v15, 1  ;;  %v3404_v29 = vrot.slane %v3367_v8, 1  ;;  %v3467_v4 = vrot.slane %v3353_v10, 2  ;;  %v5734_v59 = vld [vmem:[#allocation20_spill] sm:$0xff]  ;;  %v5735_v28 = vld [vmem:[#allocation10_spill] sm:$0xff]  ;;  %v5445_v15 = vpop.permute.xlu0 %2772 }
 0x223   :  { %v3468_v40 = vrot.slane %v3433_v24, 2  ;;  %v3298_v2 = vadd.f32 %v3282_v11, %v3250_v51  ;;  %v3331_v30 = vmul.f32 0.27406862, %v3315_v37  ;;  %v3346_v14 = vadd.f32 %v3330_v43, %v3297_v55  ;;  %3186 = vrot.lane.b32.xlu0 %v5412_v33, %s3675_s14 }
 0x224   :  { %v2034_v0 = vadd.f32 %v5215_v21, %v5734_v59  ;;  %v3503_v44 = vmul.f32 0.45186275, %v5427_v31  ;;  %v3405_v9 = vsel %vm740_vm3, %v3403_v22, %v3404_v29  ;;  %v2029_v52 = vadd.f32 %v5229_v35, %v5735_v28 }
 0x225   :  { %v3425_v32 = vadd.f32 %v3405_v9, %v3353_v10  ;;  %v3347_v57 = vadd.f32 %v3331_v30, %v3298_v2  ;;  %v3355_v51 = vmul.f32 0.27406862, %v3346_v14  ;;  %v3469_v5 = vsel %vm805_vm4, %v3467_v4, %v3468_v40  ;;  %v2437_v4 = vpop.permute.xlu1 %2436 }
 0x226   :  { %3522 = vrot.lane.b32.xlu1 %v3503_v44, %s3674_s13  ;;  %v3370_v37 = vmul.f32 0.45186275, %v3346_v14  ;;  %v5442_v21 = vmul.f32 0.27406862, %v5255_v20  ;;  %v2074_v13 = vadd.f32 %v5270_v6, %v2034_v0  ;;  %v2031_v10 = vadd.f32 %v5242_v19, %v4801_v18  ;;  %v2801_v2 = vpop.permute.xlu0 %2800  ;;  %v5738_v0 = vld [vmem:[#allocation17_spill] sm:$0xff] }
 0x227   :  { %v5447_v8 = vadd.f32 %v3469_v5, %v3425_v32  ;;  %v3371_v24 = vmul.f32 0.45186275, %v3347_v57  ;;  %v3435_v11 = vmul.f32 0.27406862, %v3347_v57  ;;  %v3473_v35 = vrot.slane %v3355_v51, 2  ;;  %v5742_v32 = vld [vmem:[#allocation33_spill] sm:$0xff] }
 0x228   :  { %v3409_v55 = vrot.slane %v3370_v37, 1  ;;  %3190 = vrot.lane.b32.xlu0 %v5442_v21, %s3675_s14  ;;  %2083 = vst.msk [vmem:[#allocation6 + $0x198] sm:$0xff] %vm942_vm5, %v2074_v13  ;;  %v2069_v20 = vadd.f32 %v5277_v38, %v2029_v52  ;;  %v2033_v43 = vadd.f32 %v5257_v34, %v4805_v42  ;;  %v2035_v40 = vadd.f32 %v5268_v23, %v4811_v62  ;;  %v5736_v34 = vld [vmem:[#allocation30_spill] sm:$0xff]  ;;  %v5737_v23 = vld [vmem:[#allocation12_spill] sm:$0xff]  ;;  %v5741_v52 = vld [vmem:[#allocation9_spill] sm:$0xff] }
 0x229   :  { %v3505_v6 = vmul.f32 0.45186275, %v5447_v8  ;;  %v3410_v22 = vrot.slane %v3371_v24, 1  ;;  %v3474_v29 = vrot.slane %v3435_v11, 2  ;;  %v5461_v18 = vmul.f32 0.27406862, %v5285_v1 }
 0x22a   :  { %2078 = vst.msk [vmem:[#allocation6 + $0x58] sm:$0xff] %vm942_vm5, %v2069_v20  ;;  %v2071_v19 = vadd.f32 %v5287_v25, %v2031_v10  ;;  %v2406_v30 = vadd.f32 %v5736_v34, %v4907_v36  ;;  %v2073_v14 = vadd.f32 %v5304_v54, %v2033_v43  ;;  %v2408_v1 = vadd.f32 %v5289_v61, %v5737_v23  ;;  %v5739_v36 = vld [vmem:[#allocation31_spill] sm:$0xff]  ;;  %v5740_v54 = vld [vmem:[#allocation34_spill] sm:$0xff]  ;;  %v5745_v5 = vld [vmem:[#allocation36_spill] sm:$0xff]  ;;  %v2805_v37 = vpop.permute.xlu0 %2804 }
 0x22b   :  { %3526 = vrot.lane.b32.xlu1 %v3505_v6, %s3674_s13  ;;  %v3411_v38 = vsel %vm740_vm3, %v3409_v55, %v3410_v22  ;;  %v3475_v42 = vsel %vm805_vm4, %v3473_v35, %v3474_v29  ;;  %v2075_v25 = vadd.f32 %v5318_v45, %v2035_v40  ;;  %v5478_v59 = vmul.f32 0.27406862, %v5325_v63  ;;  %v5743_v61 = vld [vmem:[#allocation15_spill] sm:$0xff]  ;;  %v5746_v13 = vld [vmem:[#allocation18_spill] sm:$0xff]  ;;  %v5747_v11 = vld [vmem:[#allocation24_spill] sm:$0xff]  ;;  %v2763_v55 = vpop.permute.xlu1 %2762 }
 0x22c   :  { %v3427_v62 = vadd.f32 %v3411_v38, %v3355_v51  ;;  %3556 = vrot.lane.b32.xlu0 %v5461_v18, %s3675_s14  ;;  %2080 = vst.msk [vmem:[#allocation6 + $0xd8] sm:$0xff] %vm942_vm5, %v2071_v19  ;;  %2082 = vst.msk [vmem:[#allocation6 + $0x158] sm:$0xff] %vm942_vm5, %v2073_v14  ;;  %v2410_v44 = vadd.f32 %v5739_v36, %v5738_v0  ;;  %v2446_v9 = vadd.f32 %v5740_v54, %v2406_v30  ;;  %v5744_v51 = vld [vmem:[#allocation35_spill] sm:$0xff]  ;;  %v5748_v6 = vld [vmem:[#allocation26_spill] sm:$0xff] }
 0x22d   :  { %2084 = vst.msk [vmem:[#allocation6 + $0x1d8] sm:$0xff] %vm942_vm5, %v2075_v25  ;;  %v2412_v57 = vadd.f32 %v5742_v32, %v5741_v52  ;;  %v2407_v45 = vadd.f32 %v5744_v51, %v5743_v61  ;;  %v2448_v63 = vadd.f32 %v5745_v5, %v2408_v1  ;;  %v2409_v24 = vadd.f32 %v5347_v49, %v5746_v13  ;;  %v5750_v40 = vld [vmem:[#allocation16_spill] sm:$0xff]  ;;  %v5753_v30 = vld [vmem:[#allocation25_spill] sm:$0xff]  ;;  %v5757_v51 = vld [vmem:[#allocation27_spill] sm:$0xff] }
 0x22e   :  { %v5484_v28 = vadd.f32 %v3475_v42, %v3427_v62  ;;  %2455 = vst.msk [vmem:[#allocation6 + $0x20] sm:$0xff] %vm942_vm5, %v2446_v9  ;;  %v2411_v35 = vadd.f32 %v5360_v17, %v5747_v11  ;;  %v2450_v10 = vadd.f32 %v5352_v41, %v2410_v44  ;;  %v2413_v43 = vadd.f32 %v5379_v60, %v5748_v6  ;;  %v5749_v17 = vld [vmem:[#allocation11_spill] sm:$0xff]  ;;  %v2809_v42 = vpop.permute.xlu0 %2808  ;;  %v5754_v23 = vld [vmem:[#allocation32_spill] sm:$0xff]  ;;  %v5755_v36 = vld [vmem:[#allocation13_spill] sm:$0xff] }
 0x22f   :  { %2457 = vst.msk [vmem:[#allocation6 + $0xa0] sm:$0xff] %vm942_vm5, %v2448_v63  ;;  %v2452_v22 = vadd.f32 %v5366_v46, %v2412_v57  ;;  %v2447_v49 = vadd.f32 %v5394_v27, %v2407_v45  ;;  %v2784_v41 = vadd.f32 %v5387_v16, %v5749_v17  ;;  %v2449_v29 = vadd.f32 %v5414_v26, %v2409_v24  ;;  %v5751_v46 = vld [vmem:[#allocation23_spill] sm:$0xff] }
 0x230   :  { %v3507_v20 = vmul.f32 0.45186275, %v5484_v28  ;;  %3560 = vrot.lane.b32.xlu0 %v5478_v59, %s3675_s14  ;;  %2459 = vst.msk [vmem:[#allocation6 + $0x120] sm:$0xff] %vm942_vm5, %v2450_v10  ;;  %v2786_v19 = vadd.f32 %v5404_v50, %v5750_v40  ;;  %v2451_v38 = vadd.f32 %v5429_v7, %v2411_v35  ;;  %v5515_v60 = vmul.f32 0.27406862, %v5350_v12  ;;  %v5752_v7 = vld [vmem:[#allocation29_spill] sm:$0xff] }
 0x231   :  { %2461 = vst.msk [vmem:[#allocation6 + $0x1a0] sm:$0xff] %vm942_vm5, %v2452_v22  ;;  %2456 = vst.msk [vmem:[#allocation6 + $0x60] sm:$0xff] %vm942_vm5, %v2447_v49  ;;  %v2788_v27 = vadd.f32 %v5425_v3, %v5751_v46  ;;  %v2453_v16 = vadd.f32 %v2437_v4, %v2413_v43  ;;  %v2824_v50 = vadd.f32 %v2801_v2, %v2784_v41  ;;  %v5524_v34 = vmul.f32 0.27406862, %v5752_v7  ;;  %v2767_v4 = vpop.permute.xlu1 %2766 }
 0x232   :  { %3530 = vrot.lane.b32.xlu1 %v3507_v20, %s3674_s13  ;;  %2458 = vst.msk [vmem:[#allocation6 + $0xe0] sm:$0xff] %vm942_vm5, %v2449_v29  ;;  %2460 = vst.msk [vmem:[#allocation6 + $0x160] sm:$0xff] %vm942_vm5, %v2451_v38  ;;  %v2826_v26 = vadd.f32 %v2805_v37, %v2786_v19  ;;  %v2790_v3 = vadd.f32 %v5445_v15, %v5753_v30  ;;  %v5536_v2 = vmul.f32 0.27406862, %v5385_v56  ;;  %v2813_v14 = vpop.permute.xlu0 %2812  ;;  %v5540_v1 = vmul.f32 0.27406862, %v5754_v23 }
 0x233   :  { %2462 = vst.msk [vmem:[#allocation6 + $0x1e0] sm:$0xff] %vm942_vm5, %v2453_v16  ;;  %v2828_v12 = vadd.f32 %v2809_v42, %v2788_v27  ;;  %2833 = vst.msk [vmem:[#allocation6 + $0x28] sm:$0xff] %vm942_vm5, %v2824_v50  ;;  %v5548_v25 = vmul.f32 0.27406862, %v5341_v53  ;;  %v5553_v56 = vmul.f32 0.27406862, %v5368_v39  ;;  %v2785_v44 = vadd.f32 %v2763_v55, %v5755_v36 }
 0x234   :  { %3564 = vrot.lane.b32.xlu0 %v5515_v60, %s3675_s14  ;;  %2835 = vst.msk [vmem:[#allocation6 + $0xa8] sm:$0xff] %vm942_vm5, %v2826_v26  ;;  %v2830_v62 = vadd.f32 %v2813_v14, %v2790_v3  ;;  %v5559_v54 = vmul.f32 0.27406862, %v5406_v58  ;;  %v5756_v53 = vld [vmem:[#allocation19_spill] sm:$0xff]  ;;  %v5566_v39 = vmul.f32 0.27406862, %v5427_v31 }
 0x235   :  { %2837 = vst.msk [vmem:[#allocation6 + $0x128] sm:$0xff] %vm942_vm5, %v2828_v12  ;;  %v2787_v32 = vadd.f32 %v2767_v4, %v5756_v53  ;;  %v5573_v45 = vmul.f32 0.27406862, %v5447_v8  ;;  %v5758_v37 = vld [vmem:[#allocation28_spill] sm:$0xff]  ;;  %v5580_v13 = vmul.f32 0.27406862, %v5484_v28 }
 0x236   :  { %3180 = vrot.lane.b32.xlu1 %v5524_v34, %s3675_s14  ;;  %2839 = vst.msk [vmem:[#allocation6 + $0x1a8] sm:$0xff] %vm942_vm5, %v2830_v62 }
 0x237   :  { %v2771_v15 = vpop.permute.xlu1 %2770 }
 0x238   :  { %3568 = vrot.lane.b32.xlu0 %v5536_v2, %s3675_s14  ;;  %v2789_v58 = vadd.f32 %v2771_v15, %v5757_v51 }
 0x23a   :  { %3184 = vrot.lane.b32.xlu1 %v5540_v1, %s3675_s14 }
 0x23e   :  { %3188 = vrot.lane.b32.xlu1 %v5548_v25, %s3675_s14  ;;  %v2775_v0 = vpop.permute.xlu1 %2774 }
 0x23f   :  { %v2791_v31 = vadd.f32 %v2775_v0, %v5758_v37 }
 0x242   :  { %3192 = vrot.lane.b32.xlu1 %v5553_v56, %s3675_s14  ;;  %v2803_v9 = vpop.permute.xlu1 %2802 }
 0x243   :  { %v2825_v52 = vadd.f32 %v2803_v9, %v2785_v44 }
 0x245   :  { %2834 = vst.msk [vmem:[#allocation6 + $0x68] sm:$0xff] %vm942_vm5, %v2825_v52  ;;  %v3139_v8 = vpop.permute.xlu0 %3138 }
 0x246   :  { %3558 = vrot.lane.b32.xlu1 %v5559_v54, %s3675_s14  ;;  %v2807_v57 = vpop.permute.xlu1 %2806  ;;  %v3162_v29 = vadd.f32 %v3139_v8, %v5391_v47 }
 0x247   :  { %v2827_v61 = vadd.f32 %v2807_v57, %v2787_v32 }
 0x249   :  { %2836 = vst.msk [vmem:[#allocation6 + $0xe8] sm:$0xff] %vm942_vm5, %v2827_v61 }
 0x24a   :  { %3562 = vrot.lane.b32.xlu1 %v5566_v39, %s3675_s14  ;;  %v2811_v5 = vpop.permute.xlu1 %2810 }
 0x24b   :  { %v2829_v63 = vadd.f32 %v2811_v5, %v2789_v58 }
 0x24c   :  { %v3143_v35 = vpop.permute.xlu0 %3142 }
 0x24d   :  { %2838 = vst.msk [vmem:[#allocation6 + $0x168] sm:$0xff] %vm942_vm5, %v2829_v63  ;;  %v3164_v38 = vadd.f32 %v3143_v35, %v5399_v48 }
 0x24e   :  { %3566 = vrot.lane.b32.xlu1 %v5573_v45, %s3675_s14  ;;  %v2815_v24 = vpop.permute.xlu1 %2814 }
 0x24f   :  { %v2831_v11 = vadd.f32 %v2815_v24, %v2791_v31 }
 0x251   :  { %2840 = vst.msk [vmem:[#allocation6 + $0x1e8] sm:$0xff] %vm942_vm5, %v2831_v11 }
 0x252   :  { %3570 = vrot.lane.b32.xlu1 %v5580_v13, %s3675_s14 }
 0x253   :  { %v3147_v10 = vpop.permute.xlu0 %3146 }
 0x254   :  { %v3166_v42 = vadd.f32 %v3147_v10, %v5412_v33 }
 0x25a   :  { %v3151_v55 = vpop.permute.xlu0 %3150 }
 0x25b   :  { %v3168_v12 = vadd.f32 %v3151_v55, %v5442_v21 }
 0x25f   :  { %v3141_v6 = vpop.permute.xlu1 %3140 }
 0x260   :  { %v3163_v36 = vadd.f32 %v3141_v6, %v5524_v34 }
 0x265   :  { %v3517_v20 = vpop.permute.xlu0 %3516 }
 0x266   :  { %v3540_v48 = vadd.f32 %v3517_v20, %v5461_v18 }
 0x26b   :  { %v3145_v22 = vpop.permute.xlu1 %3144 }
 0x26c   :  { %v3165_v53 = vadd.f32 %v3145_v22, %v5540_v1 }
 0x271   :  { %v3521_v43 = vpop.permute.xlu0 %3520 }
 0x272   :  { %v3542_v33 = vadd.f32 %v3521_v43, %v5478_v59 }
 0x278   :  { %v3149_v17 = vpop.permute.xlu1 %3148 }
 0x279   :  { %v3167_v61 = vadd.f32 %v3149_v17, %v5548_v25 }
 0x27d   :  { %v3525_v49 = vpop.permute.xlu0 %3524 }
 0x27e   :  { %v3544_v21 = vadd.f32 %v3525_v49, %v5515_v60 }
 0x284   :  { %v3153_v28 = vpop.permute.xlu1 %3152 }
 0x289   :  { %v3529_v41 = vpop.permute.xlu0 %3528 }
 0x28a   :  { %v3546_v9 = vadd.f32 %v3529_v41, %v5536_v2  ;;  %v3169_v2 = vadd.f32 %v3153_v28, %v5553_v56 }
 0x28d   :  { %v3179_v40 = vpop.permute.xlu0 %3178 }
 0x28e   :  { %v3202_v19 = vadd.f32 %v3179_v40, %v3162_v29 }
 0x290   :  { %3211 = vst.msk [vmem:[#allocation6 + $0x30] sm:$0xff] %vm942_vm5, %v3202_v19  ;;  %v3519_v46 = vpop.permute.xlu1 %3518 }
 0x291   :  { %v3183_v27 = vpop.permute.xlu0 %3182  ;;  %v3541_v1 = vadd.f32 %v3519_v46, %v5559_v54 }
 0x292   :  { %v3204_v16 = vadd.f32 %v3183_v27, %v3164_v38 }
 0x294   :  { %3213 = vst.msk [vmem:[#allocation6 + $0xb0] sm:$0xff] %vm942_vm5, %v3204_v16 }
 0x295   :  { %v3187_v50 = vpop.permute.xlu0 %3186 }
 0x296   :  { %v3206_v26 = vadd.f32 %v3187_v50, %v3166_v42 }
 0x298   :  { %v3523_v7 = vpop.permute.xlu1 %3522  ;;  %3215 = vst.msk [vmem:[#allocation6 + $0x130] sm:$0xff] %vm942_vm5, %v3206_v26 }
 0x299   :  { %v3543_v31 = vadd.f32 %v3523_v7, %v5566_v39 }
 0x29a   :  { %v3191_v47 = vpop.permute.xlu0 %3190 }
 0x29b   :  { %v3208_v30 = vadd.f32 %v3191_v47, %v3168_v12 }
 0x29d   :  { %3217 = vst.msk [vmem:[#allocation6 + $0x1b0] sm:$0xff] %vm942_vm5, %v3208_v30  ;;  %v3527_v3 = vpop.permute.xlu1 %3526 }
 0x29e   :  { %v3557_v4 = vpop.permute.xlu0 %3556  ;;  %v3545_v11 = vadd.f32 %v3527_v3, %v5573_v45 }
 0x29f   :  { %v3580_v14 = vadd.f32 %v3557_v4, %v3540_v48 }
 0x2a1   :  { %3589 = vst.msk [vmem:[#allocation6 + $0x38] sm:$0xff] %vm942_vm5, %v3580_v14 }
 0x2a2   :  { %v3561_v62 = vpop.permute.xlu0 %3560 }
 0x2a3   :  { %v3582_v23 = vadd.f32 %v3561_v62, %v3542_v33 }
 0x2a4   :  { %v3531_v15 = vpop.permute.xlu1 %3530 }
 0x2a5   :  { %3591 = vst.msk [vmem:[#allocation6 + $0xb8] sm:$0xff] %vm942_vm5, %v3582_v23  ;;  %v3547_v54 = vadd.f32 %v3531_v15, %v5580_v13 }
 0x2a6   :  { %v3565_v0 = vpop.permute.xlu0 %3564 }
 0x2a7   :  { %v3584_v18 = vadd.f32 %v3565_v0, %v3544_v21 }
 0x2a8   :  { %v3181_v44 = vpop.permute.xlu1 %3180 }
 0x2a9   :  { %v3203_v52 = vadd.f32 %v3181_v44, %v3163_v36  ;;  %3593 = vst.msk [vmem:[#allocation6 + $0x138] sm:$0xff] %vm942_vm5, %v3584_v18 }
 0x2aa   :  { %v3569_v59 = vpop.permute.xlu0 %3568 }
 0x2ab   :  { %3212 = vst.msk [vmem:[#allocation6 + $0x70] sm:$0xff] %vm942_vm5, %v3203_v52  ;;  %v3586_v32 = vadd.f32 %v3569_v59, %v3546_v9 }
 0x2ac   :  { %v3185_v57 = vpop.permute.xlu1 %3184 }
 0x2ad   :  { %v3205_v60 = vadd.f32 %v3185_v57, %v3165_v53  ;;  %3595 = vst.msk [vmem:[#allocation6 + $0x1b8] sm:$0xff] %vm942_vm5, %v3586_v32 }
 0x2af   :  { %3214 = vst.msk [vmem:[#allocation6 + $0xf0] sm:$0xff] %vm942_vm5, %v3205_v60 }
 0x2b0   :  { %v3189_v34 = vpop.permute.xlu1 %3188 }
 0x2b1   :  { %v3207_v51 = vadd.f32 %v3189_v34, %v3167_v61 }
 0x2b3   :  { %3216 = vst.msk [vmem:[#allocation6 + $0x170] sm:$0xff] %vm942_vm5, %v3207_v51 }
 0x2b4   :  { %v3193_v58 = vpop.permute.xlu1 %3192 }
 0x2b5   :  { %v3209_v5 = vadd.f32 %v3193_v58, %v3169_v2 }
 0x2b7   :  { %3218 = vst.msk [vmem:[#allocation6 + $0x1f0] sm:$0xff] %vm942_vm5, %v3209_v5 }
 0x2b8   :  { %v3559_v63 = vpop.permute.xlu1 %3558 }
 0x2b9   :  { %v3581_v37 = vadd.f32 %v3559_v63, %v3541_v1 }
 0x2bb   :  { %3590 = vst.msk [vmem:[#allocation6 + $0x78] sm:$0xff] %vm942_vm5, %v3581_v37 }
 0x2bc   :  { %v3563_v25 = vpop.permute.xlu1 %3562 }
 0x2bd   :  { %v3583_v24 = vadd.f32 %v3563_v25, %v3543_v31 }
 0x2bf   :  { %3592 = vst.msk [vmem:[#allocation6 + $0xf8] sm:$0xff] %vm942_vm5, %v3583_v24 }
 0x2c0   :  { %v3567_v56 = vpop.permute.xlu1 %3566 }
 0x2c1   :  { %v3585_v8 = vadd.f32 %v3567_v56, %v3545_v11 }
 0x2c3   :  { %3594 = vst.msk [vmem:[#allocation6 + $0x178] sm:$0xff] %vm942_vm5, %v3585_v8 }
 0x2c4   :  { %v3571_v35 = vpop.permute.xlu1 %3570 }
 0x2c5   :  { %v3587_v10 = vadd.f32 %v3571_v35, %v3547_v54 }
 0x2c7   :  { %3596 = vst.msk [vmem:[#allocation6 + $0x1f8] sm:$0xff] %vm942_vm5, %v3587_v10 }
 0x2c8   :  { %3656 = shalt.err (!%p3653_p9)
}
 0x2c9   :  { %3608 = dma.vmem_to_hbm [thread:$0]  %s3603_s16, 8192, %s5624_s1, [#allocation5], %s3670_s9, %s3670_s9, %s3671_s10  }
 0x2ca   :  { %3667 = dma.done.wait [#allocation5], 8192  }
 0x2cb   :  { %3668 = vsyncadd [#allocation5], 4294959104 }
 0x2cc   :  { %3612 = vsyncpa [#allocation4], 1 }
 0x2cd   :  { %3613 = vsyncpa [#allocation5], 1 }

</bundles_post_ra>
